<compile_context>
chip_gen: v7x
topology: tpu7x:2x2x1
jax: 0.10.0
libtpu: 0.0.40
codegen_flags: <defaults>
</compile_context>

<pallas_src>
import functools

import jax
import jax.numpy as jnp
from jax import lax
from jax.experimental import pallas as pl
from jax.experimental.pallas import tpu as pltpu


# ------------------------------ in-kernel helpers ------------------------------

def _layer_norm(x, g, b, eps=1e-5):
    mean = jnp.mean(x, axis=-1, keepdims=True)
    c = x - mean
    var = jnp.mean(c * c, axis=-1, keepdims=True)
    return c * lax.rsqrt(var + eps) * g + b


# ------------------------------ the fused kernel -------------------------------

def _decoder_block_kernel(
        x_ref, mem_ref, tgt_mask_ref, src_mask_ref,
        wqkv_s_ref, bqkv_s_ref, wo_s_ref, bo_s_ref, lng_ref, lnb_ref,
        wq_c_ref, bq_c_ref, wkv_c_ref, bkv_c_ref, wo_c_ref, bo_c_ref,
        ln1g_ref, ln1b_ref, wff1_ref, bff1_ref, wff2_ref, bff2_ref,
        ln2g_ref, ln2b_ref,
        o_ref,
        ctx_ref,
        *, heads, embed_size, nb, lq, lk):
    E = embed_size
    hd = E // heads
    bf16 = jnp.bfloat16
    f32 = jnp.float32
    inv_scale = jnp.float32(1.0 / (float(E) ** 0.5))

    x = x_ref[...]                          # (nb*lq, E) f32  (batch folded into rows)
    mem_bf = mem_ref[...].astype(bf16)      # (nb*lk, E) bf16

    def mha(q_bf, k_bf, v_bf, mask_ref, wo_ref, bo_ref, kv_len):
        """q_bf pre-scaled (nb*lq, E) bf16; k/v (nb*kv_len, E) bf16.

        Writes every head's (lq, hd) context into the head-concat layout of
        ctx_ref, then does ONE full-depth (K=E) output projection.
        """
        for b in range(nb):                                   # static unroll
            # mask -> additive bias, computed ONCE per batch (hoisted out of head loop)
            m = mask_ref[b].astype(f32)                       # (lq, kv_len)
            bias = jnp.where(m == 0.0, f32(-1e20), f32(0.0))
            q_rows = slice(b * lq, (b + 1) * lq)
            k_rows = slice(b * kv_len, (b + 1) * kv_len)
            for h in range(heads):                            # static unroll
                cols = slice(h * hd, (h + 1) * hd)
                qh = q_bf[q_rows, cols]                       # (lq, hd)
                kh = k_bf[k_rows, cols]                       # (kv, hd)
                vh = v_bf[k_rows, cols]                       # (kv, hd)
                # q @ k^T via dot_general (no materialized transpose)
                s = lax.dot_general(qh, kh, (((1,), (1,)), ((), ())),
                                    preferred_element_type=f32)   # (lq, kv)
                s = s + bias
                s = s - jnp.max(s, axis=-1, keepdims=True)
                p = jnp.exp(s)
                p = p * pl.reciprocal(jnp.sum(p, axis=-1, keepdims=True), approx=True)
                oh = jnp.dot(p.astype(bf16), vh, preferred_element_type=f32)  # (lq, hd)
                ctx_ref[q_rows, cols] = oh                    # head-concat layout
        # single full-K output projection for ALL heads and batches at once
        return jnp.dot(ctx_ref[...].astype(bf16), wo_ref[...],
                       preferred_element_type=f32) + bo_ref[...]

    # ---- masked self attention: one fused QKV matmul (K = E) ----
    qkv = jnp.dot(x.astype(bf16), wqkv_s_ref[...],
                  preferred_element_type=f32) + bqkv_s_ref[...]          # (R, 3E) f32
    q_s = (qkv[:, 0 * E:1 * E] * inv_scale).astype(bf16)   # pre-scaled once
    k_s = qkv[:, 1 * E:2 * E].astype(bf16)
    v_s = qkv[:, 2 * E:3 * E].astype(bf16)
    attn = mha(q_s, k_s, v_s, tgt_mask_ref, wo_s_ref, bo_s_ref, lq)
    # TODO(synk): nn.Dropout is a no-op at inference; treated as identity.
    query = _layer_norm(attn + x, lng_ref[...], lnb_ref[...])            # (R, E) f32

    # ---- transformer block: cross attention (K,V from memory, Q from query) ----
    q_c = jnp.dot(query.astype(bf16), wq_c_ref[...],
                  preferred_element_type=f32) + bq_c_ref[...]
    q_c = (q_c * inv_scale).astype(bf16)
    kv = jnp.dot(mem_bf, wkv_c_ref[...],
                 preferred_element_type=f32) + bkv_c_ref[...]            # (nb*lk, 2E)
    k_c = kv[:, 0 * E:1 * E].astype(bf16)
    v_c = kv[:, 1 * E:2 * E].astype(bf16)
    cross = mha(q_c, k_c, v_c, src_mask_ref, wo_c_ref, bo_c_ref, lk)
    x2 = _layer_norm(cross + query, ln1g_ref[...], ln1b_ref[...])        # (R, E) f32

    # ---- feed forward + residual + norm2 (all fused, bf16 matmuls) ----
    h1 = jnp.maximum(
        jnp.dot(x2.astype(bf16), wff1_ref[...],
                preferred_element_type=f32) + bff1_ref[...], 0.0)        # (R, 4E)
    ff = jnp.dot(h1.astype(bf16), wff2_ref[...],
                 preferred_element_type=f32) + bff2_ref[...]             # (R, E)
    o_ref[...] = _layer_norm(ff + x2, ln2g_ref[...], ln2b_ref[...])


# ------------------------------ python wrapper ----------------------------------

def _pick_batch_tile(n, max_nb=8):
    """Largest divisor of n that is <= max_nb (batches per grid step)."""
    nb = min(n, max_nb)
    while n % nb:
        nb -= 1
    return nb


def decoder_block(x, memory, src_mask, tgt_mask, p, embed_size, heads,
                  max_batch_per_step=8):
    """x: (N, Lq, E) f32, memory: (N, Lk, E) f32,
       src_mask: (N, Lq, Lk), tgt_mask: (N, Lq, Lq) int8/float {0,1} (nonzero = attend).
       p: parameter dict from init_params (weights pre-fused, bf16)."""
    N, Lq, E = x.shape
    Lk = memory.shape[1]

    nb = _pick_batch_tile(N, max_batch_per_step)
    grid = (N // nb,)
    rq = nb * Lq      # query rows per grid step (note: needs rq % 8 == 0 when grid > 1)
    rk = nb * Lk

    # Free metadata-only reshapes: fold batch into the row dim outside the kernel.
    x2d = x.reshape(N * Lq, E)
    mem2d = memory.reshape(N * Lk, E)

    def const2d(arr):
        r, c = arr.shape
        return pl.BlockSpec((r, c), lambda i: (0, 0))   # same block every step -> no re-DMA

    in_specs = [
        pl.BlockSpec((rq, E), lambda i: (i, 0)),          # x2d
        pl.BlockSpec((rk, E), lambda i: (i, 0)),          # mem2d
        pl.BlockSpec((nb, Lq, Lq), lambda i: (i, 0, 0)),  # tgt_mask (int8)
        pl.BlockSpec((nb, Lq, Lk), lambda i: (i, 0, 0)),  # src_mask (int8)
        const2d(p["wqkv_s"]), const2d(p["bqkv_s"]),
        const2d(p["wo_s"]), const2d(p["bo_s"]),
        const2d(p["ln_g"]), const2d(p["ln_b"]),
        const2d(p["wq_c"]), const2d(p["bq_c"]),
        const2d(p["wkv_c"]), const2d(p["bkv_c"]),
        const2d(p["wo_c"]), const2d(p["bo_c"]),
        const2d(p["ln1_g"]), const2d(p["ln1_b"]),
        const2d(p["w_ff1"]), const2d(p["b_ff1"]),
        const2d(p["w_ff2"]), const2d(p["b_ff2"]),
        const2d(p["ln2_g"]), const2d(p["ln2_b"]),
    ]

    # Generation-aware VMEM limit: use ~3/4 of physical VMEM (raises the cap on
    # v5e/v6e's 128 MiB, stays safe on v7x's 64 MiB).
    try:
        phys = pltpu.get_tpu_info().vmem_capacity_bytes
        vmem_limit = min((int(phys) * 3) // 4, 100 * 1024 * 1024)
    except Exception:
        vmem_limit = 48 * 1024 * 1024

    out2d = pl.pallas_call(
        functools.partial(_decoder_block_kernel,
                          heads=heads, embed_size=E, nb=nb, lq=Lq, lk=Lk),
        out_shape=jax.ShapeDtypeStruct((N * Lq, E), jnp.float32),
        grid=grid,
        in_specs=in_specs,
        out_specs=pl.BlockSpec((rq, E), lambda i: (i, 0)),
        scratch_shapes=[pltpu.VMEM((rq, E), jnp.float32)],   # head-concat context buffer
        compiler_params=pltpu.CompilerParams(
            dimension_semantics=("parallel",),   # shard batch tiles across v7x cores
            vmem_limit_bytes=vmem_limit,
        ),
    )(x2d, mem2d, tgt_mask, src_mask,
      p["wqkv_s"], p["bqkv_s"], p["wo_s"], p["bo_s"], p["ln_g"], p["ln_b"],
      p["wq_c"], p["bq_c"], p["wkv_c"], p["bkv_c"], p["wo_c"], p["bo_c"],
      p["ln1_g"], p["ln1_b"],
      p["w_ff1"], p["b_ff1"], p["w_ff2"], p["b_ff2"],
      p["ln2_g"], p["ln2_b"])

    return out2d.reshape(N, Lq, E)


# ------------------------------ parameter init ----------------------------------

def init_params(key, embed_size, forward_expansion):
    """Weights are fused (QKV / KV concat) and cast to bf16 ONCE here, so the
    forward call does no per-call concatenation or dtype rewrites."""
    E = embed_size
    hidden = forward_expansion * E
    bf = jnp.bfloat16

    def dense(k, fan_in, fan_out):
        kw, kb = jax.random.split(k)
        w = jax.random.normal(kw, (fan_in, fan_out), jnp.float32) * 0.05
        b = jax.random.normal(kb, (fan_out,), jnp.float32) * 0.01
        return w, b

    ks = jax.random.split(key, 10)
    wq_s, bq_s = dense(ks[0], E, E)
    wk_s, bk_s = dense(ks[1], E, E)
    wv_s, bv_s = dense(ks[2], E, E)
    wo_s, bo_s = dense(ks[3], E, E)
    wq_c, bq_c = dense(ks[4], E, E)
    wk_c, bk_c = dense(ks[5], E, E)
    wv_c, bv_c = dense(ks[6], E, E)
    wo_c, bo_c = dense(ks[7], E, E)
    w_ff1, b_ff1 = dense(ks[8], E, hidden)
    w_ff2, b_ff2 = dense(ks[9], hidden, E)

    ones = jnp.ones((1, E), jnp.float32)
    zeros = jnp.zeros((1, E), jnp.float32)
    return dict(
        # self attention: fused [q | k | v] projection
        wqkv_s=jnp.concatenate([wq_s, wk_s, wv_s], axis=1).astype(bf),     # (E, 3E) bf16
        bqkv_s=jnp.concatenate([bq_s, bk_s, bv_s]).reshape(1, 3 * E),      # (1, 3E) f32
        wo_s=wo_s.astype(bf), bo_s=bo_s.reshape(1, E),
        ln_g=ones, ln_b=zeros,
        # cross attention: separate Q, fused [k | v] from memory
        wq_c=wq_c.astype(bf), bq_c=bq_c.reshape(1, E),
        wkv_c=jnp.concatenate([wk_c, wv_c], axis=1).astype(bf),            # (E, 2E) bf16
        bkv_c=jnp.concatenate([bk_c, bv_c]).reshape(1, 2 * E),
        wo_c=wo_c.astype(bf), bo_c=bo_c.reshape(1, E),
        ln1_g=ones, ln1_b=zeros,
        # feed forward
        w_ff1=w_ff1.astype(bf), b_ff1=b_ff1.reshape(1, hidden),
        w_ff2=w_ff2.astype(bf), b_ff2=b_ff2.reshape(1, E),
        ln2_g=ones, ln2_b=zeros,
    )


# ----------------------------------- main ----------------------------------------

if __name__ == "__main__":
    embed_size = 32
    heads = 4
    forward_expansion = 4
    N, Lq, Lk = 2, 8, 8

    key = jax.random.PRNGKey(0)
    kx, km = jax.random.split(key)
    x = jax.random.normal(kx, (N, Lq, embed_size), jnp.float32)
    memory = jax.random.normal(km, (N, Lk, embed_size), jnp.float32)

    # int8 masks (4x fewer HBM bytes than f32): causal target mask, all-ones source.
    tgt_mask = jnp.broadcast_to(
        jnp.tril(jnp.ones((Lq, Lq), jnp.int8))[None], (N, Lq, Lq))
    src_mask = jnp.ones((N, Lq, Lk), jnp.int8)

    params = init_params(jax.random.PRNGKey(42), embed_size, forward_expansion)

    fn = jax.jit(functools.partial(decoder_block,
                                   embed_size=embed_size, heads=heads))
    out = fn(x, memory, src_mask, tgt_mask, params)
    jax.block_until_ready(out)
    assert out.shape == (N, Lq, embed_size)
    assert bool(jnp.all(jnp.isfinite(out)))
    print("KERNEL_OK")
</pallas_src>

<mosaic_0001>
module attributes {stable_mosaic.version = 11 : i64} {
  func.func @_decoder_block_kernel(%arg0: i32, %arg1: memref<16x32xf32, #tpu.memory_space<vmem>>, %arg2: memref<16x32xf32, #tpu.memory_space<vmem>>, %arg3: memref<2x8x8xi8, #tpu.memory_space<vmem>>, %arg4: memref<2x8x8xi8, #tpu.memory_space<vmem>>, %arg5: memref<32x96xbf16, #tpu.memory_space<vmem>>, %arg6: memref<1x96xf32, #tpu.memory_space<vmem>>, %arg7: memref<32x32xbf16, #tpu.memory_space<vmem>>, %arg8: memref<1x32xf32, #tpu.memory_space<vmem>>, %arg9: memref<1x32xf32, #tpu.memory_space<vmem>>, %arg10: memref<1x32xf32, #tpu.memory_space<vmem>>, %arg11: memref<32x32xbf16, #tpu.memory_space<vmem>>, %arg12: memref<1x32xf32, #tpu.memory_space<vmem>>, %arg13: memref<32x64xbf16, #tpu.memory_space<vmem>>, %arg14: memref<1x64xf32, #tpu.memory_space<vmem>>, %arg15: memref<32x32xbf16, #tpu.memory_space<vmem>>, %arg16: memref<1x32xf32, #tpu.memory_space<vmem>>, %arg17: memref<1x32xf32, #tpu.memory_space<vmem>>, %arg18: memref<1x32xf32, #tpu.memory_space<vmem>>, %arg19: memref<32x128xbf16, #tpu.memory_space<vmem>>, %arg20: memref<1x128xf32, #tpu.memory_space<vmem>>, %arg21: memref<128x32xbf16, #tpu.memory_space<vmem>>, %arg22: memref<1x32xf32, #tpu.memory_space<vmem>>, %arg23: memref<1x32xf32, #tpu.memory_space<vmem>>, %arg24: memref<1x32xf32, #tpu.memory_space<vmem>>, %arg25: memref<16x32xf32, #tpu.memory_space<vmem>>, %arg26: memref<16x32xf32, #tpu.memory_space<vmem>>) attributes {dimension_semantics = [#tpu.dimension_semantics<parallel>], iteration_bounds = array<i64: 1>, scalar_prefetch = 0 : i64, scratch_operands = 1 : i64, tpu.core_type = #tpu.core_type<tc>, window_params = [{transform_indices = @transform_0, window_bounds = array<i64: 16, 32>}, {transform_indices = @transform_1, window_bounds = array<i64: 16, 32>}, {transform_indices = @transform_2, window_bounds = array<i64: 2, 8, 8>}, {transform_indices = @transform_3, window_bounds = array<i64: 2, 8, 8>}, {pipeline_mode = #tpu.pipeline_mode<synchronous>, transform_indices = @transform_4, window_bounds = array<i64: 32, 96>}, {pipeline_mode = #tpu.pipeline_mode<synchronous>, transform_indices = @transform_5, window_bounds = array<i64: 1, 96>}, {pipeline_mode = #tpu.pipeline_mode<synchronous>, transform_indices = @transform_6, window_bounds = array<i64: 32, 32>}, {pipeline_mode = #tpu.pipeline_mode<synchronous>, transform_indices = @transform_7, window_bounds = array<i64: 1, 32>}, {pipeline_mode = #tpu.pipeline_mode<synchronous>, transform_indices = @transform_8, window_bounds = array<i64: 1, 32>}, {pipeline_mode = #tpu.pipeline_mode<synchronous>, transform_indices = @transform_9, window_bounds = array<i64: 1, 32>}, {pipeline_mode = #tpu.pipeline_mode<synchronous>, transform_indices = @transform_10, window_bounds = array<i64: 32, 32>}, {pipeline_mode = #tpu.pipeline_mode<synchronous>, transform_indices = @transform_11, window_bounds = array<i64: 1, 32>}, {pipeline_mode = #tpu.pipeline_mode<synchronous>, transform_indices = @transform_12, window_bounds = array<i64: 32, 64>}, {pipeline_mode = #tpu.pipeline_mode<synchronous>, transform_indices = @transform_13, window_bounds = array<i64: 1, 64>}, {pipeline_mode = #tpu.pipeline_mode<synchronous>, transform_indices = @transform_14, window_bounds = array<i64: 32, 32>}, {pipeline_mode = #tpu.pipeline_mode<synchronous>, transform_indices = @transform_15, window_bounds = array<i64: 1, 32>}, {pipeline_mode = #tpu.pipeline_mode<synchronous>, transform_indices = @transform_16, window_bounds = array<i64: 1, 32>}, {pipeline_mode = #tpu.pipeline_mode<synchronous>, transform_indices = @transform_17, window_bounds = array<i64: 1, 32>}, {pipeline_mode = #tpu.pipeline_mode<synchronous>, transform_indices = @transform_18, window_bounds = array<i64: 32, 128>}, {pipeline_mode = #tpu.pipeline_mode<synchronous>, transform_indices = @transform_19, window_bounds = array<i64: 1, 128>}, {pipeline_mode = #tpu.pipeline_mode<synchronous>, transform_indices = @transform_20, window_bounds = array<i64: 128, 32>}, {pipeline_mode = #tpu.pipeline_mode<synchronous>, transform_indices = @transform_21, window_bounds = array<i64: 1, 32>}, {pipeline_mode = #tpu.pipeline_mode<synchronous>, transform_indices = @transform_22, window_bounds = array<i64: 1, 32>}, {pipeline_mode = #tpu.pipeline_mode<synchronous>, transform_indices = @transform_23, window_bounds = array<i64: 1, 32>}, {transform_indices = @transform_24, window_bounds = array<i64: 16, 32>}]} {
    %c0 = arith.constant 0 : index
    %c0_0 = arith.constant 0 : index
    %0 = vector.load %arg1[%c0, %c0_0] : memref<16x32xf32, #tpu.memory_space<vmem>>, vector<16x32xf32>
    %c0_1 = arith.constant 0 : index
    %c0_2 = arith.constant 0 : index
    %1 = vector.load %arg2[%c0_1, %c0_2] : memref<16x32xf32, #tpu.memory_space<vmem>>, vector<16x32xf32>
    %2 = arith.truncf %1 : vector<16x32xf32> to vector<16x32xbf16>
    %3 = arith.truncf %0 : vector<16x32xf32> to vector<16x32xbf16>
    %c0_3 = arith.constant 0 : index
    %c0_4 = arith.constant 0 : index
    %4 = vector.load %arg5[%c0_3, %c0_4] : memref<32x96xbf16, #tpu.memory_space<vmem>>, vector<32x96xbf16>
    %cst = arith.constant dense<0.000000e+00> : vector<16x96xf32>
    %5 = tpu.matmul %3, %4, %cst {dimension_numbers = #tpu.dot_dimension_numbers<[1], [0], [0], [1], [0, 0, 1, 1], [], []>} : vector<16x32xbf16>, vector<32x96xbf16>, vector<16x96xf32> -> vector<16x96xf32>
    %c0_5 = arith.constant 0 : index
    %c0_6 = arith.constant 0 : index
    %6 = vector.load %arg6[%c0_5, %c0_6] : memref<1x96xf32, #tpu.memory_space<vmem>>, vector<1x96xf32>
    %7 = vector.broadcast %6 : vector<1x96xf32> to vector<16x96xf32>
    %8 = arith.addf %5, %7 : vector<16x96xf32>
    %9 = vector.extract_strided_slice %8 {offsets = [0, 0], sizes = [16, 32], strides = [1, 1]} : vector<16x96xf32> to vector<16x32xf32>
    %cst_7 = arith.constant 0.176776692 : f32
    %10 = vector.broadcast %cst_7 : f32 to vector<16x32xf32>
    %11 = arith.mulf %9, %10 : vector<16x32xf32>
    %12 = arith.truncf %11 : vector<16x32xf32> to vector<16x32xbf16>
    %13 = vector.extract_strided_slice %8 {offsets = [0, 32], sizes = [16, 32], strides = [1, 1]} : vector<16x96xf32> to vector<16x32xf32>
    %14 = arith.truncf %13 : vector<16x32xf32> to vector<16x32xbf16>
    %15 = vector.extract_strided_slice %8 {offsets = [0, 64], sizes = [16, 32], strides = [1, 1]} : vector<16x96xf32> to vector<16x32xf32>
    %16 = arith.truncf %15 : vector<16x32xf32> to vector<16x32xbf16>
    %c0_8 = arith.constant 0 : index
    %c0_9 = arith.constant 0 : index
    %c0_10 = arith.constant 0 : index
    %17 = vector.load %arg3[%c0_8, %c0_9, %c0_10] : memref<2x8x8xi8, #tpu.memory_space<vmem>>, vector<1x8x8xi8>
    %18 = vector.shape_cast %17 : vector<1x8x8xi8> to vector<8x8xi8>
    %19 = arith.sitofp %18 : vector<8x8xi8> to vector<8x8xf32>
    %cst_11 = arith.constant 0.000000e+00 : f32
    %20 = vector.broadcast %cst_11 : f32 to vector<8x8xf32>
    %21 = arith.cmpf oeq, %19, %20 : vector<8x8xf32>
    %cst_12 = arith.constant -1.000000e+20 : f32
    %cst_13 = arith.constant 0.000000e+00 : f32
    %22 = vector.broadcast %cst_12 : f32 to vector<8x8xf32>
    %23 = vector.broadcast %cst_13 : f32 to vector<8x8xf32>
    %24 = arith.select %21, %22, %23 : vector<8x8xi1>, vector<8x8xf32>
    %25 = vector.extract_strided_slice %12 {offsets = [0, 0], sizes = [8, 8], strides = [1, 1]} : vector<16x32xbf16> to vector<8x8xbf16>
    %26 = vector.extract_strided_slice %14 {offsets = [0, 0], sizes = [8, 8], strides = [1, 1]} : vector<16x32xbf16> to vector<8x8xbf16>
    %27 = vector.extract_strided_slice %16 {offsets = [0, 0], sizes = [8, 8], strides = [1, 1]} : vector<16x32xbf16> to vector<8x8xbf16>
    %cst_14 = arith.constant dense<0.000000e+00> : vector<8x8xf32>
    %28 = tpu.matmul %25, %26, %cst_14 {dimension_numbers = #tpu.dot_dimension_numbers<[1], [1], [0], [0], [0, 0, 1, 0], [], []>} : vector<8x8xbf16>, vector<8x8xbf16>, vector<8x8xf32> -> vector<8x8xf32>
    %29 = arith.addf %28, %24 : vector<8x8xf32>
    %cst_15 = arith.constant dense<0xFF800000> : vector<8xf32>
    %30 = vector.multi_reduction <maximumf>, %29, %cst_15 [1] : vector<8x8xf32> to vector<8xf32>
    %31 = vector.shape_cast %30 : vector<8xf32> to vector<8x1xf32>
    %32 = vector.broadcast %31 : vector<8x1xf32> to vector<8x8xf32>
    %33 = arith.subf %29, %32 : vector<8x8xf32>
    %34 = math.exp %33 : vector<8x8xf32>
    %cst_16 = arith.constant dense<0.000000e+00> : vector<8xf32>
    %35 = vector.multi_reduction <add>, %34, %cst_16 [1] : vector<8x8xf32> to vector<8xf32>
    %36 = vector.shape_cast %35 : vector<8xf32> to vector<8x1xf32>
    %37 = tpu.reciprocal %36 {approx = true} : vector<8x1xf32> -> vector<8x1xf32>
    %38 = vector.broadcast %37 : vector<8x1xf32> to vector<8x8xf32>
    %39 = arith.mulf %34, %38 : vector<8x8xf32>
    %40 = arith.truncf %39 : vector<8x8xf32> to vector<8x8xbf16>
    %cst_17 = arith.constant dense<0.000000e+00> : vector<8x8xf32>
    %41 = tpu.matmul %40, %27, %cst_17 {dimension_numbers = #tpu.dot_dimension_numbers<[1], [0], [0], [1], [0, 0, 1, 1], [], []>} : vector<8x8xbf16>, vector<8x8xbf16>, vector<8x8xf32> -> vector<8x8xf32>
    %c0_18 = arith.constant 0 : index
    %c0_19 = arith.constant 0 : index
    %42 = vector.load %arg26[%c0_18, %c0_19] : memref<16x32xf32, #tpu.memory_space<vmem>>, vector<8x8xf32>
    tpu.vector_store %arg26[%c0_18, %c0_19], %41 {strides = array<i32>} : memref<16x32xf32, #tpu.memory_space<vmem>>, vector<8x8xf32>,
    %43 = vector.extract_strided_slice %12 {offsets = [0, 8], sizes = [8, 8], strides = [1, 1]} : vector<16x32xbf16> to vector<8x8xbf16>
    %44 = vector.extract_strided_slice %14 {offsets = [0, 8], sizes = [8, 8], strides = [1, 1]} : vector<16x32xbf16> to vector<8x8xbf16>
    %45 = vector.extract_strided_slice %16 {offsets = [0, 8], sizes = [8, 8], strides = [1, 1]} : vector<16x32xbf16> to vector<8x8xbf16>
    %cst_20 = arith.constant dense<0.000000e+00> : vector<8x8xf32>
    %46 = tpu.matmul %43, %44, %cst_20 {dimension_numbers = #tpu.dot_dimension_numbers<[1], [1], [0], [0], [0, 0, 1, 0], [], []>} : vector<8x8xbf16>, vector<8x8xbf16>, vector<8x8xf32> -> vector<8x8xf32>
    %47 = arith.addf %46, %24 : vector<8x8xf32>
    %cst_21 = arith.constant dense<0xFF800000> : vector<8xf32>
    %48 = vector.multi_reduction <maximumf>, %47, %cst_21 [1] : vector<8x8xf32> to vector<8xf32>
    %49 = vector.shape_cast %48 : vector<8xf32> to vector<8x1xf32>
    %50 = vector.broadcast %49 : vector<8x1xf32> to vector<8x8xf32>
    %51 = arith.subf %47, %50 : vector<8x8xf32>
    %52 = math.exp %51 : vector<8x8xf32>
    %cst_22 = arith.constant dense<0.000000e+00> : vector<8xf32>
    %53 = vector.multi_reduction <add>, %52, %cst_22 [1] : vector<8x8xf32> to vector<8xf32>
    %54 = vector.shape_cast %53 : vector<8xf32> to vector<8x1xf32>
    %55 = tpu.reciprocal %54 {approx = true} : vector<8x1xf32> -> vector<8x1xf32>
    %56 = vector.broadcast %55 : vector<8x1xf32> to vector<8x8xf32>
    %57 = arith.mulf %52, %56 : vector<8x8xf32>
    %58 = arith.truncf %57 : vector<8x8xf32> to vector<8x8xbf16>
    %cst_23 = arith.constant dense<0.000000e+00> : vector<8x8xf32>
    %59 = tpu.matmul %58, %45, %cst_23 {dimension_numbers = #tpu.dot_dimension_numbers<[1], [0], [0], [1], [0, 0, 1, 1], [], []>} : vector<8x8xbf16>, vector<8x8xbf16>, vector<8x8xf32> -> vector<8x8xf32>
    %c0_24 = arith.constant 0 : index
    %c8 = arith.constant 8 : index
    %60 = vector.load %arg26[%c0_24, %c8] : memref<16x32xf32, #tpu.memory_space<vmem>>, vector<8x8xf32>
    tpu.vector_store %arg26[%c0_24, %c8], %59 {strides = array<i32>} : memref<16x32xf32, #tpu.memory_space<vmem>>, vector<8x8xf32>,
    %61 = vector.extract_strided_slice %12 {offsets = [0, 16], sizes = [8, 8], strides = [1, 1]} : vector<16x32xbf16> to vector<8x8xbf16>
    %62 = vector.extract_strided_slice %14 {offsets = [0, 16], sizes = [8, 8], strides = [1, 1]} : vector<16x32xbf16> to vector<8x8xbf16>
    %63 = vector.extract_strided_slice %16 {offsets = [0, 16], sizes = [8, 8], strides = [1, 1]} : vector<16x32xbf16> to vector<8x8xbf16>
    %cst_25 = arith.constant dense<0.000000e+00> : vector<8x8xf32>
    %64 = tpu.matmul %61, %62, %cst_25 {dimension_numbers = #tpu.dot_dimension_numbers<[1], [1], [0], [0], [0, 0, 1, 0], [], []>} : vector<8x8xbf16>, vector<8x8xbf16>, vector<8x8xf32> -> vector<8x8xf32>
    %65 = arith.addf %64, %24 : vector<8x8xf32>
    %cst_26 = arith.constant dense<0xFF800000> : vector<8xf32>
    %66 = vector.multi_reduction <maximumf>, %65, %cst_26 [1] : vector<8x8xf32> to vector<8xf32>
    %67 = vector.shape_cast %66 : vector<8xf32> to vector<8x1xf32>
    %68 = vector.broadcast %67 : vector<8x1xf32> to vector<8x8xf32>
    %69 = arith.subf %65, %68 : vector<8x8xf32>
    %70 = math.exp %69 : vector<8x8xf32>
    %cst_27 = arith.constant dense<0.000000e+00> : vector<8xf32>
    %71 = vector.multi_reduction <add>, %70, %cst_27 [1] : vector<8x8xf32> to vector<8xf32>
    %72 = vector.shape_cast %71 : vector<8xf32> to vector<8x1xf32>
    %73 = tpu.reciprocal %72 {approx = true} : vector<8x1xf32> -> vector<8x1xf32>
    %74 = vector.broadcast %73 : vector<8x1xf32> to vector<8x8xf32>
    %75 = arith.mulf %70, %74 : vector<8x8xf32>
    %76 = arith.truncf %75 : vector<8x8xf32> to vector<8x8xbf16>
    %cst_28 = arith.constant dense<0.000000e+00> : vector<8x8xf32>
    %77 = tpu.matmul %76, %63, %cst_28 {dimension_numbers = #tpu.dot_dimension_numbers<[1], [0], [0], [1], [0, 0, 1, 1], [], []>} : vector<8x8xbf16>, vector<8x8xbf16>, vector<8x8xf32> -> vector<8x8xf32>
    %c0_29 = arith.constant 0 : index
    %c16 = arith.constant 16 : index
    %78 = vector.load %arg26[%c0_29, %c16] : memref<16x32xf32, #tpu.memory_space<vmem>>, vector<8x8xf32>
    tpu.vector_store %arg26[%c0_29, %c16], %77 {strides = array<i32>} : memref<16x32xf32, #tpu.memory_space<vmem>>, vector<8x8xf32>,
    %79 = vector.extract_strided_slice %12 {offsets = [0, 24], sizes = [8, 8], strides = [1, 1]} : vector<16x32xbf16> to vector<8x8xbf16>
    %80 = vector.extract_strided_slice %14 {offsets = [0, 24], sizes = [8, 8], strides = [1, 1]} : vector<16x32xbf16> to vector<8x8xbf16>
    %81 = vector.extract_strided_slice %16 {offsets = [0, 24], sizes = [8, 8], strides = [1, 1]} : vector<16x32xbf16> to vector<8x8xbf16>
    %cst_30 = arith.constant dense<0.000000e+00> : vector<8x8xf32>
    %82 = tpu.matmul %79, %80, %cst_30 {dimension_numbers = #tpu.dot_dimension_numbers<[1], [1], [0], [0], [0, 0, 1, 0], [], []>} : vector<8x8xbf16>, vector<8x8xbf16>, vector<8x8xf32> -> vector<8x8xf32>
    %83 = arith.addf %82, %24 : vector<8x8xf32>
    %cst_31 = arith.constant dense<0xFF800000> : vector<8xf32>
    %84 = vector.multi_reduction <maximumf>, %83, %cst_31 [1] : vector<8x8xf32> to vector<8xf32>
    %85 = vector.shape_cast %84 : vector<8xf32> to vector<8x1xf32>
    %86 = vector.broadcast %85 : vector<8x1xf32> to vector<8x8xf32>
    %87 = arith.subf %83, %86 : vector<8x8xf32>
    %88 = math.exp %87 : vector<8x8xf32>
    %cst_32 = arith.constant dense<0.000000e+00> : vector<8xf32>
    %89 = vector.multi_reduction <add>, %88, %cst_32 [1] : vector<8x8xf32> to vector<8xf32>
    %90 = vector.shape_cast %89 : vector<8xf32> to vector<8x1xf32>
    %91 = tpu.reciprocal %90 {approx = true} : vector<8x1xf32> -> vector<8x1xf32>
    %92 = vector.broadcast %91 : vector<8x1xf32> to vector<8x8xf32>
    %93 = arith.mulf %88, %92 : vector<8x8xf32>
    %94 = arith.truncf %93 : vector<8x8xf32> to vector<8x8xbf16>
    %cst_33 = arith.constant dense<0.000000e+00> : vector<8x8xf32>
    %95 = tpu.matmul %94, %81, %cst_33 {dimension_numbers = #tpu.dot_dimension_numbers<[1], [0], [0], [1], [0, 0, 1, 1], [], []>} : vector<8x8xbf16>, vector<8x8xbf16>, vector<8x8xf32> -> vector<8x8xf32>
    %c0_34 = arith.constant 0 : index
    %c24 = arith.constant 24 : index
    %96 = vector.load %arg26[%c0_34, %c24] : memref<16x32xf32, #tpu.memory_space<vmem>>, vector<8x8xf32>
    tpu.vector_store %arg26[%c0_34, %c24], %95 {strides = array<i32>} : memref<16x32xf32, #tpu.memory_space<vmem>>, vector<8x8xf32>,
    %c1 = arith.constant 1 : index
    %c0_35 = arith.constant 0 : index
    %c0_36 = arith.constant 0 : index
    %97 = vector.load %arg3[%c1, %c0_35, %c0_36] : memref<2x8x8xi8, #tpu.memory_space<vmem>>, vector<1x8x8xi8>
    %98 = vector.shape_cast %97 : vector<1x8x8xi8> to vector<8x8xi8>
    %99 = arith.sitofp %98 : vector<8x8xi8> to vector<8x8xf32>
    %cst_37 = arith.constant 0.000000e+00 : f32
    %100 = vector.broadcast %cst_37 : f32 to vector<8x8xf32>
    %101 = arith.cmpf oeq, %99, %100 : vector<8x8xf32>
    %cst_38 = arith.constant -1.000000e+20 : f32
    %cst_39 = arith.constant 0.000000e+00 : f32
    %102 = vector.broadcast %cst_38 : f32 to vector<8x8xf32>
    %103 = vector.broadcast %cst_39 : f32 to vector<8x8xf32>
    %104 = arith.select %101, %102, %103 : vector<8x8xi1>, vector<8x8xf32>
    %105 = vector.extract_strided_slice %12 {offsets = [8, 0], sizes = [8, 8], strides = [1, 1]} : vector<16x32xbf16> to vector<8x8xbf16>
    %106 = vector.extract_strided_slice %14 {offsets = [8, 0], sizes = [8, 8], strides = [1, 1]} : vector<16x32xbf16> to vector<8x8xbf16>
    %107 = vector.extract_strided_slice %16 {offsets = [8, 0], sizes = [8, 8], strides = [1, 1]} : vector<16x32xbf16> to vector<8x8xbf16>
    %cst_40 = arith.constant dense<0.000000e+00> : vector<8x8xf32>
    %108 = tpu.matmul %105, %106, %cst_40 {dimension_numbers = #tpu.dot_dimension_numbers<[1], [1], [0], [0], [0, 0, 1, 0], [], []>} : vector<8x8xbf16>, vector<8x8xbf16>, vector<8x8xf32> -> vector<8x8xf32>
    %109 = arith.addf %108, %104 : vector<8x8xf32>
    %cst_41 = arith.constant dense<0xFF800000> : vector<8xf32>
    %110 = vector.multi_reduction <maximumf>, %109, %cst_41 [1] : vector<8x8xf32> to vector<8xf32>
    %111 = vector.shape_cast %110 : vector<8xf32> to vector<8x1xf32>
    %112 = vector.broadcast %111 : vector<8x1xf32> to vector<8x8xf32>
    %113 = arith.subf %109, %112 : vector<8x8xf32>
    %114 = math.exp %113 : vector<8x8xf32>
    %cst_42 = arith.constant dense<0.000000e+00> : vector<8xf32>
    %115 = vector.multi_reduction <add>, %114, %cst_42 [1] : vector<8x8xf32> to vector<8xf32>
    %116 = vector.shape_cast %115 : vector<8xf32> to vector<8x1xf32>
    %117 = tpu.reciprocal %116 {approx = true} : vector<8x1xf32> -> vector<8x1xf32>
    %118 = vector.broadcast %117 : vector<8x1xf32> to vector<8x8xf32>
    %119 = arith.mulf %114, %118 : vector<8x8xf32>
    %120 = arith.truncf %119 : vector<8x8xf32> to vector<8x8xbf16>
    %cst_43 = arith.constant dense<0.000000e+00> : vector<8x8xf32>
    %121 = tpu.matmul %120, %107, %cst_43 {dimension_numbers = #tpu.dot_dimension_numbers<[1], [0], [0], [1], [0, 0, 1, 1], [], []>} : vector<8x8xbf16>, vector<8x8xbf16>, vector<8x8xf32> -> vector<8x8xf32>
    %c8_44 = arith.constant 8 : index
    %c0_45 = arith.constant 0 : index
    %122 = vector.load %arg26[%c8_44, %c0_45] : memref<16x32xf32, #tpu.memory_space<vmem>>, vector<8x8xf32>
    tpu.vector_store %arg26[%c8_44, %c0_45], %121 {strides = array<i32>} : memref<16x32xf32, #tpu.memory_space<vmem>>, vector<8x8xf32>,
    %123 = vector.extract_strided_slice %12 {offsets = [8, 8], sizes = [8, 8], strides = [1, 1]} : vector<16x32xbf16> to vector<8x8xbf16>
    %124 = vector.extract_strided_slice %14 {offsets = [8, 8], sizes = [8, 8], strides = [1, 1]} : vector<16x32xbf16> to vector<8x8xbf16>
    %125 = vector.extract_strided_slice %16 {offsets = [8, 8], sizes = [8, 8], strides = [1, 1]} : vector<16x32xbf16> to vector<8x8xbf16>
    %cst_46 = arith.constant dense<0.000000e+00> : vector<8x8xf32>
    %126 = tpu.matmul %123, %124, %cst_46 {dimension_numbers = #tpu.dot_dimension_numbers<[1], [1], [0], [0], [0, 0, 1, 0], [], []>} : vector<8x8xbf16>, vector<8x8xbf16>, vector<8x8xf32> -> vector<8x8xf32>
    %127 = arith.addf %126, %104 : vector<8x8xf32>
    %cst_47 = arith.constant dense<0xFF800000> : vector<8xf32>
    %128 = vector.multi_reduction <maximumf>, %127, %cst_47 [1] : vector<8x8xf32> to vector<8xf32>
    %129 = vector.shape_cast %128 : vector<8xf32> to vector<8x1xf32>
    %130 = vector.broadcast %129 : vector<8x1xf32> to vector<8x8xf32>
    %131 = arith.subf %127, %130 : vector<8x8xf32>
    %132 = math.exp %131 : vector<8x8xf32>
    %cst_48 = arith.constant dense<0.000000e+00> : vector<8xf32>
    %133 = vector.multi_reduction <add>, %132, %cst_48 [1] : vector<8x8xf32> to vector<8xf32>
    %134 = vector.shape_cast %133 : vector<8xf32> to vector<8x1xf32>
    %135 = tpu.reciprocal %134 {approx = true} : vector<8x1xf32> -> vector<8x1xf32>
    %136 = vector.broadcast %135 : vector<8x1xf32> to vector<8x8xf32>
    %137 = arith.mulf %132, %136 : vector<8x8xf32>
    %138 = arith.truncf %137 : vector<8x8xf32> to vector<8x8xbf16>
    %cst_49 = arith.constant dense<0.000000e+00> : vector<8x8xf32>
    %139 = tpu.matmul %138, %125, %cst_49 {dimension_numbers = #tpu.dot_dimension_numbers<[1], [0], [0], [1], [0, 0, 1, 1], [], []>} : vector<8x8xbf16>, vector<8x8xbf16>, vector<8x8xf32> -> vector<8x8xf32>
    %c8_50 = arith.constant 8 : index
    %c8_51 = arith.constant 8 : index
    %140 = vector.load %arg26[%c8_50, %c8_51] : memref<16x32xf32, #tpu.memory_space<vmem>>, vector<8x8xf32>
    tpu.vector_store %arg26[%c8_50, %c8_51], %139 {strides = array<i32>} : memref<16x32xf32, #tpu.memory_space<vmem>>, vector<8x8xf32>,
    %141 = vector.extract_strided_slice %12 {offsets = [8, 16], sizes = [8, 8], strides = [1, 1]} : vector<16x32xbf16> to vector<8x8xbf16>
    %142 = vector.extract_strided_slice %14 {offsets = [8, 16], sizes = [8, 8], strides = [1, 1]} : vector<16x32xbf16> to vector<8x8xbf16>
    %143 = vector.extract_strided_slice %16 {offsets = [8, 16], sizes = [8, 8], strides = [1, 1]} : vector<16x32xbf16> to vector<8x8xbf16>
    %cst_52 = arith.constant dense<0.000000e+00> : vector<8x8xf32>
    %144 = tpu.matmul %141, %142, %cst_52 {dimension_numbers = #tpu.dot_dimension_numbers<[1], [1], [0], [0], [0, 0, 1, 0], [], []>} : vector<8x8xbf16>, vector<8x8xbf16>, vector<8x8xf32> -> vector<8x8xf32>
    %145 = arith.addf %144, %104 : vector<8x8xf32>
    %cst_53 = arith.constant dense<0xFF800000> : vector<8xf32>
    %146 = vector.multi_reduction <maximumf>, %145, %cst_53 [1] : vector<8x8xf32> to vector<8xf32>
    %147 = vector.shape_cast %146 : vector<8xf32> to vector<8x1xf32>
    %148 = vector.broadcast %147 : vector<8x1xf32> to vector<8x8xf32>
    %149 = arith.subf %145, %148 : vector<8x8xf32>
    %150 = math.exp %149 : vector<8x8xf32>
    %cst_54 = arith.constant dense<0.000000e+00> : vector<8xf32>
    %151 = vector.multi_reduction <add>, %150, %cst_54 [1] : vector<8x8xf32> to vector<8xf32>
    %152 = vector.shape_cast %151 : vector<8xf32> to vector<8x1xf32>
    %153 = tpu.reciprocal %152 {approx = true} : vector<8x1xf32> -> vector<8x1xf32>
    %154 = vector.broadcast %153 : vector<8x1xf32> to vector<8x8xf32>
    %155 = arith.mulf %150, %154 : vector<8x8xf32>
    %156 = arith.truncf %155 : vector<8x8xf32> to vector<8x8xbf16>
    %cst_55 = arith.constant dense<0.000000e+00> : vector<8x8xf32>
    %157 = tpu.matmul %156, %143, %cst_55 {dimension_numbers = #tpu.dot_dimension_numbers<[1], [0], [0], [1], [0, 0, 1, 1], [], []>} : vector<8x8xbf16>, vector<8x8xbf16>, vector<8x8xf32> -> vector<8x8xf32>
    %c8_56 = arith.constant 8 : index
    %c16_57 = arith.constant 16 : index
    %158 = vector.load %arg26[%c8_56, %c16_57] : memref<16x32xf32, #tpu.memory_space<vmem>>, vector<8x8xf32>
    tpu.vector_store %arg26[%c8_56, %c16_57], %157 {strides = array<i32>} : memref<16x32xf32, #tpu.memory_space<vmem>>, vector<8x8xf32>,
    %159 = vector.extract_strided_slice %12 {offsets = [8, 24], sizes = [8, 8], strides = [1, 1]} : vector<16x32xbf16> to vector<8x8xbf16>
    %160 = vector.extract_strided_slice %14 {offsets = [8, 24], sizes = [8, 8], strides = [1, 1]} : vector<16x32xbf16> to vector<8x8xbf16>
    %161 = vector.extract_strided_slice %16 {offsets = [8, 24], sizes = [8, 8], strides = [1, 1]} : vector<16x32xbf16> to vector<8x8xbf16>
    %cst_58 = arith.constant dense<0.000000e+00> : vector<8x8xf32>
    %162 = tpu.matmul %159, %160, %cst_58 {dimension_numbers = #tpu.dot_dimension_numbers<[1], [1], [0], [0], [0, 0, 1, 0], [], []>} : vector<8x8xbf16>, vector<8x8xbf16>, vector<8x8xf32> -> vector<8x8xf32>
    %163 = arith.addf %162, %104 : vector<8x8xf32>
    %cst_59 = arith.constant dense<0xFF800000> : vector<8xf32>
    %164 = vector.multi_reduction <maximumf>, %163, %cst_59 [1] : vector<8x8xf32> to vector<8xf32>
    %165 = vector.shape_cast %164 : vector<8xf32> to vector<8x1xf32>
    %166 = vector.broadcast %165 : vector<8x1xf32> to vector<8x8xf32>
    %167 = arith.subf %163, %166 : vector<8x8xf32>
    %168 = math.exp %167 : vector<8x8xf32>
    %cst_60 = arith.constant dense<0.000000e+00> : vector<8xf32>
    %169 = vector.multi_reduction <add>, %168, %cst_60 [1] : vector<8x8xf32> to vector<8xf32>
    %170 = vector.shape_cast %169 : vector<8xf32> to vector<8x1xf32>
    %171 = tpu.reciprocal %170 {approx = true} : vector<8x1xf32> -> vector<8x1xf32>
    %172 = vector.broadcast %171 : vector<8x1xf32> to vector<8x8xf32>
    %173 = arith.mulf %168, %172 : vector<8x8xf32>
    %174 = arith.truncf %173 : vector<8x8xf32> to vector<8x8xbf16>
    %cst_61 = arith.constant dense<0.000000e+00> : vector<8x8xf32>
    %175 = tpu.matmul %174, %161, %cst_61 {dimension_numbers = #tpu.dot_dimension_numbers<[1], [0], [0], [1], [0, 0, 1, 1], [], []>} : vector<8x8xbf16>, vector<8x8xbf16>, vector<8x8xf32> -> vector<8x8xf32>
    %c8_62 = arith.constant 8 : index
    %c24_63 = arith.constant 24 : index
    %176 = vector.load %arg26[%c8_62, %c24_63] : memref<16x32xf32, #tpu.memory_space<vmem>>, vector<8x8xf32>
    tpu.vector_store %arg26[%c8_62, %c24_63], %175 {strides = array<i32>} : memref<16x32xf32, #tpu.memory_space<vmem>>, vector<8x8xf32>,
    %c0_64 = arith.constant 0 : index
    %c0_65 = arith.constant 0 : index
    %177 = vector.load %arg26[%c0_64, %c0_65] : memref<16x32xf32, #tpu.memory_space<vmem>>, vector<16x32xf32>
    %178 = arith.truncf %177 : vector<16x32xf32> to vector<16x32xbf16>
    %c0_66 = arith.constant 0 : index
    %c0_67 = arith.constant 0 : index
    %179 = vector.load %arg7[%c0_66, %c0_67] : memref<32x32xbf16, #tpu.memory_space<vmem>>, vector<32x32xbf16>
    %cst_68 = arith.constant dense<0.000000e+00> : vector<16x32xf32>
    %180 = tpu.matmul %178, %179, %cst_68 {dimension_numbers = #tpu.dot_dimension_numbers<[1], [0], [0], [1], [0, 0, 1, 1], [], []>} : vector<16x32xbf16>, vector<32x32xbf16>, vector<16x32xf32> -> vector<16x32xf32>
    %c0_69 = arith.constant 0 : index
    %c0_70 = arith.constant 0 : index
    %181 = vector.load %arg8[%c0_69, %c0_70] : memref<1x32xf32, #tpu.memory_space<vmem>>, vector<1x32xf32>
    %182 = vector.broadcast %181 : vector<1x32xf32> to vector<16x32xf32>
    %183 = arith.addf %180, %182 : vector<16x32xf32>
    %184 = arith.addf %183, %0 : vector<16x32xf32>
    %c0_71 = arith.constant 0 : index
    %c0_72 = arith.constant 0 : index
    %185 = vector.load %arg9[%c0_71, %c0_72] : memref<1x32xf32, #tpu.memory_space<vmem>>, vector<1x32xf32>
    %c0_73 = arith.constant 0 : index
    %c0_74 = arith.constant 0 : index
    %186 = vector.load %arg10[%c0_73, %c0_74] : memref<1x32xf32, #tpu.memory_space<vmem>>, vector<1x32xf32>
    %cst_75 = arith.constant dense<0.000000e+00> : vector<16xf32>
    %187 = vector.multi_reduction <add>, %184, %cst_75 [1] : vector<16x32xf32> to vector<16xf32>
    %188 = vector.shape_cast %187 : vector<16xf32> to vector<16x1xf32>
    %cst_76 = arith.constant 3.200000e+01 : f32
    %189 = vector.broadcast %cst_76 : f32 to vector<16x1xf32>
    %190 = arith.divf %188, %189 : vector<16x1xf32>
    %191 = vector.broadcast %190 : vector<16x1xf32> to vector<16x32xf32>
    %192 = arith.subf %184, %191 : vector<16x32xf32>
    %193 = arith.mulf %192, %192 : vector<16x32xf32>
    %cst_77 = arith.constant dense<0.000000e+00> : vector<16xf32>
    %194 = vector.multi_reduction <add>, %193, %cst_77 [1] : vector<16x32xf32> to vector<16xf32>
    %195 = vector.shape_cast %194 : vector<16xf32> to vector<16x1xf32>
    %cst_78 = arith.constant 3.200000e+01 : f32
    %196 = vector.broadcast %cst_78 : f32 to vector<16x1xf32>
    %197 = arith.divf %195, %196 : vector<16x1xf32>
    %cst_79 = arith.constant 9.99999974E-6 : f32
    %198 = vector.broadcast %cst_79 : f32 to vector<16x1xf32>
    %199 = arith.addf %197, %198 : vector<16x1xf32>
    %200 = math.rsqrt %199 : vector<16x1xf32>
    %201 = vector.broadcast %200 : vector<16x1xf32> to vector<16x32xf32>
    %202 = arith.mulf %192, %201 : vector<16x32xf32>
    %203 = vector.broadcast %185 : vector<1x32xf32> to vector<16x32xf32>
    %204 = arith.mulf %202, %203 : vector<16x32xf32>
    %205 = vector.broadcast %186 : vector<1x32xf32> to vector<16x32xf32>
    %206 = arith.addf %204, %205 : vector<16x32xf32>
    %207 = arith.truncf %206 : vector<16x32xf32> to vector<16x32xbf16>
    %c0_80 = arith.constant 0 : index
    %c0_81 = arith.constant 0 : index
    %208 = vector.load %arg11[%c0_80, %c0_81] : memref<32x32xbf16, #tpu.memory_space<vmem>>, vector<32x32xbf16>
    %cst_82 = arith.constant dense<0.000000e+00> : vector<16x32xf32>
    %209 = tpu.matmul %207, %208, %cst_82 {dimension_numbers = #tpu.dot_dimension_numbers<[1], [0], [0], [1], [0, 0, 1, 1], [], []>} : vector<16x32xbf16>, vector<32x32xbf16>, vector<16x32xf32> -> vector<16x32xf32>
    %c0_83 = arith.constant 0 : index
    %c0_84 = arith.constant 0 : index
    %210 = vector.load %arg12[%c0_83, %c0_84] : memref<1x32xf32, #tpu.memory_space<vmem>>, vector<1x32xf32>
    %211 = vector.broadcast %210 : vector<1x32xf32> to vector<16x32xf32>
    %212 = arith.addf %209, %211 : vector<16x32xf32>
    %cst_85 = arith.constant 0.176776692 : f32
    %213 = vector.broadcast %cst_85 : f32 to vector<16x32xf32>
    %214 = arith.mulf %212, %213 : vector<16x32xf32>
    %215 = arith.truncf %214 : vector<16x32xf32> to vector<16x32xbf16>
    %c0_86 = arith.constant 0 : index
    %c0_87 = arith.constant 0 : index
    %216 = vector.load %arg13[%c0_86, %c0_87] : memref<32x64xbf16, #tpu.memory_space<vmem>>, vector<32x64xbf16>
    %cst_88 = arith.constant dense<0.000000e+00> : vector<16x64xf32>
    %217 = tpu.matmul %2, %216, %cst_88 {dimension_numbers = #tpu.dot_dimension_numbers<[1], [0], [0], [1], [0, 0, 1, 1], [], []>} : vector<16x32xbf16>, vector<32x64xbf16>, vector<16x64xf32> -> vector<16x64xf32>
    %c0_89 = arith.constant 0 : index
    %c0_90 = arith.constant 0 : index
    %218 = vector.load %arg14[%c0_89, %c0_90] : memref<1x64xf32, #tpu.memory_space<vmem>>, vector<1x64xf32>
    %219 = vector.broadcast %218 : vector<1x64xf32> to vector<16x64xf32>
    %220 = arith.addf %217, %219 : vector<16x64xf32>
    %221 = vector.extract_strided_slice %220 {offsets = [0, 0], sizes = [16, 32], strides = [1, 1]} : vector<16x64xf32> to vector<16x32xf32>
    %222 = arith.truncf %221 : vector<16x32xf32> to vector<16x32xbf16>
    %223 = vector.extract_strided_slice %220 {offsets = [0, 32], sizes = [16, 32], strides = [1, 1]} : vector<16x64xf32> to vector<16x32xf32>
    %224 = arith.truncf %223 : vector<16x32xf32> to vector<16x32xbf16>
    %c0_91 = arith.constant 0 : index
    %c0_92 = arith.constant 0 : index
    %c0_93 = arith.constant 0 : index
    %225 = vector.load %arg4[%c0_91, %c0_92, %c0_93] : memref<2x8x8xi8, #tpu.memory_space<vmem>>, vector<1x8x8xi8>
    %226 = vector.shape_cast %225 : vector<1x8x8xi8> to vector<8x8xi8>
    %227 = arith.sitofp %226 : vector<8x8xi8> to vector<8x8xf32>
    %cst_94 = arith.constant 0.000000e+00 : f32
    %228 = vector.broadcast %cst_94 : f32 to vector<8x8xf32>
    %229 = arith.cmpf oeq, %227, %228 : vector<8x8xf32>
    %cst_95 = arith.constant -1.000000e+20 : f32
    %cst_96 = arith.constant 0.000000e+00 : f32
    %230 = vector.broadcast %cst_95 : f32 to vector<8x8xf32>
    %231 = vector.broadcast %cst_96 : f32 to vector<8x8xf32>
    %232 = arith.select %229, %230, %231 : vector<8x8xi1>, vector<8x8xf32>
    %233 = vector.extract_strided_slice %215 {offsets = [0, 0], sizes = [8, 8], strides = [1, 1]} : vector<16x32xbf16> to vector<8x8xbf16>
    %234 = vector.extract_strided_slice %222 {offsets = [0, 0], sizes = [8, 8], strides = [1, 1]} : vector<16x32xbf16> to vector<8x8xbf16>
    %235 = vector.extract_strided_slice %224 {offsets = [0, 0], sizes = [8, 8], strides = [1, 1]} : vector<16x32xbf16> to vector<8x8xbf16>
    %cst_97 = arith.constant dense<0.000000e+00> : vector<8x8xf32>
    %236 = tpu.matmul %233, %234, %cst_97 {dimension_numbers = #tpu.dot_dimension_numbers<[1], [1], [0], [0], [0, 0, 1, 0], [], []>} : vector<8x8xbf16>, vector<8x8xbf16>, vector<8x8xf32> -> vector<8x8xf32>
    %237 = arith.addf %236, %232 : vector<8x8xf32>
    %cst_98 = arith.constant dense<0xFF800000> : vector<8xf32>
    %238 = vector.multi_reduction <maximumf>, %237, %cst_98 [1] : vector<8x8xf32> to vector<8xf32>
    %239 = vector.shape_cast %238 : vector<8xf32> to vector<8x1xf32>
    %240 = vector.broadcast %239 : vector<8x1xf32> to vector<8x8xf32>
    %241 = arith.subf %237, %240 : vector<8x8xf32>
    %242 = math.exp %241 : vector<8x8xf32>
    %cst_99 = arith.constant dense<0.000000e+00> : vector<8xf32>
    %243 = vector.multi_reduction <add>, %242, %cst_99 [1] : vector<8x8xf32> to vector<8xf32>
    %244 = vector.shape_cast %243 : vector<8xf32> to vector<8x1xf32>
    %245 = tpu.reciprocal %244 {approx = true} : vector<8x1xf32> -> vector<8x1xf32>
    %246 = vector.broadcast %245 : vector<8x1xf32> to vector<8x8xf32>
    %247 = arith.mulf %242, %246 : vector<8x8xf32>
    %248 = arith.truncf %247 : vector<8x8xf32> to vector<8x8xbf16>
    %cst_100 = arith.constant dense<0.000000e+00> : vector<8x8xf32>
    %249 = tpu.matmul %248, %235, %cst_100 {dimension_numbers = #tpu.dot_dimension_numbers<[1], [0], [0], [1], [0, 0, 1, 1], [], []>} : vector<8x8xbf16>, vector<8x8xbf16>, vector<8x8xf32> -> vector<8x8xf32>
    %c0_101 = arith.constant 0 : index
    %c0_102 = arith.constant 0 : index
    %250 = vector.load %arg26[%c0_101, %c0_102] : memref<16x32xf32, #tpu.memory_space<vmem>>, vector<8x8xf32>
    tpu.vector_store %arg26[%c0_101, %c0_102], %249 {strides = array<i32>} : memref<16x32xf32, #tpu.memory_space<vmem>>, vector<8x8xf32>,
    %251 = vector.extract_strided_slice %215 {offsets = [0, 8], sizes = [8, 8], strides = [1, 1]} : vector<16x32xbf16> to vector<8x8xbf16>
    %252 = vector.extract_strided_slice %222 {offsets = [0, 8], sizes = [8, 8], strides = [1, 1]} : vector<16x32xbf16> to vector<8x8xbf16>
    %253 = vector.extract_strided_slice %224 {offsets = [0, 8], sizes = [8, 8], strides = [1, 1]} : vector<16x32xbf16> to vector<8x8xbf16>
    %cst_103 = arith.constant dense<0.000000e+00> : vector<8x8xf32>
    %254 = tpu.matmul %251, %252, %cst_103 {dimension_numbers = #tpu.dot_dimension_numbers<[1], [1], [0], [0], [0, 0, 1, 0], [], []>} : vector<8x8xbf16>, vector<8x8xbf16>, vector<8x8xf32> -> vector<8x8xf32>
    %255 = arith.addf %254, %232 : vector<8x8xf32>
    %cst_104 = arith.constant dense<0xFF800000> : vector<8xf32>
    %256 = vector.multi_reduction <maximumf>, %255, %cst_104 [1] : vector<8x8xf32> to vector<8xf32>
    %257 = vector.shape_cast %256 : vector<8xf32> to vector<8x1xf32>
    %258 = vector.broadcast %257 : vector<8x1xf32> to vector<8x8xf32>
    %259 = arith.subf %255, %258 : vector<8x8xf32>
    %260 = math.exp %259 : vector<8x8xf32>
    %cst_105 = arith.constant dense<0.000000e+00> : vector<8xf32>
    %261 = vector.multi_reduction <add>, %260, %cst_105 [1] : vector<8x8xf32> to vector<8xf32>
    %262 = vector.shape_cast %261 : vector<8xf32> to vector<8x1xf32>
    %263 = tpu.reciprocal %262 {approx = true} : vector<8x1xf32> -> vector<8x1xf32>
    %264 = vector.broadcast %263 : vector<8x1xf32> to vector<8x8xf32>
    %265 = arith.mulf %260, %264 : vector<8x8xf32>
    %266 = arith.truncf %265 : vector<8x8xf32> to vector<8x8xbf16>
    %cst_106 = arith.constant dense<0.000000e+00> : vector<8x8xf32>
    %267 = tpu.matmul %266, %253, %cst_106 {dimension_numbers = #tpu.dot_dimension_numbers<[1], [0], [0], [1], [0, 0, 1, 1], [], []>} : vector<8x8xbf16>, vector<8x8xbf16>, vector<8x8xf32> -> vector<8x8xf32>
    %c0_107 = arith.constant 0 : index
    %c8_108 = arith.constant 8 : index
    %268 = vector.load %arg26[%c0_107, %c8_108] : memref<16x32xf32, #tpu.memory_space<vmem>>, vector<8x8xf32>
    tpu.vector_store %arg26[%c0_107, %c8_108], %267 {strides = array<i32>} : memref<16x32xf32, #tpu.memory_space<vmem>>, vector<8x8xf32>,
    %269 = vector.extract_strided_slice %215 {offsets = [0, 16], sizes = [8, 8], strides = [1, 1]} : vector<16x32xbf16> to vector<8x8xbf16>
    %270 = vector.extract_strided_slice %222 {offsets = [0, 16], sizes = [8, 8], strides = [1, 1]} : vector<16x32xbf16> to vector<8x8xbf16>
    %271 = vector.extract_strided_slice %224 {offsets = [0, 16], sizes = [8, 8], strides = [1, 1]} : vector<16x32xbf16> to vector<8x8xbf16>
    %cst_109 = arith.constant dense<0.000000e+00> : vector<8x8xf32>
    %272 = tpu.matmul %269, %270, %cst_109 {dimension_numbers = #tpu.dot_dimension_numbers<[1], [1], [0], [0], [0, 0, 1, 0], [], []>} : vector<8x8xbf16>, vector<8x8xbf16>, vector<8x8xf32> -> vector<8x8xf32>
    %273 = arith.addf %272, %232 : vector<8x8xf32>
    %cst_110 = arith.constant dense<0xFF800000> : vector<8xf32>
    %274 = vector.multi_reduction <maximumf>, %273, %cst_110 [1] : vector<8x8xf32> to vector<8xf32>
    %275 = vector.shape_cast %274 : vector<8xf32> to vector<8x1xf32>
    %276 = vector.broadcast %275 : vector<8x1xf32> to vector<8x8xf32>
    %277 = arith.subf %273, %276 : vector<8x8xf32>
    %278 = math.exp %277 : vector<8x8xf32>
    %cst_111 = arith.constant dense<0.000000e+00> : vector<8xf32>
    %279 = vector.multi_reduction <add>, %278, %cst_111 [1] : vector<8x8xf32> to vector<8xf32>
    %280 = vector.shape_cast %279 : vector<8xf32> to vector<8x1xf32>
    %281 = tpu.reciprocal %280 {approx = true} : vector<8x1xf32> -> vector<8x1xf32>
    %282 = vector.broadcast %281 : vector<8x1xf32> to vector<8x8xf32>
    %283 = arith.mulf %278, %282 : vector<8x8xf32>
    %284 = arith.truncf %283 : vector<8x8xf32> to vector<8x8xbf16>
    %cst_112 = arith.constant dense<0.000000e+00> : vector<8x8xf32>
    %285 = tpu.matmul %284, %271, %cst_112 {dimension_numbers = #tpu.dot_dimension_numbers<[1], [0], [0], [1], [0, 0, 1, 1], [], []>} : vector<8x8xbf16>, vector<8x8xbf16>, vector<8x8xf32> -> vector<8x8xf32>
    %c0_113 = arith.constant 0 : index
    %c16_114 = arith.constant 16 : index
    %286 = vector.load %arg26[%c0_113, %c16_114] : memref<16x32xf32, #tpu.memory_space<vmem>>, vector<8x8xf32>
    tpu.vector_store %arg26[%c0_113, %c16_114], %285 {strides = array<i32>} : memref<16x32xf32, #tpu.memory_space<vmem>>, vector<8x8xf32>,
    %287 = vector.extract_strided_slice %215 {offsets = [0, 24], sizes = [8, 8], strides = [1, 1]} : vector<16x32xbf16> to vector<8x8xbf16>
    %288 = vector.extract_strided_slice %222 {offsets = [0, 24], sizes = [8, 8], strides = [1, 1]} : vector<16x32xbf16> to vector<8x8xbf16>
    %289 = vector.extract_strided_slice %224 {offsets = [0, 24], sizes = [8, 8], strides = [1, 1]} : vector<16x32xbf16> to vector<8x8xbf16>
    %cst_115 = arith.constant dense<0.000000e+00> : vector<8x8xf32>
    %290 = tpu.matmul %287, %288, %cst_115 {dimension_numbers = #tpu.dot_dimension_numbers<[1], [1], [0], [0], [0, 0, 1, 0], [], []>} : vector<8x8xbf16>, vector<8x8xbf16>, vector<8x8xf32> -> vector<8x8xf32>
    %291 = arith.addf %290, %232 : vector<8x8xf32>
    %cst_116 = arith.constant dense<0xFF800000> : vector<8xf32>
    %292 = vector.multi_reduction <maximumf>, %291, %cst_116 [1] : vector<8x8xf32> to vector<8xf32>
    %293 = vector.shape_cast %292 : vector<8xf32> to vector<8x1xf32>
    %294 = vector.broadcast %293 : vector<8x1xf32> to vector<8x8xf32>
    %295 = arith.subf %291, %294 : vector<8x8xf32>
    %296 = math.exp %295 : vector<8x8xf32>
    %cst_117 = arith.constant dense<0.000000e+00> : vector<8xf32>
    %297 = vector.multi_reduction <add>, %296, %cst_117 [1] : vector<8x8xf32> to vector<8xf32>
    %298 = vector.shape_cast %297 : vector<8xf32> to vector<8x1xf32>
    %299 = tpu.reciprocal %298 {approx = true} : vector<8x1xf32> -> vector<8x1xf32>
    %300 = vector.broadcast %299 : vector<8x1xf32> to vector<8x8xf32>
    %301 = arith.mulf %296, %300 : vector<8x8xf32>
    %302 = arith.truncf %301 : vector<8x8xf32> to vector<8x8xbf16>
    %cst_118 = arith.constant dense<0.000000e+00> : vector<8x8xf32>
    %303 = tpu.matmul %302, %289, %cst_118 {dimension_numbers = #tpu.dot_dimension_numbers<[1], [0], [0], [1], [0, 0, 1, 1], [], []>} : vector<8x8xbf16>, vector<8x8xbf16>, vector<8x8xf32> -> vector<8x8xf32>
    %c0_119 = arith.constant 0 : index
    %c24_120 = arith.constant 24 : index
    %304 = vector.load %arg26[%c0_119, %c24_120] : memref<16x32xf32, #tpu.memory_space<vmem>>, vector<8x8xf32>
    tpu.vector_store %arg26[%c0_119, %c24_120], %303 {strides = array<i32>} : memref<16x32xf32, #tpu.memory_space<vmem>>, vector<8x8xf32>,
    %c1_121 = arith.constant 1 : index
    %c0_122 = arith.constant 0 : index
    %c0_123 = arith.constant 0 : index
    %305 = vector.load %arg4[%c1_121, %c0_122, %c0_123] : memref<2x8x8xi8, #tpu.memory_space<vmem>>, vector<1x8x8xi8>
    %306 = vector.shape_cast %305 : vector<1x8x8xi8> to vector<8x8xi8>
    %307 = arith.sitofp %306 : vector<8x8xi8> to vector<8x8xf32>
    %cst_124 = arith.constant 0.000000e+00 : f32
    %308 = vector.broadcast %cst_124 : f32 to vector<8x8xf32>
    %309 = arith.cmpf oeq, %307, %308 : vector<8x8xf32>
    %cst_125 = arith.constant -1.000000e+20 : f32
    %cst_126 = arith.constant 0.000000e+00 : f32
    %310 = vector.broadcast %cst_125 : f32 to vector<8x8xf32>
    %311 = vector.broadcast %cst_126 : f32 to vector<8x8xf32>
    %312 = arith.select %309, %310, %311 : vector<8x8xi1>, vector<8x8xf32>
    %313 = vector.extract_strided_slice %215 {offsets = [8, 0], sizes = [8, 8], strides = [1, 1]} : vector<16x32xbf16> to vector<8x8xbf16>
    %314 = vector.extract_strided_slice %222 {offsets = [8, 0], sizes = [8, 8], strides = [1, 1]} : vector<16x32xbf16> to vector<8x8xbf16>
    %315 = vector.extract_strided_slice %224 {offsets = [8, 0], sizes = [8, 8], strides = [1, 1]} : vector<16x32xbf16> to vector<8x8xbf16>
    %cst_127 = arith.constant dense<0.000000e+00> : vector<8x8xf32>
    %316 = tpu.matmul %313, %314, %cst_127 {dimension_numbers = #tpu.dot_dimension_numbers<[1], [1], [0], [0], [0, 0, 1, 0], [], []>} : vector<8x8xbf16>, vector<8x8xbf16>, vector<8x8xf32> -> vector<8x8xf32>
    %317 = arith.addf %316, %312 : vector<8x8xf32>
    %cst_128 = arith.constant dense<0xFF800000> : vector<8xf32>
    %318 = vector.multi_reduction <maximumf>, %317, %cst_128 [1] : vector<8x8xf32> to vector<8xf32>
    %319 = vector.shape_cast %318 : vector<8xf32> to vector<8x1xf32>
    %320 = vector.broadcast %319 : vector<8x1xf32> to vector<8x8xf32>
    %321 = arith.subf %317, %320 : vector<8x8xf32>
    %322 = math.exp %321 : vector<8x8xf32>
    %cst_129 = arith.constant dense<0.000000e+00> : vector<8xf32>
    %323 = vector.multi_reduction <add>, %322, %cst_129 [1] : vector<8x8xf32> to vector<8xf32>
    %324 = vector.shape_cast %323 : vector<8xf32> to vector<8x1xf32>
    %325 = tpu.reciprocal %324 {approx = true} : vector<8x1xf32> -> vector<8x1xf32>
    %326 = vector.broadcast %325 : vector<8x1xf32> to vector<8x8xf32>
    %327 = arith.mulf %322, %326 : vector<8x8xf32>
    %328 = arith.truncf %327 : vector<8x8xf32> to vector<8x8xbf16>
    %cst_130 = arith.constant dense<0.000000e+00> : vector<8x8xf32>
    %329 = tpu.matmul %328, %315, %cst_130 {dimension_numbers = #tpu.dot_dimension_numbers<[1], [0], [0], [1], [0, 0, 1, 1], [], []>} : vector<8x8xbf16>, vector<8x8xbf16>, vector<8x8xf32> -> vector<8x8xf32>
    %c8_131 = arith.constant 8 : index
    %c0_132 = arith.constant 0 : index
    %330 = vector.load %arg26[%c8_131, %c0_132] : memref<16x32xf32, #tpu.memory_space<vmem>>, vector<8x8xf32>
    tpu.vector_store %arg26[%c8_131, %c0_132], %329 {strides = array<i32>} : memref<16x32xf32, #tpu.memory_space<vmem>>, vector<8x8xf32>,
    %331 = vector.extract_strided_slice %215 {offsets = [8, 8], sizes = [8, 8], strides = [1, 1]} : vector<16x32xbf16> to vector<8x8xbf16>
    %332 = vector.extract_strided_slice %222 {offsets = [8, 8], sizes = [8, 8], strides = [1, 1]} : vector<16x32xbf16> to vector<8x8xbf16>
    %333 = vector.extract_strided_slice %224 {offsets = [8, 8], sizes = [8, 8], strides = [1, 1]} : vector<16x32xbf16> to vector<8x8xbf16>
    %cst_133 = arith.constant dense<0.000000e+00> : vector<8x8xf32>
    %334 = tpu.matmul %331, %332, %cst_133 {dimension_numbers = #tpu.dot_dimension_numbers<[1], [1], [0], [0], [0, 0, 1, 0], [], []>} : vector<8x8xbf16>, vector<8x8xbf16>, vector<8x8xf32> -> vector<8x8xf32>
    %335 = arith.addf %334, %312 : vector<8x8xf32>
    %cst_134 = arith.constant dense<0xFF800000> : vector<8xf32>
    %336 = vector.multi_reduction <maximumf>, %335, %cst_134 [1] : vector<8x8xf32> to vector<8xf32>
    %337 = vector.shape_cast %336 : vector<8xf32> to vector<8x1xf32>
    %338 = vector.broadcast %337 : vector<8x1xf32> to vector<8x8xf32>
    %339 = arith.subf %335, %338 : vector<8x8xf32>
    %340 = math.exp %339 : vector<8x8xf32>
    %cst_135 = arith.constant dense<0.000000e+00> : vector<8xf32>
    %341 = vector.multi_reduction <add>, %340, %cst_135 [1] : vector<8x8xf32> to vector<8xf32>
    %342 = vector.shape_cast %341 : vector<8xf32> to vector<8x1xf32>
    %343 = tpu.reciprocal %342 {approx = true} : vector<8x1xf32> -> vector<8x1xf32>
    %344 = vector.broadcast %343 : vector<8x1xf32> to vector<8x8xf32>
    %345 = arith.mulf %340, %344 : vector<8x8xf32>
    %346 = arith.truncf %345 : vector<8x8xf32> to vector<8x8xbf16>
    %cst_136 = arith.constant dense<0.000000e+00> : vector<8x8xf32>
    %347 = tpu.matmul %346, %333, %cst_136 {dimension_numbers = #tpu.dot_dimension_numbers<[1], [0], [0], [1], [0, 0, 1, 1], [], []>} : vector<8x8xbf16>, vector<8x8xbf16>, vector<8x8xf32> -> vector<8x8xf32>
    %c8_137 = arith.constant 8 : index
    %c8_138 = arith.constant 8 : index
    %348 = vector.load %arg26[%c8_137, %c8_138] : memref<16x32xf32, #tpu.memory_space<vmem>>, vector<8x8xf32>
    tpu.vector_store %arg26[%c8_137, %c8_138], %347 {strides = array<i32>} : memref<16x32xf32, #tpu.memory_space<vmem>>, vector<8x8xf32>,
    %349 = vector.extract_strided_slice %215 {offsets = [8, 16], sizes = [8, 8], strides = [1, 1]} : vector<16x32xbf16> to vector<8x8xbf16>
    %350 = vector.extract_strided_slice %222 {offsets = [8, 16], sizes = [8, 8], strides = [1, 1]} : vector<16x32xbf16> to vector<8x8xbf16>
    %351 = vector.extract_strided_slice %224 {offsets = [8, 16], sizes = [8, 8], strides = [1, 1]} : vector<16x32xbf16> to vector<8x8xbf16>
    %cst_139 = arith.constant dense<0.000000e+00> : vector<8x8xf32>
    %352 = tpu.matmul %349, %350, %cst_139 {dimension_numbers = #tpu.dot_dimension_numbers<[1], [1], [0], [0], [0, 0, 1, 0], [], []>} : vector<8x8xbf16>, vector<8x8xbf16>, vector<8x8xf32> -> vector<8x8xf32>
    %353 = arith.addf %352, %312 : vector<8x8xf32>
    %cst_140 = arith.constant dense<0xFF800000> : vector<8xf32>
    %354 = vector.multi_reduction <maximumf>, %353, %cst_140 [1] : vector<8x8xf32> to vector<8xf32>
    %355 = vector.shape_cast %354 : vector<8xf32> to vector<8x1xf32>
    %356 = vector.broadcast %355 : vector<8x1xf32> to vector<8x8xf32>
    %357 = arith.subf %353, %356 : vector<8x8xf32>
    %358 = math.exp %357 : vector<8x8xf32>
    %cst_141 = arith.constant dense<0.000000e+00> : vector<8xf32>
    %359 = vector.multi_reduction <add>, %358, %cst_141 [1] : vector<8x8xf32> to vector<8xf32>
    %360 = vector.shape_cast %359 : vector<8xf32> to vector<8x1xf32>
    %361 = tpu.reciprocal %360 {approx = true} : vector<8x1xf32> -> vector<8x1xf32>
    %362 = vector.broadcast %361 : vector<8x1xf32> to vector<8x8xf32>
    %363 = arith.mulf %358, %362 : vector<8x8xf32>
    %364 = arith.truncf %363 : vector<8x8xf32> to vector<8x8xbf16>
    %cst_142 = arith.constant dense<0.000000e+00> : vector<8x8xf32>
    %365 = tpu.matmul %364, %351, %cst_142 {dimension_numbers = #tpu.dot_dimension_numbers<[1], [0], [0], [1], [0, 0, 1, 1], [], []>} : vector<8x8xbf16>, vector<8x8xbf16>, vector<8x8xf32> -> vector<8x8xf32>
    %c8_143 = arith.constant 8 : index
    %c16_144 = arith.constant 16 : index
    %366 = vector.load %arg26[%c8_143, %c16_144] : memref<16x32xf32, #tpu.memory_space<vmem>>, vector<8x8xf32>
    tpu.vector_store %arg26[%c8_143, %c16_144], %365 {strides = array<i32>} : memref<16x32xf32, #tpu.memory_space<vmem>>, vector<8x8xf32>,
    %367 = vector.extract_strided_slice %215 {offsets = [8, 24], sizes = [8, 8], strides = [1, 1]} : vector<16x32xbf16> to vector<8x8xbf16>
    %368 = vector.extract_strided_slice %222 {offsets = [8, 24], sizes = [8, 8], strides = [1, 1]} : vector<16x32xbf16> to vector<8x8xbf16>
    %369 = vector.extract_strided_slice %224 {offsets = [8, 24], sizes = [8, 8], strides = [1, 1]} : vector<16x32xbf16> to vector<8x8xbf16>
    %cst_145 = arith.constant dense<0.000000e+00> : vector<8x8xf32>
    %370 = tpu.matmul %367, %368, %cst_145 {dimension_numbers = #tpu.dot_dimension_numbers<[1], [1], [0], [0], [0, 0, 1, 0], [], []>} : vector<8x8xbf16>, vector<8x8xbf16>, vector<8x8xf32> -> vector<8x8xf32>
    %371 = arith.addf %370, %312 : vector<8x8xf32>
    %cst_146 = arith.constant dense<0xFF800000> : vector<8xf32>
    %372 = vector.multi_reduction <maximumf>, %371, %cst_146 [1] : vector<8x8xf32> to vector<8xf32>
    %373 = vector.shape_cast %372 : vector<8xf32> to vector<8x1xf32>
    %374 = vector.broadcast %373 : vector<8x1xf32> to vector<8x8xf32>
    %375 = arith.subf %371, %374 : vector<8x8xf32>
    %376 = math.exp %375 : vector<8x8xf32>
    %cst_147 = arith.constant dense<0.000000e+00> : vector<8xf32>
    %377 = vector.multi_reduction <add>, %376, %cst_147 [1] : vector<8x8xf32> to vector<8xf32>
    %378 = vector.shape_cast %377 : vector<8xf32> to vector<8x1xf32>
    %379 = tpu.reciprocal %378 {approx = true} : vector<8x1xf32> -> vector<8x1xf32>
    %380 = vector.broadcast %379 : vector<8x1xf32> to vector<8x8xf32>
    %381 = arith.mulf %376, %380 : vector<8x8xf32>
    %382 = arith.truncf %381 : vector<8x8xf32> to vector<8x8xbf16>
    %cst_148 = arith.constant dense<0.000000e+00> : vector<8x8xf32>
    %383 = tpu.matmul %382, %369, %cst_148 {dimension_numbers = #tpu.dot_dimension_numbers<[1], [0], [0], [1], [0, 0, 1, 1], [], []>} : vector<8x8xbf16>, vector<8x8xbf16>, vector<8x8xf32> -> vector<8x8xf32>
    %c8_149 = arith.constant 8 : index
    %c24_150 = arith.constant 24 : index
    %384 = vector.load %arg26[%c8_149, %c24_150] : memref<16x32xf32, #tpu.memory_space<vmem>>, vector<8x8xf32>
    tpu.vector_store %arg26[%c8_149, %c24_150], %383 {strides = array<i32>} : memref<16x32xf32, #tpu.memory_space<vmem>>, vector<8x8xf32>,
    %c0_151 = arith.constant 0 : index
    %c0_152 = arith.constant 0 : index
    %385 = vector.load %arg26[%c0_151, %c0_152] : memref<16x32xf32, #tpu.memory_space<vmem>>, vector<16x32xf32>
    %386 = arith.truncf %385 : vector<16x32xf32> to vector<16x32xbf16>
    %c0_153 = arith.constant 0 : index
    %c0_154 = arith.constant 0 : index
    %387 = vector.load %arg15[%c0_153, %c0_154] : memref<32x32xbf16, #tpu.memory_space<vmem>>, vector<32x32xbf16>
    %cst_155 = arith.constant dense<0.000000e+00> : vector<16x32xf32>
    %388 = tpu.matmul %386, %387, %cst_155 {dimension_numbers = #tpu.dot_dimension_numbers<[1], [0], [0], [1], [0, 0, 1, 1], [], []>} : vector<16x32xbf16>, vector<32x32xbf16>, vector<16x32xf32> -> vector<16x32xf32>
    %c0_156 = arith.constant 0 : index
    %c0_157 = arith.constant 0 : index
    %389 = vector.load %arg16[%c0_156, %c0_157] : memref<1x32xf32, #tpu.memory_space<vmem>>, vector<1x32xf32>
    %390 = vector.broadcast %389 : vector<1x32xf32> to vector<16x32xf32>
    %391 = arith.addf %388, %390 : vector<16x32xf32>
    %392 = arith.addf %391, %206 : vector<16x32xf32>
    %c0_158 = arith.constant 0 : index
    %c0_159 = arith.constant 0 : index
    %393 = vector.load %arg17[%c0_158, %c0_159] : memref<1x32xf32, #tpu.memory_space<vmem>>, vector<1x32xf32>
    %c0_160 = arith.constant 0 : index
    %c0_161 = arith.constant 0 : index
    %394 = vector.load %arg18[%c0_160, %c0_161] : memref<1x32xf32, #tpu.memory_space<vmem>>, vector<1x32xf32>
    %cst_162 = arith.constant dense<0.000000e+00> : vector<16xf32>
    %395 = vector.multi_reduction <add>, %392, %cst_162 [1] : vector<16x32xf32> to vector<16xf32>
    %396 = vector.shape_cast %395 : vector<16xf32> to vector<16x1xf32>
    %cst_163 = arith.constant 3.200000e+01 : f32
    %397 = vector.broadcast %cst_163 : f32 to vector<16x1xf32>
    %398 = arith.divf %396, %397 : vector<16x1xf32>
    %399 = vector.broadcast %398 : vector<16x1xf32> to vector<16x32xf32>
    %400 = arith.subf %392, %399 : vector<16x32xf32>
    %401 = arith.mulf %400, %400 : vector<16x32xf32>
    %cst_164 = arith.constant dense<0.000000e+00> : vector<16xf32>
    %402 = vector.multi_reduction <add>, %401, %cst_164 [1] : vector<16x32xf32> to vector<16xf32>
    %403 = vector.shape_cast %402 : vector<16xf32> to vector<16x1xf32>
    %cst_165 = arith.constant 3.200000e+01 : f32
    %404 = vector.broadcast %cst_165 : f32 to vector<16x1xf32>
    %405 = arith.divf %403, %404 : vector<16x1xf32>
    %cst_166 = arith.constant 9.99999974E-6 : f32
    %406 = vector.broadcast %cst_166 : f32 to vector<16x1xf32>
    %407 = arith.addf %405, %406 : vector<16x1xf32>
    %408 = math.rsqrt %407 : vector<16x1xf32>
    %409 = vector.broadcast %408 : vector<16x1xf32> to vector<16x32xf32>
    %410 = arith.mulf %400, %409 : vector<16x32xf32>
    %411 = vector.broadcast %393 : vector<1x32xf32> to vector<16x32xf32>
    %412 = arith.mulf %410, %411 : vector<16x32xf32>
    %413 = vector.broadcast %394 : vector<1x32xf32> to vector<16x32xf32>
    %414 = arith.addf %412, %413 : vector<16x32xf32>
    %415 = arith.truncf %414 : vector<16x32xf32> to vector<16x32xbf16>
    %c0_167 = arith.constant 0 : index
    %c0_168 = arith.constant 0 : index
    %416 = vector.load %arg19[%c0_167, %c0_168] : memref<32x128xbf16, #tpu.memory_space<vmem>>, vector<32x128xbf16>
    %cst_169 = arith.constant dense<0.000000e+00> : vector<16x128xf32>
    %417 = tpu.matmul %415, %416, %cst_169 {dimension_numbers = #tpu.dot_dimension_numbers<[1], [0], [0], [1], [0, 0, 1, 1], [], []>} : vector<16x32xbf16>, vector<32x128xbf16>, vector<16x128xf32> -> vector<16x128xf32>
    %c0_170 = arith.constant 0 : index
    %c0_171 = arith.constant 0 : index
    %418 = vector.load %arg20[%c0_170, %c0_171] : memref<1x128xf32, #tpu.memory_space<vmem>>, vector<1x128xf32>
    %419 = vector.broadcast %418 : vector<1x128xf32> to vector<16x128xf32>
    %420 = arith.addf %417, %419 : vector<16x128xf32>
    %cst_172 = arith.constant 0.000000e+00 : f32
    %421 = vector.broadcast %cst_172 : f32 to vector<16x128xf32>
    %422 = arith.maximumf %420, %421 : vector<16x128xf32>
    %423 = arith.truncf %422 : vector<16x128xf32> to vector<16x128xbf16>
    %c0_173 = arith.constant 0 : index
    %c0_174 = arith.constant 0 : index
    %424 = vector.load %arg21[%c0_173, %c0_174] : memref<128x32xbf16, #tpu.memory_space<vmem>>, vector<128x32xbf16>
    %cst_175 = arith.constant dense<0.000000e+00> : vector<16x32xf32>
    %425 = tpu.matmul %423, %424, %cst_175 {dimension_numbers = #tpu.dot_dimension_numbers<[1], [0], [0], [1], [0, 0, 1, 1], [], []>} : vector<16x128xbf16>, vector<128x32xbf16>, vector<16x32xf32> -> vector<16x32xf32>
    %c0_176 = arith.constant 0 : index
    %c0_177 = arith.constant 0 : index
    %426 = vector.load %arg22[%c0_176, %c0_177] : memref<1x32xf32, #tpu.memory_space<vmem>>, vector<1x32xf32>
    %427 = vector.broadcast %426 : vector<1x32xf32> to vector<16x32xf32>
    %428 = arith.addf %425, %427 : vector<16x32xf32>
    %429 = arith.addf %428, %414 : vector<16x32xf32>
    %c0_178 = arith.constant 0 : index
    %c0_179 = arith.constant 0 : index
    %430 = vector.load %arg23[%c0_178, %c0_179] : memref<1x32xf32, #tpu.memory_space<vmem>>, vector<1x32xf32>
    %c0_180 = arith.constant 0 : index
    %c0_181 = arith.constant 0 : index
    %431 = vector.load %arg24[%c0_180, %c0_181] : memref<1x32xf32, #tpu.memory_space<vmem>>, vector<1x32xf32>
    %cst_182 = arith.constant dense<0.000000e+00> : vector<16xf32>
    %432 = vector.multi_reduction <add>, %429, %cst_182 [1] : vector<16x32xf32> to vector<16xf32>
    %433 = vector.shape_cast %432 : vector<16xf32> to vector<16x1xf32>
    %cst_183 = arith.constant 3.200000e+01 : f32
    %434 = vector.broadcast %cst_183 : f32 to vector<16x1xf32>
    %435 = arith.divf %433, %434 : vector<16x1xf32>
    %436 = vector.broadcast %435 : vector<16x1xf32> to vector<16x32xf32>
    %437 = arith.subf %429, %436 : vector<16x32xf32>
    %438 = arith.mulf %437, %437 : vector<16x32xf32>
    %cst_184 = arith.constant dense<0.000000e+00> : vector<16xf32>
    %439 = vector.multi_reduction <add>, %438, %cst_184 [1] : vector<16x32xf32> to vector<16xf32>
    %440 = vector.shape_cast %439 : vector<16xf32> to vector<16x1xf32>
    %cst_185 = arith.constant 3.200000e+01 : f32
    %441 = vector.broadcast %cst_185 : f32 to vector<16x1xf32>
    %442 = arith.divf %440, %441 : vector<16x1xf32>
    %cst_186 = arith.constant 9.99999974E-6 : f32
    %443 = vector.broadcast %cst_186 : f32 to vector<16x1xf32>
    %444 = arith.addf %442, %443 : vector<16x1xf32>
    %445 = math.rsqrt %444 : vector<16x1xf32>
    %446 = vector.broadcast %445 : vector<16x1xf32> to vector<16x32xf32>
    %447 = arith.mulf %437, %446 : vector<16x32xf32>
    %448 = vector.broadcast %430 : vector<1x32xf32> to vector<16x32xf32>
    %449 = arith.mulf %447, %448 : vector<16x32xf32>
    %450 = vector.broadcast %431 : vector<1x32xf32> to vector<16x32xf32>
    %451 = arith.addf %449, %450 : vector<16x32xf32>
    %c0_187 = arith.constant 0 : index
    %c0_188 = arith.constant 0 : index
    %452 = vector.load %arg25[%c0_187, %c0_188] : memref<16x32xf32, #tpu.memory_space<vmem>>, vector<16x32xf32>
    tpu.vector_store %arg25[%c0_187, %c0_188], %451 {strides = array<i32>} : memref<16x32xf32, #tpu.memory_space<vmem>>, vector<16x32xf32>,
    return
  }
  func.func @transform_0(%arg0: i32) -> (i32, i32) {
    %c0_i32 = arith.constant 0 : i32
    %c0_i32_0 = arith.constant 0 : i32
    return %arg0, %c0_i32 : i32, i32
  }
  func.func @transform_1(%arg0: i32) -> (i32, i32) {
    %c0_i32 = arith.constant 0 : i32
    %c0_i32_0 = arith.constant 0 : i32
    return %arg0, %c0_i32 : i32, i32
  }
  func.func @transform_2(%arg0: i32) -> (i32, i32, i32) {
    %c0_i32 = arith.constant 0 : i32
    %c0_i32_0 = arith.constant 0 : i32
    %c0_i32_1 = arith.constant 0 : i32
    return %arg0, %c0_i32, %c0_i32_0 : i32, i32, i32
  }
  func.func @transform_3(%arg0: i32) -> (i32, i32, i32) {
    %c0_i32 = arith.constant 0 : i32
    %c0_i32_0 = arith.constant 0 : i32
    %c0_i32_1 = arith.constant 0 : i32
    return %arg0, %c0_i32, %c0_i32_0 : i32, i32, i32
  }
  func.func @transform_4(%arg0: i32) -> (i32, i32) {
    %c0_i32 = arith.constant 0 : i32
    %c0_i32_0 = arith.constant 0 : i32
    %c0_i32_1 = arith.constant 0 : i32
    return %c0_i32, %c0_i32_0 : i32, i32
  }
  func.func @transform_5(%arg0: i32) -> (i32, i32) {
    %c0_i32 = arith.constant 0 : i32
    %c0_i32_0 = arith.constant 0 : i32
    %c0_i32_1 = arith.constant 0 : i32
    return %c0_i32, %c0_i32_0 : i32, i32
  }
  func.func @transform_6(%arg0: i32) -> (i32, i32) {
    %c0_i32 = arith.constant 0 : i32
    %c0_i32_0 = arith.constant 0 : i32
    %c0_i32_1 = arith.constant 0 : i32
    return %c0_i32, %c0_i32_0 : i32, i32
  }
  func.func @transform_7(%arg0: i32) -> (i32, i32) {
    %c0_i32 = arith.constant 0 : i32
    %c0_i32_0 = arith.constant 0 : i32
    %c0_i32_1 = arith.constant 0 : i32
    return %c0_i32, %c0_i32_0 : i32, i32
  }
  func.func @transform_8(%arg0: i32) -> (i32, i32) {
    %c0_i32 = arith.constant 0 : i32
    %c0_i32_0 = arith.constant 0 : i32
    %c0_i32_1 = arith.constant 0 : i32
    return %c0_i32, %c0_i32_0 : i32, i32
  }
  func.func @transform_9(%arg0: i32) -> (i32, i32) {
    %c0_i32 = arith.constant 0 : i32
    %c0_i32_0 = arith.constant 0 : i32
    %c0_i32_1 = arith.constant 0 : i32
    return %c0_i32, %c0_i32_0 : i32, i32
  }
  func.func @transform_10(%arg0: i32) -> (i32, i32) {
    %c0_i32 = arith.constant 0 : i32
    %c0_i32_0 = arith.constant 0 : i32
    %c0_i32_1 = arith.constant 0 : i32
    return %c0_i32, %c0_i32_0 : i32, i32
  }
  func.func @transform_11(%arg0: i32) -> (i32, i32) {
    %c0_i32 = arith.constant 0 : i32
    %c0_i32_0 = arith.constant 0 : i32
    %c0_i32_1 = arith.constant 0 : i32
    return %c0_i32, %c0_i32_0 : i32, i32
  }
  func.func @transform_12(%arg0: i32) -> (i32, i32) {
    %c0_i32 = arith.constant 0 : i32
    %c0_i32_0 = arith.constant 0 : i32
    %c0_i32_1 = arith.constant 0 : i32
    return %c0_i32, %c0_i32_0 : i32, i32
  }
  func.func @transform_13(%arg0: i32) -> (i32, i32) {
    %c0_i32 = arith.constant 0 : i32
    %c0_i32_0 = arith.constant 0 : i32
    %c0_i32_1 = arith.constant 0 : i32
    return %c0_i32, %c0_i32_0 : i32, i32
  }
  func.func @transform_14(%arg0: i32) -> (i32, i32) {
    %c0_i32 = arith.constant 0 : i32
    %c0_i32_0 = arith.constant 0 : i32
    %c0_i32_1 = arith.constant 0 : i32
    return %c0_i32, %c0_i32_0 : i32, i32
  }
  func.func @transform_15(%arg0: i32) -> (i32, i32) {
    %c0_i32 = arith.constant 0 : i32
    %c0_i32_0 = arith.constant 0 : i32
    %c0_i32_1 = arith.constant 0 : i32
    return %c0_i32, %c0_i32_0 : i32, i32
  }
  func.func @transform_16(%arg0: i32) -> (i32, i32) {
    %c0_i32 = arith.constant 0 : i32
    %c0_i32_0 = arith.constant 0 : i32
    %c0_i32_1 = arith.constant 0 : i32
    return %c0_i32, %c0_i32_0 : i32, i32
  }
  func.func @transform_17(%arg0: i32) -> (i32, i32) {
    %c0_i32 = arith.constant 0 : i32
    %c0_i32_0 = arith.constant 0 : i32
    %c0_i32_1 = arith.constant 0 : i32
    return %c0_i32, %c0_i32_0 : i32, i32
  }
  func.func @transform_18(%arg0: i32) -> (i32, i32) {
    %c0_i32 = arith.constant 0 : i32
    %c0_i32_0 = arith.constant 0 : i32
    %c0_i32_1 = arith.constant 0 : i32
    return %c0_i32, %c0_i32_0 : i32, i32
  }
  func.func @transform_19(%arg0: i32) -> (i32, i32) {
    %c0_i32 = arith.constant 0 : i32
    %c0_i32_0 = arith.constant 0 : i32
    %c0_i32_1 = arith.constant 0 : i32
    return %c0_i32, %c0_i32_0 : i32, i32
  }
  func.func @transform_20(%arg0: i32) -> (i32, i32) {
    %c0_i32 = arith.constant 0 : i32
    %c0_i32_0 = arith.constant 0 : i32
    %c0_i32_1 = arith.constant 0 : i32
    return %c0_i32, %c0_i32_0 : i32, i32
  }
  func.func @transform_21(%arg0: i32) -> (i32, i32) {
    %c0_i32 = arith.constant 0 : i32
    %c0_i32_0 = arith.constant 0 : i32
    %c0_i32_1 = arith.constant 0 : i32
    return %c0_i32, %c0_i32_0 : i32, i32
  }
  func.func @transform_22(%arg0: i32) -> (i32, i32) {
    %c0_i32 = arith.constant 0 : i32
    %c0_i32_0 = arith.constant 0 : i32
    %c0_i32_1 = arith.constant 0 : i32
    return %c0_i32, %c0_i32_0 : i32, i32
  }
  func.func @transform_23(%arg0: i32) -> (i32, i32) {
    %c0_i32 = arith.constant 0 : i32
    %c0_i32_0 = arith.constant 0 : i32
    %c0_i32_1 = arith.constant 0 : i32
    return %c0_i32, %c0_i32_0 : i32, i32
  }
  func.func @transform_24(%arg0: i32) -> (i32, i32) {
    %c0_i32 = arith.constant 0 : i32
    %c0_i32_0 = arith.constant 0 : i32
    return %arg0, %c0_i32 : i32, i32
  }
}

</mosaic_0001>

<bundles_post_ra>
// kernel: decoder_block.1
= control target key start
LH: loop header
LB: loop body
LE: loop exit
PB: predicated region body
PF: predicated region fallthrough
CT: control target
= control target key end

     0   :  { %s4570_s0 = inlined_call_operand.vmem [shape: f32[16,32], index: 0, kind: input, shape index: {}]   ;;  %s4571_s1 = inlined_call_operand.vmem [shape: f32[16,32], index: 1, kind: input, shape index: {}]   ;;  %s4572_s2 = inlined_call_operand.hbm [shape: s8[2,8,8], index: 2, kind: input, shape index: {}]   ;;  %s4573_s3 = inlined_call_operand.hbm [shape: s8[2,8,8], index: 3, kind: input, shape index: {}]   ;;  %s4574_s4 = inlined_call_operand.vmem [shape: bf16[32,96], index: 4, kind: input, shape index: {}]   ;;  %s4575_s5 = inlined_call_operand.hbm [shape: f32[1,96], index: 5, kind: input, shape index: {}]   ;;  %s4576_s6 = inlined_call_operand.vmem [shape: bf16[32,32], index: 6, kind: input, shape index: {}]   ;;  %s4577_s7 = inlined_call_operand.hbm [shape: f32[1,32], index: 7, kind: input, shape index: {}]   ;;  %s4578_s8 = inlined_call_operand.vmem [shape: f32[1,32], index: 8, kind: input, shape index: {}]   ;;  %s4579_s9 = inlined_call_operand.hbm [shape: f32[1,32], index: 9, kind: input, shape index: {}]   ;;  %s4580_s10 = inlined_call_operand.vmem [shape: bf16[32,32], index: 10, kind: input, shape index: {}]   ;;  %s4581_s11 = inlined_call_operand.hbm [shape: f32[1,32], index: 11, kind: input, shape index: {}]   ;;  %s4582_s12 = inlined_call_operand.vmem [shape: bf16[32,64], index: 12, kind: input, shape index: {}]   ;;  %s4583_s13 = inlined_call_operand.hbm [shape: f32[1,64], index: 13, kind: input, shape index: {}]   ;;  %s4584_s14 = inlined_call_operand.vmem [shape: bf16[32,32], index: 14, kind: input, shape index: {}]   ;;  %s4585_s15 = inlined_call_operand.hbm [shape: f32[1,32], index: 15, kind: input, shape index: {}]   ;;  %s4586_s16 = inlined_call_operand.hbm [shape: f32[1,32], index: 16, kind: input, shape index: {}]   ;;  %s4587_s17 = inlined_call_operand.hbm [shape: f32[1,32], index: 17, kind: input, shape index: {}]   ;;  %s4588_s18 = inlined_call_operand.vmem [shape: bf16[32,128], index: 18, kind: input, shape index: {}]   ;;  %s4589_s19 = inlined_call_operand.hbm [shape: f32[1,128], index: 19, kind: input, shape index: {}]   ;;  %s4590_s20 = inlined_call_operand.vmem [shape: bf16[128,32], index: 20, kind: input, shape index: {}]   ;;  %s4591_s21 = inlined_call_operand.hbm [shape: f32[1,32], index: 21, kind: input, shape index: {}]   ;;  %s4592_s22 = inlined_call_operand.hbm [shape: f32[1,32], index: 22, kind: input, shape index: {}]   ;;  %s4593_s23 = inlined_call_operand.hbm [shape: f32[1,32], index: 23, kind: input, shape index: {}]   ;;  %s4594_s24 = inlined_call_operand.hbm [shape: f32[16,32], index: 24, kind: output, shape index: {}]  }
   0x1   :  { %4605 = sst [smem:[#allocation36_spill]] %s4570_s0 }
   0x2   :  { %4606 = sst [smem:[#allocation37_spill]] %s4571_s1 }
   0x3   :  { %4607 = sst [smem:[#allocation38_spill]] %s4572_s2 }
   0x4   :  { %4608 = sst [smem:[#allocation39_spill]] %s4573_s3 }
   0x5   :  { %4609 = sst [smem:[#allocation40_spill]] %s4574_s4 }
   0x6   :  { %4610 = sst [smem:[#allocation41_spill]] %s4575_s5 }
   0x7   :  { %4611 = sst [smem:[#allocation42_spill]] %s4576_s6 }
   0x8   :  { %4612 = sst [smem:[#allocation43_spill]] %s4577_s7 }
   0x9   :  { %4613 = sst [smem:[#allocation44_spill]] %s4578_s8 }
   0xa   :  { %29 = vsyncpa [#allocation4], 0 }
   0xb   :  { %30 = vsyncpa [#allocation7], 0 }
   0xc   :  { %31 = vsyncpa [#allocation10], 0 }
   0xd   :  { %32 = vsyncpa [#allocation13], 0 }
   0xe   :  { %33 = vsyncpa [#allocation16], 0 }
   0xf   :  { %34 = vsyncpa [#allocation19], 0 }
  0x10   :  { %35 = vsyncpa [#allocation22], 0 }
  0x11   :  { %36 = vsyncpa [#allocation25], 0 }
  0x12   :  { %37 = vsyncpa [#allocation5], 0  ;;  %s3697_s5 = smov [#allocation6]   ;;  %s3698_s27 = smov [#allocation9]  }
  0x13   :  { %s59_s26 = sshll.u32 %s3697_s5, 4  ;;  %s86_s28 = sshll.u32 %s3698_s27, 4  ;;  %s60_s26 = int_to_ptr.vmem [resolvable:$true] %s59_s26  ;;  %s3856_s28 = int_to_ptr.vmem [resolvable:$true] %s86_s28 }
  0x14   :  { %s4614_s29 = sld [smem:[#allocation39_spill]] }
  0x1a   :  { %s3349_s0 = scalar_lea.hbm %s4614_s29, 64 }
  0x1b   :  { %p3350_p0 = scmp.ne.s32.totalorder %s4614_s29, %s3349_s0  ;;  %p3353_p1 = scmp.lt.u32.totalorder %s3349_s0, %s4614_s29 }
  0x1d   :  { %p3355_p2 = pnand %p3353_p1, %p3350_p0 }
  0x1f   :  { %3358 = shalt.err (!%p3355_p2)
}
  0x20   :  { %s3359_s8 = scalar_lea.vmem %s60_s26, 64  ;;  %p3364_p4 = scmp.lt.s32.totalorder %s60_s26, %s60_s26 }
  0x21   :  { %p3360_p3 = scmp.ne.s32.totalorder %s60_s26, %s3359_s8  ;;  %p3365_p5 = scmp.lt.s32.totalorder %s3359_s8, %s3359_s8 }
  0x23   :  { %p3366_p6 = por %p3365_p5, %p3364_p4 }
  0x25   :  { %p3367_p7 = pnand %p3366_p6, %p3360_p3 }
  0x27   :  { %3370 = shalt.err (!%p3367_p7)
}
  0x28   :  { %s4603_s4 = smov 32   ;;  %s4604_s1 = smov 2  }
  0x29   :  { %65 = dma.hbm_to_vmem [thread:$0]  %s4614_s29, 64, %s60_s26, [#allocation7], %s4603_s4, %s4603_s4, %s4604_s1  }
  0x2a   :  { %s4615_s0 = sld [smem:[#allocation43_spill]] }
  0x30   :  { %s3371_s7 = scalar_lea.hbm %s4615_s0, 16 }
  0x31   :  { %p3372_p8 = scmp.ne.s32.totalorder %s4615_s0, %s3371_s7  ;;  %p3375_p9 = scmp.lt.u32.totalorder %s3371_s7, %s4615_s0 }
  0x33   :  { %p3377_p10 = pnand %p3375_p9, %p3372_p8 }
  0x35   :  { %3380 = shalt.err (!%p3377_p10)
}
  0x36   :  { %s3381_s5 = scalar_lea.vmem %s3856_s28, 16  ;;  %s3385_s26 = scalar_lea.vmem %s3856_s28, 32 }
  0x37   :  { %p3382_p11 = scmp.ne.s32.totalorder %s3856_s28, %s3381_s5  ;;  %p3386_p12 = scmp.lt.s32.totalorder %s3856_s28, %s3856_s28 }
  0x38   :  { %p3387_p13 = scmp.lt.s32.totalorder %s3385_s26, %s3381_s5 }
  0x3a   :  { %p3388_p0 = por %p3387_p13, %p3386_p12 }
  0x3c   :  { %p3389_p1 = pnand %p3388_p0, %p3382_p11 }
  0x3e   :  { %3392 = shalt.err (!%p3389_p1)
}
  0x3f   :  { %89 = dma.hbm_to_vmem [thread:$0]  %s4615_s0, 16, %s3856_s28, [#allocation10]  }
  0x40   :  { %s3701_s6 = smov [#allocation12]   ;;  %s3702_s7 = smov [#allocation15]  }
  0x41   :  { %s110_s2 = sshll.u32 %s3701_s6, 4  ;;  %s134_s30 = sshll.u32 %s3702_s7, 4  ;;  %s111_s2 = int_to_ptr.vmem [resolvable:$true] %s110_s2  ;;  %s135_s30 = int_to_ptr.vmem [resolvable:$true] %s134_s30 }
  0x42   :  { %s3393_s8 = scalar_lea.hbm %s4581_s11, 16 }
  0x43   :  { %p3394_p2 = scmp.ne.s32.totalorder %s4581_s11, %s3393_s8  ;;  %p3397_p3 = scmp.lt.u32.totalorder %s3393_s8, %s4581_s11 }
  0x45   :  { %p3399_p4 = pnand %p3397_p3, %p3394_p2 }
  0x47   :  { %3402 = shalt.err (!%p3399_p4)
}
  0x48   :  { %s3403_s28 = scalar_lea.vmem %s111_s2, 16  ;;  %s3407_s0 = scalar_lea.vmem %s111_s2, 32 }
  0x49   :  { %p3404_p5 = scmp.ne.s32.totalorder %s111_s2, %s3403_s28  ;;  %p3408_p6 = scmp.lt.s32.totalorder %s111_s2, %s111_s2 }
  0x4a   :  { %p3409_p7 = scmp.lt.s32.totalorder %s3407_s0, %s3403_s28 }
  0x4c   :  { %p3410_p8 = por %p3409_p7, %p3408_p6 }
  0x4e   :  { %p3411_p9 = pnand %p3410_p8, %p3404_p5 }
  0x50   :  { %3414 = shalt.err (!%p3411_p9)
}
  0x51   :  { %113 = dma.hbm_to_vmem [thread:$0]  %s4581_s11, 16, %s111_s2, [#allocation13]  }
  0x52   :  { %s3415_s7 = scalar_lea.hbm %s4585_s15, 16 }
  0x53   :  { %p3416_p10 = scmp.ne.s32.totalorder %s4585_s15, %s3415_s7  ;;  %p3419_p11 = scmp.lt.u32.totalorder %s3415_s7, %s4585_s15 }
  0x55   :  { %p3421_p12 = pnand %p3419_p11, %p3416_p10 }
  0x57   :  { %3424 = shalt.err (!%p3421_p12)
}
  0x58   :  { %s3425_s5 = scalar_lea.vmem %s135_s30, 16  ;;  %s3429_s26 = scalar_lea.vmem %s135_s30, 32 }
  0x59   :  { %p3426_p13 = scmp.ne.s32.totalorder %s135_s30, %s3425_s5  ;;  %p3430_p0 = scmp.lt.s32.totalorder %s135_s30, %s135_s30 }
  0x5a   :  { %p3431_p1 = scmp.lt.s32.totalorder %s3429_s26, %s3425_s5 }
  0x5c   :  { %p3432_p2 = por %p3431_p1, %p3430_p0 }
  0x5e   :  { %p3433_p3 = pnand %p3432_p2, %p3426_p13 }
  0x60   :  { %3436 = shalt.err (!%p3433_p3)
}
  0x61   :  { %137 = dma.hbm_to_vmem [thread:$0]  %s4585_s15, 16, %s135_s30, [#allocation16]  }
  0x62   :  { %s3703_s28 = smov [#allocation18]   ;;  %s3704_s29 = smov [#allocation21]  }
  0x63   :  { %s154_s0 = sshll.u32 %s3703_s28, 4  ;;  %s178_s27 = sshll.u32 %s3704_s29, 4  ;;  %s155_s0 = int_to_ptr.vmem [resolvable:$true] %s154_s0  ;;  %s179_s27 = int_to_ptr.vmem [resolvable:$true] %s178_s27 }
  0x64   :  { %s3437_s7 = scalar_lea.hbm %s4587_s17, 16 }
  0x65   :  { %p3438_p4 = scmp.ne.s32.totalorder %s4587_s17, %s3437_s7  ;;  %p3441_p5 = scmp.lt.u32.totalorder %s3437_s7, %s4587_s17 }
  0x67   :  { %p3443_p6 = pnand %p3441_p5, %p3438_p4 }
  0x69   :  { %3446 = shalt.err (!%p3443_p6)
}
  0x6a   :  { %s3447_s15 = scalar_lea.vmem %s155_s0, 16  ;;  %s3451_s30 = scalar_lea.vmem %s155_s0, 32 }
  0x6b   :  { %p3448_p7 = scmp.ne.s32.totalorder %s155_s0, %s3447_s15  ;;  %p3452_p8 = scmp.lt.s32.totalorder %s155_s0, %s155_s0 }
  0x6c   :  { %p3453_p9 = scmp.lt.s32.totalorder %s3451_s30, %s3447_s15 }
  0x6e   :  { %p3454_p10 = por %p3453_p9, %p3452_p8 }
  0x70   :  { %p3455_p11 = pnand %p3454_p10, %p3448_p7 }
  0x72   :  { %3458 = shalt.err (!%p3455_p11)
}
  0x73   :  { %157 = dma.hbm_to_vmem [thread:$0]  %s4587_s17, 16, %s155_s0, [#allocation19]  }
  0x74   :  { %s3459_s28 = scalar_lea.hbm %s4591_s21, 16 }
  0x75   :  { %p3460_p12 = scmp.ne.s32.totalorder %s4591_s21, %s3459_s28  ;;  %p3463_p13 = scmp.lt.u32.totalorder %s3459_s28, %s4591_s21 }
  0x77   :  { %p3465_p0 = pnand %p3463_p13, %p3460_p12 }
  0x79   :  { %3468 = shalt.err (!%p3465_p0)
}
  0x7a   :  { %s3469_s1 = scalar_lea.vmem %s179_s27, 16  ;;  %s3473_s3 = scalar_lea.vmem %s179_s27, 32 }
  0x7b   :  { %p3470_p1 = scmp.ne.s32.totalorder %s179_s27, %s3469_s1  ;;  %p3474_p2 = scmp.lt.s32.totalorder %s179_s27, %s179_s27 }
  0x7c   :  { %p3475_p3 = scmp.lt.s32.totalorder %s3473_s3, %s3469_s1 }
  0x7e   :  { %p3476_p4 = por %p3475_p3, %p3474_p2 }
  0x80   :  { %p3477_p5 = pnand %p3476_p4, %p3470_p1 }
  0x82   :  { %3480 = shalt.err (!%p3477_p5)
}
  0x83   :  { %181 = dma.hbm_to_vmem [thread:$0]  %s4591_s21, 16, %s179_s27, [#allocation22]  }
  0x84   :  { %s3705_s25 = smov [#allocation3]   ;;  %s3706_s15 = smov [#allocation8]  }
  0x85   :  { %s47_s8 = sshll.u32 %s3705_s25, 4  ;;  %s74_s30 = sshll.u32 %s3706_s15, 4  ;;  %s48_s8 = int_to_ptr.vmem [resolvable:$true] %s47_s8  ;;  %s75_s30 = int_to_ptr.vmem [resolvable:$true] %s74_s30 }
  0x86   :  { %s4616_s11 = sld [smem:[#allocation38_spill]] }
  0x8c   :  { %s3481_s2 = scalar_lea.hbm %s4616_s11, 64 }
  0x8d   :  { %p3482_p6 = scmp.ne.s32.totalorder %s4616_s11, %s3481_s2  ;;  %p3485_p7 = scmp.lt.u32.totalorder %s3481_s2, %s4616_s11 }
  0x8f   :  { %p3487_p8 = pnand %p3485_p7, %p3482_p6 }
  0x91   :  { %3490 = shalt.err (!%p3487_p8)
}
  0x92   :  { %s3491_s21 = scalar_lea.vmem %s48_s8, 64  ;;  %p3496_p10 = scmp.lt.s32.totalorder %s48_s8, %s48_s8 }
  0x93   :  { %p3492_p9 = scmp.ne.s32.totalorder %s48_s8, %s3491_s21  ;;  %p3497_p11 = scmp.lt.s32.totalorder %s3491_s21, %s3491_s21 }
  0x95   :  { %p3498_p12 = por %p3497_p11, %p3496_p10 }
  0x97   :  { %p3499_p13 = pnand %p3498_p12, %p3492_p9 }
  0x99   :  { %3502 = shalt.err (!%p3499_p13)
}
  0x9a   :  { %s4617_s27 = smov 2   ;;  %s4618_s7 = smov 32  }
  0x9b   :  { %53 = dma.hbm_to_vmem [thread:$0]  %s4616_s11, 64, %s48_s8, [#allocation4], %s4618_s7, %s4618_s7, %s4617_s27  }
  0x9c   :  { %s4619_s25 = sld [smem:[#allocation41_spill]] }
  0xa2   :  { %s3503_s15 = scalar_lea.hbm %s4619_s25, 16 }
  0xa3   :  { %p3504_p0 = scmp.ne.s32.totalorder %s4619_s25, %s3503_s15  ;;  %p3507_p1 = scmp.lt.u32.totalorder %s3503_s15, %s4619_s25 }
  0xa5   :  { %p3509_p2 = pnand %p3507_p1, %p3504_p0 }
  0xa7   :  { %3512 = shalt.err (!%p3509_p2)
}
  0xa8   :  { %s3513_s29 = scalar_lea.vmem %s75_s30, 16  ;;  %s3517_s4 = scalar_lea.vmem %s75_s30, 32 }
  0xa9   :  { %p3514_p3 = scmp.ne.s32.totalorder %s75_s30, %s3513_s29  ;;  %p3518_p4 = scmp.lt.s32.totalorder %s75_s30, %s75_s30 }
  0xaa   :  { %p3519_p5 = scmp.lt.s32.totalorder %s3517_s4, %s3513_s29 }
  0xac   :  { %p3520_p6 = por %p3519_p5, %p3518_p4 }
  0xae   :  { %p3521_p7 = pnand %p3520_p6, %p3514_p3 }
  0xb0   :  { %3524 = shalt.err (!%p3521_p7)
}
  0xb1   :  { %77 = dma.hbm_to_vmem [thread:$0]  %s4619_s25, 16, %s75_s30, [#allocation7]  }
  0xb2   :  { %s3707_s6 = smov [#allocation11]   ;;  %s3708_s27 = smov [#allocation14]  }
  0xb3   :  { %s98_s21 = sshll.u32 %s3707_s6, 4  ;;  %s122_s7 = sshll.u32 %s3708_s27, 4  ;;  %s99_s21 = int_to_ptr.vmem [resolvable:$true] %s98_s21  ;;  %s123_s7 = int_to_ptr.vmem [resolvable:$true] %s122_s7 }
  0xb4   :  { %s3525_s17 = scalar_lea.hbm %s4579_s9, 16 }
  0xb5   :  { %p3526_p8 = scmp.ne.s32.totalorder %s4579_s9, %s3525_s17  ;;  %p3529_p9 = scmp.lt.u32.totalorder %s3525_s17, %s4579_s9 }
  0xb7   :  { %p3531_p10 = pnand %p3529_p9, %p3526_p8 }
  0xb9   :  { %3534 = shalt.err (!%p3531_p10)
}
  0xba   :  { %s3535_s30 = scalar_lea.vmem %s99_s21, 16  ;;  %s3539_s25 = scalar_lea.vmem %s99_s21, 32 }
  0xbb   :  { %p3536_p11 = scmp.ne.s32.totalorder %s99_s21, %s3535_s30  ;;  %p3540_p12 = scmp.lt.s32.totalorder %s99_s21, %s99_s21 }
  0xbc   :  { %p3541_p13 = scmp.lt.s32.totalorder %s3539_s25, %s3535_s30 }
  0xbe   :  { %p3542_p0 = por %p3541_p13, %p3540_p12 }
  0xc0   :  { %p3543_p1 = pnand %p3542_p0, %p3536_p11 }
  0xc2   :  { %3546 = shalt.err (!%p3543_p1)
}
  0xc3   :  { %101 = dma.hbm_to_vmem [thread:$0]  %s4579_s9, 16, %s99_s21, [#allocation10]  }
  0xc4   :  { %s3547_s8 = scalar_lea.hbm %s4583_s13, 16 }
  0xc5   :  { %p3548_p2 = scmp.ne.s32.totalorder %s4583_s13, %s3547_s8  ;;  %p3551_p3 = scmp.lt.u32.totalorder %s3547_s8, %s4583_s13 }
  0xc7   :  { %p3553_p4 = pnand %p3551_p3, %p3548_p2 }
  0xc9   :  { %3556 = shalt.err (!%p3553_p4)
}
  0xca   :  { %s3557_s3 = scalar_lea.vmem %s123_s7, 16  ;;  %s3561_s17 = scalar_lea.vmem %s123_s7, 32 }
  0xcb   :  { %p3558_p5 = scmp.ne.s32.totalorder %s123_s7, %s3557_s3  ;;  %p3562_p6 = scmp.lt.s32.totalorder %s123_s7, %s123_s7 }
  0xcc   :  { %p3563_p7 = scmp.lt.s32.totalorder %s3561_s17, %s3557_s3 }
  0xce   :  { %p3564_p8 = por %p3563_p7, %p3562_p6 }
  0xd0   :  { %p3565_p9 = pnand %p3564_p8, %p3558_p5 }
  0xd2   :  { %3568 = shalt.err (!%p3565_p9)
}
  0xd3   :  { %125 = dma.hbm_to_vmem [thread:$0]  %s4583_s13, 16, %s123_s7, [#allocation13]  }
  0xd4   :  { %s3709_s0 = smov [#allocation17]   ;;  %s3710_s5 = smov [#allocation20]  }
  0xd5   :  { %s144_s15 = sshll.u32 %s3709_s0, 4  ;;  %s166_s26 = sshll.u32 %s3710_s5, 4  ;;  %s145_s15 = int_to_ptr.vmem [resolvable:$true] %s144_s15  ;;  %s167_s26 = int_to_ptr.vmem [resolvable:$true] %s166_s26 }
  0xd6   :  { %s3569_s2 = scalar_lea.hbm %s4586_s16, 16 }
  0xd7   :  { %p3570_p10 = scmp.ne.s32.totalorder %s4586_s16, %s3569_s2  ;;  %p3573_p11 = scmp.lt.u32.totalorder %s3569_s2, %s4586_s16 }
  0xd9   :  { %p3575_p12 = pnand %p3573_p11, %p3570_p10 }
  0xdb   :  { %3578 = shalt.err (!%p3575_p12)
}
  0xdc   :  { %s3579_s13 = scalar_lea.vmem %s145_s15, 16  ;;  %s3583_s7 = scalar_lea.vmem %s145_s15, 32 }
  0xdd   :  { %p3580_p13 = scmp.ne.s32.totalorder %s145_s15, %s3579_s13  ;;  %p3584_p0 = scmp.lt.s32.totalorder %s145_s15, %s145_s15 }
  0xde   :  { %p3585_p1 = scmp.lt.s32.totalorder %s3583_s7, %s3579_s13 }
  0xe0   :  { %p3586_p2 = por %p3585_p1, %p3584_p0 }
  0xe2   :  { %p3587_p3 = pnand %p3586_p2, %p3580_p13 }
  0xe4   :  { %3590 = shalt.err (!%p3587_p3)
}
  0xe5   :  { %147 = dma.hbm_to_vmem [thread:$0]  %s4586_s16, 16, %s145_s15, [#allocation16]  }
  0xe6   :  { %s3591_s3 = scalar_lea.hbm %s4589_s19, 16 }
  0xe7   :  { %p3592_p4 = scmp.ne.s32.totalorder %s4589_s19, %s3591_s3  ;;  %p3595_p5 = scmp.lt.u32.totalorder %s3591_s3, %s4589_s19 }
  0xe9   :  { %p3597_p6 = pnand %p3595_p5, %p3592_p4 }
  0xeb   :  { %3600 = shalt.err (!%p3597_p6)
}
  0xec   :  { %s3601_s5 = scalar_lea.vmem %s167_s26, 16  ;;  %s3605_s30 = scalar_lea.vmem %s167_s26, 32 }
  0xed   :  { %p3602_p7 = scmp.ne.s32.totalorder %s167_s26, %s3601_s5  ;;  %p3606_p8 = scmp.lt.s32.totalorder %s167_s26, %s167_s26 }
  0xee   :  { %p3607_p9 = scmp.lt.s32.totalorder %s3605_s30, %s3601_s5 }
  0xf0   :  { %p3608_p10 = por %p3607_p9, %p3606_p8 }
  0xf2   :  { %p3609_p11 = pnand %p3608_p10, %p3602_p7 }
  0xf4   :  { %3612 = shalt.err (!%p3609_p11)
}
  0xf5   :  { %169 = dma.hbm_to_vmem [thread:$0]  %s4589_s19, 16, %s167_s26, [#allocation19]  }
  0xf6   :  { %s3711_s25 = smov [#allocation23]   ;;  %s3712_s28 = smov [#allocation24]  }
  0xf7   :  { %s188_s2 = sshll.u32 %s3711_s25, 4  ;;  %s198_s29 = sshll.u32 %s3712_s28, 4  ;;  %s189_s2 = int_to_ptr.vmem [resolvable:$true] %s188_s2  ;;  %s199_s29 = int_to_ptr.vmem [resolvable:$true] %s198_s29 }
  0xf8   :  { %s3613_s13 = scalar_lea.hbm %s4592_s22, 16 }
  0xf9   :  { %p3614_p12 = scmp.ne.s32.totalorder %s4592_s22, %s3613_s13  ;;  %p3617_p13 = scmp.lt.u32.totalorder %s3613_s13, %s4592_s22 }
  0xfb   :  { %p3619_p0 = pnand %p3617_p13, %p3614_p12 }
  0xfd   :  { %3622 = shalt.err (!%p3619_p0)
}
  0xfe   :  { %s3623_s19 = scalar_lea.vmem %s189_s2, 16  ;;  %s3627_s26 = scalar_lea.vmem %s189_s2, 32 }
  0xff   :  { %p3624_p1 = scmp.ne.s32.totalorder %s189_s2, %s3623_s19  ;;  %p3628_p2 = scmp.lt.s32.totalorder %s189_s2, %s189_s2 }
 0x100   :  { %p3629_p3 = scmp.lt.s32.totalorder %s3627_s26, %s3623_s19 }
 0x102   :  { %p3630_p4 = por %p3629_p3, %p3628_p2 }
 0x104   :  { %p3631_p5 = pnand %p3630_p4, %p3624_p1 }
 0x106   :  { %3634 = shalt.err (!%p3631_p5)
}
 0x107   :  { %191 = dma.hbm_to_vmem [thread:$0]  %s4592_s22, 16, %s189_s2, [#allocation22]  }
 0x108   :  { %s3635_s21 = scalar_lea.hbm %s4593_s23, 16 }
 0x109   :  { %p3636_p6 = scmp.ne.s32.totalorder %s4593_s23, %s3635_s21  ;;  %p3639_p7 = scmp.lt.u32.totalorder %s3635_s21, %s4593_s23 }
 0x10b   :  { %p3641_p8 = pnand %p3639_p7, %p3636_p6 }
 0x10d   :  { %3644 = shalt.err (!%p3641_p8)
}
 0x10e   :  { %s3645_s15 = scalar_lea.vmem %s199_s29, 16  ;;  %s3649_s25 = scalar_lea.vmem %s199_s29, 32 }
 0x10f   :  { %p3646_p9 = scmp.ne.s32.totalorder %s199_s29, %s3645_s15  ;;  %p3650_p10 = scmp.lt.s32.totalorder %s199_s29, %s199_s29 }
 0x110   :  { %p3651_p11 = scmp.lt.s32.totalorder %s3649_s25, %s3645_s15 }
 0x112   :  { %p3652_p12 = por %p3651_p11, %p3650_p10 }
 0x114   :  { %p3653_p13 = pnand %p3652_p12, %p3646_p9 }
 0x116   :  { %3656 = shalt.err (!%p3653_p13)
}
 0x117   :  { %201 = dma.hbm_to_vmem [thread:$0]  %s4593_s23, 16, %s199_s29, [#allocation25]  }
 0x118   :  { %3679 = dma.done.wait [#allocation4], 64  }
 0x119   :  { %3680 = vsyncadd [#allocation4], 4294967232 }
 0x11a   :  { %3681 = dma.done.wait [#allocation7], 80  }
 0x11b   :  { %3682 = vsyncadd [#allocation7], 4294967216 }
 0x11c   :  { %3683 = dma.done.wait [#allocation10], 32  }
 0x11d   :  { %3684 = vsyncadd [#allocation10], 4294967264 }
 0x11e   :  { %3685 = dma.done.wait [#allocation13], 32  }
 0x11f   :  { %3686 = vsyncadd [#allocation13], 4294967264 }
 0x120   :  { %3687 = dma.done.wait [#allocation16], 32  }
 0x121   :  { %3688 = vsyncadd [#allocation16], 4294967264 }
 0x122   :  { %3689 = dma.done.wait [#allocation19], 32  }
 0x123   :  { %3690 = vsyncadd [#allocation19], 4294967264 }
 0x124   :  { %3691 = dma.done.wait [#allocation22], 32  }
 0x125   :  { %3692 = vsyncadd [#allocation22], 4294967264 }
 0x126   :  { %3693 = dma.done.wait [#allocation25], 16  }
 0x127   :  { %3694 = vsyncadd [#allocation25], 4294967280  ;;  %v3713_v0 = vmov 0.0   ;;  %vm3714_vm0 = vmmov 0   ;;  %s4620_s29 = sld [smem:[#allocation40_spill]]  ;;  %s4621_s11 = sld [smem:[#allocation36_spill]] }
 0x128   :  { %2959 = vmatprep.subr.bf16.mxu1 %v3713_v0  ;;  %2963 = vmatprep.mubr.msk.bf16.mxu1 %vm3714_vm0, %v3713_v0  ;;  %vm274_vm1 = vcmask 261120   ;;  %v2797_v6 = vld [vmem:[#allocation8] ss:$0 sm:$0xff]  ;;  %s3715_s19 = smov 64   ;;  %s3716_s26 = smov 96   ;;  %vm331_vm2 = vcmask 64512  }
 0x129   :  { %2985 = vmatprep.subr.bf16.mxu0 %v3713_v0  ;;  %2987 = vmatprep.mubr.msk.bf16.mxu0 %vm3714_vm0, %v3713_v0  ;;  %s3717_s1 = smov 88   ;;  %vm395_vm3 = vcmask 1043456   ;;  %v4082_v21 = vld [vmem:[#allocation3] sm:$0xf]   ;;  %s3718_s3 = smov 72   ;;  %vm555_vm6 = vcmask 130112  }
 0x12a   :  { %v324_v22 = vunpack.c.0.s8 %v4082_v21  ;;  %s3719_s17 = smov 112   ;;  %s3720_s9 = smov 104   ;;  %vm671_vm7 = vcmask 195712   ;;  %vm787_vm8 = vcmask 261312  }
 0x12b   :  { %s3721_s21 = smov 120   ;;  %s3722_s0 = smov 80  }
 0x12c   :  { %v325_v23 = vcvt.s32.f32 %v324_v22  ;;  %s3723_s5 = smov 56   ;;  %s3724_s30 = smov 48  }
 0x12d   :  { %v3253_v1 = vld [vmem:[%s4620_s29] sm:$0xff]   ;;  %v3254_v2 = vld [vmem:[%s4620_s29 + $0x8] sm:$0xff]   ;;  %s3725_s16 = smov 40   ;;  %s3726_s15 = smov 8  }
 0x12e   :  { %2960 = vmatpush3.bf16.msra.mxu1 %v3253_v1  ;;  %v4053_v3 = vld [vmem:[%s4621_s11] sm:$0xff]  ;;  %v4058_v4 = vld [vmem:[%s4621_s11 + $0x8] sm:$0xff]  ;;  %vm326_vm4 = vcmp.eq.f32.partialorder %v325_v23, 0.0  ;;  %s3727_s25 = smov 16   ;;  %s3728_s22 = smov 24  }
 0x12f   :  { %2961 = vmatprep.subr.bf16.mxu1 %v3713_v0  ;;  %v250_v5 = vpack.c.bf16 %v4058_v4, %v4053_v3  ;;  %v4086_v24 = vsel %vm326_vm4, -1e+20, %v3713_v0  ;;  %s4622_s28 = sld [smem:[#allocation42_spill]]  ;;  %s4624_s4 = sld [smem:[#allocation44_spill]] }
 0x132   :  { %2962 = vmatpush3.bf16.msra.mxu1 %v3254_v2 }
 0x133   :  { %2967 = vmatprep.subr.bf16.mxu1 %v3713_v0 }
 0x135   :  { %2964 = vmatmul.mubr.msk.bf16.vlgmr.msra.gmra.mrb[0].mxu1 %vm274_vm1, %v250_v5 }
 0x136   :  { %2969 = vmatprep.mubr.msk.bf16.mxu1 %vm3714_vm0, %v3713_v0 }
 0x208   :  { %v312_v7 = vpop.f32.mrb[0].mxu1 }
 0x209   :  { %v313_v8 = vadd.f32 %v2797_v6, %v312_v7  ;;  %v2965_v9 = vpop.f32.mrb[1].mxu1 }
 0x20a   :  { %v315_v10 = vpop.f32.mrb[2].mxu1 }
 0x20b   :  { %v316_v11 = vadd.f32 %v2797_v6, %v315_v10  ;;  %v2966_v12 = vpop.f32.mrb[3].mxu1  ;;  %v319_v13 = vmul.f32 0.17677669, %v313_v8 }
 0x20d   :  { %v320_v14 = vmul.f32 0.17677669, %v316_v11  ;;  %v4067_v15 = vpack.c.bf16 %v316_v11, %v313_v8 }
 0x20f   :  { %v321_v16 = vpack.c.bf16 %v320_v14, %v319_v13  ;;  %390 = vrot.lane.b32.xlu1 %v4067_v15, %s3715_s19  ;;  %329 = vrot.lane.b32.xlu0 %v4067_v15, %s3716_s26  ;;  %v4101_v37 = vrot.slane %v4067_v15, 4 }
 0x211   :  { %v795_v31 = vrot.slane %v321_v16, 4 }
 0x213   :  { %443 = vrot.lane.b32.xlu1 %v4067_v15, %s3717_s1 }
 0x281   :  { %v330_v17 = vpop.permute.xlu0 %329  ;;  %v391_v19 = vpop.permute.xlu1 %390 }
 0x282   :  { %v336_v18 = vsel %vm331_vm2, %v330_v17, 0  ;;  %v397_v20 = vsel %vm395_vm3, %v391_v19, 0 }
 0x283   :  { %2968 = vmatpush3.bf16.xpose.msra.mxu1 %v336_v18  ;;  %v791_v18 = vunpack.c.1.s8 %v4082_v21 }
 0x284   :  { %2973 = vmatprep.subr.bf16.mxu1 %v3713_v0 }
 0x285   :  { %v444_v38 = vpop.permute.xlu1 %443  ;;  %v792_v19 = vcvt.s32.f32 %v791_v18 }
 0x286   :  { %v449_v44 = vsel %vm331_vm2, %v444_v38, 0 }
 0x287   :  { %vm793_vm5 = vcmp.eq.f32.partialorder %v792_v19, 0.0 }
 0x28a   :  { %2970 = vmatmul.mubr.msk.bf16.vlgmr.msra.gmra.mrb[4].mxu1 %vm331_vm2, %v321_v16 }
 0x28b   :  { %2974 = vmatpush3.bf16.msra.mxu1 %v397_v20  ;;  %2975 = vmatprep.mubr.msk.bf16.mxu1 %vm3714_vm0, %v3713_v0 }
 0x28c   :  { %2979 = vmatprep.subr.bf16.mxu1 %v3713_v0 }
 0x35d   :  { %v372_v25 = vpop.f32.mrb[4].mxu1 }
 0x35e   :  { %v373_v26 = vadd.f32 %v372_v25, %v4086_v24  ;;  %v2971_v27 = vpop.f32.mrb[5].mxu1 }
 0x35f   :  { %v375_v28 = vpop.f32.mrb[6].mxu1 }
 0x360   :  { %v2972_v29 = vpop.f32.mrb[7].mxu1  ;;  %v378_v30 = vsel %vm331_vm2, %v373_v26, -inf  ;;  %v794_v28 = vsel %vm793_vm5, -1e+20, %v3713_v0 }
 0x361   :  { %379 = vmax.xlane.f32.xlu0 %v378_v30 }
 0x377   :  { %675 = vrot.lane.b32.xlu0 %v4067_v15, %s3718_s3 }
 0x37b   :  { %1021 = vrot.lane.b32.xlu0 %v795_v31, %s3719_s17 }
 0x37f   :  { %1136 = vrot.lane.b32.xlu0 %v795_v31, %s3720_s9 }
 0x3ee   :  { %v380_v32 = vpop.xlane.xlu0 %379 }
 0x3ef   :  { %v381_v33 = vsub.f32 %v373_v26, %v380_v32 }
 0x3f1   :  { %v382_v34 = vmul.f32 1.442695, %v381_v33 }
 0x3f2   :  { %v676_v48 = vpop.permute.xlu0 %675 }
 0x3f3   :  { %3273 = vpow2.f32 %v382_v34  ;;  %v681_v50 = vsel %vm331_vm2, %v676_v48, 0 }
 0x3f6   :  { %v1022_v59 = vpop.permute.xlu0 %1021 }
 0x3fa   :  { %v1137_v61 = vpop.permute.xlu0 %1136 }
 0x3fd   :  { %v3274_v35 = vpop.eup %3273 }
 0x3fe   :  { %v384_v36 = vsel %vm331_vm2, %v3274_v35, 0.0 }
 0x3ff   :  { %385 = vadd.xlane.f32.xlu1 %v384_v36 }
 0x410   :  { %441 = vrot.lane.b32.xlu1 %v321_v16, %s3721_s21 }
 0x414   :  { %559 = vrot.lane.b32.xlu1 %v4067_v15, %s3722_s0 }
 0x418   :  { %557 = vrot.lane.b32.xlu1 %v321_v16, %s3719_s17 }
 0x41c   :  { %673 = vrot.lane.b32.xlu1 %v321_v16, %s3720_s9 }
 0x420   :  { %797 = vrot.lane.b32.xlu1 %v4101_v37, %s3716_s26 }
 0x424   :  { %908 = vrot.lane.b32.xlu1 %v4101_v37, %s3717_s1 }
 0x428   :  { %906 = vrot.lane.b32.xlu1 %v795_v31, %s3721_s21 }
 0x42c   :  { %1023 = vrot.lane.b32.xlu1 %v4101_v37, %s3722_s0 }
 0x430   :  { %1138 = vrot.lane.b32.xlu1 %v4101_v37, %s3718_s3 }
 0x48c   :  { %v386_v39 = vpop.xlane.xlu1 %385 }
 0x48d   :  { %3275 = vrcp.f32 %v386_v39 }
 0x490   :  { %v442_v41 = vpop.permute.xlu1 %441 }
 0x494   :  { %v560_v45 = vpop.permute.xlu1 %559 }
 0x495   :  { %v565_v47 = vsel %vm331_vm2, %v560_v45, 0 }
 0x497   :  { %v3276_v40 = vpop.eup %3275 }
 0x498   :  { %v388_v42 = vmul.f32 %v3276_v40, %v3274_v35  ;;  %v558_v46 = vpop.permute.xlu1 %557 }
 0x49a   :  { %v389_v43 = vpack.c.bf16 %v388_v42, %v388_v42 }
 0x49c   :  { %2976 = vmatmul.mubr.msk.bf16.vlgmr.msra.gmra.mrb[8].mxu1 %vm331_vm2, %v389_v43  ;;  %v674_v49 = vpop.permute.xlu1 %673 }
 0x49d   :  { %2980 = vmatpush3.bf16.xpose.msra.mxu1 %v449_v44  ;;  %2981 = vmatprep.mubr.msk.bf16.mxu1 %vm3714_vm0, %v3713_v0 }
 0x49e   :  { %2991 = vmatprep.subr.bf16.mxu1 %v3713_v0 }
 0x4a0   :  { %v798_v51 = vpop.permute.xlu1 %797 }
 0x4a1   :  { %v803_v52 = vsel %vm331_vm2, %v798_v51, 0 }
 0x4a4   :  { %2982 = vmatmul.mubr.msk.bf16.vlgmr.msra.gmra.mrb[12].mxu1 %vm331_vm2, %v442_v41  ;;  %v909_v53 = vpop.permute.xlu1 %908 }
 0x4a5   :  { %2992 = vmatpush3.bf16.xpose.msra.mxu1 %v565_v47  ;;  %2993 = vmatprep.mubr.msk.bf16.mxu1 %vm3714_vm0, %v3713_v0  ;;  %v914_v55 = vsel %vm331_vm2, %v909_v53, 0 }
 0x4a6   :  { %3003 = vmatprep.subr.bf16.mxu1 %v3713_v0 }
 0x4a8   :  { %v907_v54 = vpop.permute.xlu1 %906 }
 0x4ac   :  { %2994 = vmatmul.mubr.msk.bf16.vlgmr.msra.gmra.mrb[16].mxu1 %vm331_vm2, %v558_v46  ;;  %v1024_v56 = vpop.permute.xlu1 %1023 }
 0x4ad   :  { %3004 = vmatpush3.bf16.xpose.msra.mxu1 %v681_v50  ;;  %3005 = vmatprep.mubr.msk.bf16.mxu1 %vm3714_vm0, %v3713_v0  ;;  %v1029_v57 = vsel %vm331_vm2, %v1024_v56, 0 }
 0x4ae   :  { %3015 = vmatprep.subr.bf16.mxu1 %v3713_v0 }
 0x4b0   :  { %v1139_v58 = vpop.permute.xlu1 %1138 }
 0x4b1   :  { %v1144_v60 = vsel %vm331_vm2, %v1139_v58, 0 }
 0x4b4   :  { %3006 = vmatmul.mubr.msk.bf16.vlgmr.msra.gmra.mrb[20].mxu1 %vm331_vm2, %v674_v49 }
 0x4b5   :  { %3016 = vmatpush3.bf16.xpose.msra.mxu1 %v803_v52  ;;  %3017 = vmatprep.mubr.msk.bf16.mxu1 %vm3714_vm0, %v3713_v0 }
 0x4b6   :  { %3027 = vmatprep.subr.bf16.mxu1 %v3713_v0 }
 0x4bc   :  { %3018 = vmatmul.mubr.msk.bf16.vlgmr.msra.gmra.mrb[24].mxu1 %vm331_vm2, %v795_v31 }
 0x4bd   :  { %3028 = vmatpush3.bf16.xpose.msra.mxu1 %v914_v55  ;;  %3029 = vmatprep.mubr.msk.bf16.mxu1 %vm3714_vm0, %v3713_v0 }
 0x4be   :  { %3039 = vmatprep.subr.bf16.mxu1 %v3713_v0 }
 0x4c4   :  { %3030 = vmatmul.mubr.msk.bf16.vlgmr.msra.gmra.mrb[28].mxu1 %vm331_vm2, %v907_v54 }
 0x4c5   :  { %3040 = vmatpush3.bf16.xpose.msra.mxu1 %v1029_v57  ;;  %3041 = vmatprep.mubr.msk.bf16.mxu1 %vm3714_vm0, %v3713_v0 }
 0x4c6   :  { %3051 = vmatprep.subr.bf16.mxu1 %v3713_v0 }
 0x4cc   :  { %3042 = vmatmul.mubr.msk.bf16.vlgmr.msra.gmra.mrb[32].mxu1 %vm331_vm2, %v1022_v59 }
 0x4cd   :  { %3052 = vmatpush3.bf16.xpose.msra.mxu1 %v1144_v60  ;;  %3053 = vmatprep.mubr.msk.bf16.mxu1 %vm3714_vm0, %v3713_v0 }
 0x4ce   :  { %3063 = vmatprep.subr.bf16.mxu1 %v3713_v0 }
 0x4d4   :  { %3054 = vmatmul.mubr.msk.bf16.vlgmr.msra.gmra.mrb[36].mxu1 %vm331_vm2, %v1137_v61 }
 0x4d5   :  { %3067 = vmatprep.mubr.msk.bf16.mxu1 %vm3714_vm0, %v3713_v0 }
 0x56f   :  { %v433_v62 = vpop.f32.mrb[8].mxu1 }
 0x570   :  { %439 = vst.msk [vmem:[#allocation2] sm:$0xff] %vm331_vm2, %v433_v62  ;;  %v2977_v63 = vpop.f32.mrb[9].mxu1 }
 0x571   :  { %v436_v1 = vpop.f32.mrb[10].mxu1 }
 0x572   :  { %v2978_v2 = vpop.f32.mrb[11].mxu1 }
 0x577   :  { %v485_v5 = vpop.f32.mrb[12].mxu1 }
 0x578   :  { %v486_v6 = vadd.f32 %v485_v5, %v4086_v24  ;;  %v2983_v7 = vpop.f32.mrb[13].mxu1 }
 0x579   :  { %v488_v8 = vpop.f32.mrb[14].mxu1 }
 0x57a   :  { %v2984_v9 = vpop.f32.mrb[15].mxu1  ;;  %v491_v10 = vsel %vm331_vm2, %v486_v6, -inf }
 0x57b   :  { %492 = vmax.xlane.f32.xlu1 %v491_v10 }
 0x57f   :  { %v601_v11 = vpop.f32.mrb[16].mxu1 }
 0x580   :  { %v602_v12 = vadd.f32 %v601_v11, %v4086_v24  ;;  %v2995_v13 = vpop.f32.mrb[17].mxu1 }
 0x581   :  { %v604_v14 = vpop.f32.mrb[18].mxu1 }
 0x582   :  { %v2996_v16 = vpop.f32.mrb[19].mxu1  ;;  %v607_v17 = vsel %vm331_vm2, %v602_v12, -inf }
 0x583   :  { %608 = vmax.xlane.f32.xlu0 %v607_v17 }
 0x587   :  { %v717_v20 = vpop.f32.mrb[20].mxu1 }
 0x588   :  { %v718_v22 = vadd.f32 %v717_v20, %v4086_v24  ;;  %v3007_v23 = vpop.f32.mrb[21].mxu1 }
 0x589   :  { %v720_v25 = vpop.f32.mrb[22].mxu1 }
 0x58a   :  { %v3008_v26 = vpop.f32.mrb[23].mxu1  ;;  %v723_v27 = vsel %vm331_vm2, %v718_v22, -inf }
 0x58b   :  { %724 = vmax.xlane.f32.xlu0 %v723_v27 }
 0x58f   :  { %v839_v29 = vpop.f32.mrb[24].mxu1 }
 0x590   :  { %v4159_v30 = vadd.f32 %v839_v29, %v794_v28  ;;  %v3019_v31 = vpop.f32.mrb[25].mxu1 }
 0x591   :  { %v842_v32 = vpop.f32.mrb[26].mxu1 }
 0x592   :  { %v3020_v21 = vpop.f32.mrb[27].mxu1  ;;  %v845_v33 = vsel %vm331_vm2, %v4159_v30, -inf }
 0x593   :  { %846 = vmax.xlane.f32.xlu1 %v845_v33 }
 0x597   :  { %v950_v24 = vpop.f32.mrb[28].mxu1 }
 0x598   :  { %v951_v34 = vadd.f32 %v950_v24, %v794_v28  ;;  %v3031_v35 = vpop.f32.mrb[29].mxu1 }
 0x599   :  { %v953_v36 = vpop.f32.mrb[30].mxu1 }
 0x59a   :  { %v3032_v38 = vpop.f32.mrb[31].mxu1  ;;  %v956_v39 = vsel %vm331_vm2, %v951_v34, -inf }
 0x59b   :  { %957 = vmax.xlane.f32.xlu0 %v956_v39 }
 0x59f   :  { %v1065_v40 = vpop.f32.mrb[32].mxu1 }
 0x5a0   :  { %v1066_v41 = vadd.f32 %v1065_v40, %v794_v28  ;;  %v3043_v42 = vpop.f32.mrb[33].mxu1 }
 0x5a1   :  { %v1068_v43 = vpop.f32.mrb[34].mxu1 }
 0x5a2   :  { %v3044_v44 = vpop.f32.mrb[35].mxu1  ;;  %v1071_v45 = vsel %vm331_vm2, %v1066_v41, -inf }
 0x5a3   :  { %1072 = vmax.xlane.f32.xlu1 %v1071_v45 }
 0x5a7   :  { %v1180_v46 = vpop.f32.mrb[36].mxu1 }
 0x5a8   :  { %v1181_v47 = vadd.f32 %v1180_v46, %v794_v28  ;;  %v3055_v48 = vpop.f32.mrb[37].mxu1 }
 0x5a9   :  { %v1183_v49 = vpop.f32.mrb[38].mxu1 }
 0x5aa   :  { %v3056_v50 = vpop.f32.mrb[39].mxu1  ;;  %v1186_v51 = vsel %vm331_vm2, %v1181_v47, -inf }
 0x5ab   :  { %1187 = vmax.xlane.f32.xlu0 %v1186_v51 }
 0x5b4   :  { %503 = vrot.lane.b32.xlu1 %v4067_v15, %s3723_s5 }
 0x5c1   :  { %619 = vrot.lane.b32.xlu0 %v4067_v15, %s3724_s30 }
 0x608   :  { %v493_v52 = vpop.xlane.xlu1 %492 }
 0x609   :  { %v494_v53 = vsub.f32 %v486_v6, %v493_v52 }
 0x60b   :  { %v495_v54 = vmul.f32 1.442695, %v494_v53 }
 0x60d   :  { %3277 = vpow2.f32 %v495_v54 }
 0x610   :  { %v609_v55 = vpop.xlane.xlu0 %608 }
 0x611   :  { %v610_v56 = vsub.f32 %v602_v12, %v609_v55 }
 0x613   :  { %v611_v57 = vmul.f32 1.442695, %v610_v56 }
 0x615   :  { %3279 = vpow2.f32 %v611_v57 }
 0x617   :  { %v3278_v58 = vpop.eup %3277 }
 0x618   :  { %v725_v59 = vpop.xlane.xlu0 %724  ;;  %v497_v60 = vsel %vm331_vm2, %v3278_v58, 0.0 }
 0x619   :  { %v726_v61 = vsub.f32 %v718_v22, %v725_v59  ;;  %498 = vadd.xlane.f32.xlu1 %v497_v60 }
 0x61b   :  { %v727_v62 = vmul.f32 1.442695, %v726_v61 }
 0x61d   :  { %3281 = vpow2.f32 %v727_v62 }
 0x61f   :  { %v3280_v63 = vpop.eup %3279 }
 0x620   :  { %v613_v1 = vsel %vm331_vm2, %v3280_v63, 0.0  ;;  %v847_v6 = vpop.xlane.xlu1 %846 }
 0x621   :  { %614 = vadd.xlane.f32.xlu0 %v613_v1  ;;  %v848_v10 = vsub.f32 %v4159_v30, %v847_v6 }
 0x623   :  { %v849_v12 = vmul.f32 1.442695, %v848_v10 }
 0x625   :  { %3283 = vpow2.f32 %v849_v12 }
 0x627   :  { %v4172_v2 = vpop.eup %3281 }
 0x628   :  { %v729_v5 = vsel %vm331_vm2, %v4172_v2, 0.0  ;;  %v958_v11 = vpop.xlane.xlu0 %957 }
 0x629   :  { %730 = vadd.xlane.f32.xlu1 %v729_v5  ;;  %v959_v13 = vsub.f32 %v951_v34, %v958_v11 }
 0x62b   :  { %v960_v17 = vmul.f32 1.442695, %v959_v13 }
 0x62d   :  { %3285 = vpow2.f32 %v960_v17 }
 0x630   :  { %v1073_v7 = vpop.xlane.xlu1 %1072 }
 0x631   :  { %v1074_v16 = vsub.f32 %v1066_v41, %v1073_v7 }
 0x633   :  { %v1075_v19 = vmul.f32 1.442695, %v1074_v16 }
 0x634   :  { %v504_v8 = vpop.permute.xlu1 %503 }
 0x635   :  { %v509_v9 = vsel %vm395_vm3, %v504_v8, 0  ;;  %3287 = vpow2.f32 %v1075_v19 }
 0x636   :  { %2986 = vmatpush3.bf16.msra.mxu0 %v509_v9 }
 0x637   :  { %735 = vrot.lane.b32.xlu0 %v4067_v15, %s3725_s16  ;;  %2997 = vmatprep.subr.bf16.mxu0 %v3713_v0  ;;  %v3284_v15 = vpop.eup %3283 }
 0x638   :  { %v1188_v14 = vpop.xlane.xlu0 %1187  ;;  %v851_v22 = vsel %vm331_vm2, %v3284_v15, 0.0  ;;  %v3286_v23 = vpop.eup %3285 }
 0x639   :  { %v1189_v18 = vsub.f32 %v1181_v47, %v1188_v14  ;;  %v962_v26 = vsel %vm331_vm2, %v3286_v23, 0.0 }
 0x63a   :  { %857 = vrot.lane.b32.xlu1 %v4101_v37, %s3715_s19  ;;  %s4623_s19 = sld [smem:[#allocation37_spill]] }
 0x63b   :  { %v1190_v20 = vmul.f32 1.442695, %v1189_v18 }
 0x63c   :  { %v620_v31 = vpop.permute.xlu0 %619 }
 0x63d   :  { %3289 = vpow2.f32 %v1190_v20  ;;  %v625_v34 = vsel %vm395_vm3, %v620_v31, 0 }
 0x63f   :  { %v4184_v25 = vpop.eup %3287 }
 0x640   :  { %v1077_v28 = vsel %vm331_vm2, %v4184_v25, 0.0 }
 0x647   :  { %v4187_v27 = vpop.eup %3289 }
 0x648   :  { %v1192_v29 = vsel %vm331_vm2, %v4187_v27, 0.0 }
 0x656   :  { %852 = vadd.xlane.f32.xlu0 %v851_v22 }
 0x65a   :  { %963 = vadd.xlane.f32.xlu0 %v962_v26 }
 0x65e   :  { %1078 = vadd.xlane.f32.xlu1 %v1077_v28  ;;  %1193 = vadd.xlane.f32.xlu0 %v1192_v29  ;;  %v3255_v29 = vld [vmem:[%s4622_s28] sm:$0xff]  }
 0x65f   :  { %3064 = vmatpush3.bf16.msra.mxu1 %v3255_v29 }
 0x660   :  { %3065 = vmatprep.subr.bf16.mxu1 %v3713_v0 }
 0x66f   :  { %1083 = vrot.lane.b32.xlu1 %v4101_v37, %s3724_s30 }
 0x673   :  { %1198 = vrot.lane.b32.xlu1 %v4101_v37, %s3725_s16 }
 0x674   :  { %968 = vrot.lane.b32.xlu0 %v4101_v37, %s3723_s5 }
 0x6a6   :  { %v499_v30 = vpop.xlane.xlu1 %498 }
 0x6a7   :  { %3291 = vrcp.f32 %v499_v30  ;;  %v3256_v30 = vld [vmem:[%s4622_s28 + $0x8] sm:$0xff]  }
 0x6a8   :  { %3066 = vmatpush3.bf16.msra.mxu1 %v3256_v30  ;;  %v2827_v30 = vld [vmem:[#allocation14] ss:$0 sm:$0xff] }
 0x6a9   :  { %3079 = vmatprep.subr.bf16.mxu1 %v3713_v0 }
 0x6ae   :  { %v615_v32 = vpop.xlane.xlu0 %614 }
 0x6af   :  { %3293 = vrcp.f32 %v615_v32 }
 0x6b1   :  { %v3292_v21 = vpop.eup %3291 }
 0x6b2   :  { %v501_v33 = vmul.f32 %v3292_v21, %v3278_v58  ;;  %v736_v38 = vpop.permute.xlu0 %735 }
 0x6b3   :  { %v741_v40 = vsel %vm395_vm3, %v736_v38, 0 }
 0x6b4   :  { %v502_v24 = vpack.c.bf16 %v501_v33, %v501_v33 }
 0x6b6   :  { %2988 = vmatmul.mubr.msk.bf16.vlgmr.msra.gmra.mrb[0].mxu0 %vm331_vm2, %v502_v24  ;;  %v731_v35 = vpop.xlane.xlu1 %730 }
 0x6b7   :  { %3295 = vrcp.f32 %v731_v35  ;;  %2998 = vmatpush3.bf16.msra.mxu0 %v625_v34  ;;  %2999 = vmatprep.mubr.msk.bf16.mxu0 %vm3714_vm0, %v3713_v0 }
 0x6b8   :  { %3009 = vmatprep.subr.bf16.mxu0 %v3713_v0 }
 0x6b9   :  { %v3294_v37 = vpop.eup %3293 }
 0x6ba   :  { %v617_v36 = vmul.f32 %v3294_v37, %v3280_v63  ;;  %v858_v43 = vpop.permute.xlu1 %857 }
 0x6bb   :  { %v863_v45 = vsel %vm395_vm3, %v858_v43, 0 }
 0x6bc   :  { %v618_v39 = vpack.c.bf16 %v617_v36, %v617_v36 }
 0x6be   :  { %3000 = vmatmul.mubr.msk.bf16.vlgmr.msra.gmra.mrb[4].mxu0 %vm331_vm2, %v618_v39 }
 0x6bf   :  { %3010 = vmatpush3.bf16.msra.mxu0 %v741_v40  ;;  %3011 = vmatprep.mubr.msk.bf16.mxu0 %vm3714_vm0, %v3713_v0 }
 0x6c0   :  { %3021 = vmatprep.subr.bf16.mxu0 %v3713_v0 }
 0x6c1   :  { %v3296_v41 = vpop.eup %3295 }
 0x6c2   :  { %v733_v42 = vmul.f32 %v3296_v41, %v4172_v2 }
 0x6c4   :  { %v734_v44 = vpack.c.bf16 %v733_v42, %v733_v42 }
 0x6c6   :  { %3012 = vmatmul.mubr.msk.bf16.vlgmr.msra.gmra.mrb[8].mxu0 %vm331_vm2, %v734_v44 }
 0x6c7   :  { %3022 = vmatpush3.bf16.msra.mxu0 %v863_v45  ;;  %3023 = vmatprep.mubr.msk.bf16.mxu0 %vm3714_vm0, %v3713_v0 }
 0x6c8   :  { %3033 = vmatprep.subr.bf16.mxu0 %v3713_v0 }
 0x6e3   :  { %v853_v46 = vpop.xlane.xlu0 %852 }
 0x6e4   :  { %3297 = vrcp.f32 %v853_v46  ;;  %v2817_v46 = vld [vmem:[#allocation9] ss:$0 sm:$0xff] }
 0x6e7   :  { %v964_v47 = vpop.xlane.xlu0 %963 }
 0x6e8   :  { %3299 = vrcp.f32 %v964_v47 }
 0x6eb   :  { %v1194_v48 = vpop.xlane.xlu0 %1193  ;;  %v1079_v49 = vpop.xlane.xlu1 %1078 }
 0x6ec   :  { %3301 = vrcp.f32 %v1079_v49 }
 0x6ed   :  { %3303 = vrcp.f32 %v1194_v48 }
 0x6ee   :  { %v3298_v50 = vpop.eup %3297 }
 0x6ef   :  { %v855_v51 = vmul.f32 %v3298_v50, %v3284_v15  ;;  %v969_v52 = vpop.permute.xlu0 %968  ;;  %v1084_v57 = vpop.permute.xlu1 %1083 }
 0x6f0   :  { %v974_v55 = vsel %vm395_vm3, %v969_v52, 0  ;;  %v1089_v60 = vsel %vm395_vm3, %v1084_v57, 0 }
 0x6f1   :  { %v856_v53 = vpack.c.bf16 %v855_v51, %v855_v51 }
 0x6f2   :  { %v3300_v54 = vpop.eup %3299 }
 0x6f3   :  { %3024 = vmatmul.mubr.msk.bf16.vlgmr.msra.gmra.mrb[12].mxu0 %vm331_vm2, %v856_v53  ;;  %v966_v56 = vmul.f32 %v3300_v54, %v3286_v23  ;;  %v1199_v62 = vpop.permute.xlu1 %1198 }
 0x6f4   :  { %3034 = vmatpush3.bf16.msra.mxu0 %v974_v55  ;;  %3035 = vmatprep.mubr.msk.bf16.mxu0 %vm3714_vm0, %v3713_v0  ;;  %v1204_v2 = vsel %vm395_vm3, %v1199_v62, 0 }
 0x6f5   :  { %3045 = vmatprep.subr.bf16.mxu0 %v3713_v0  ;;  %v967_v58 = vpack.c.bf16 %v966_v56, %v966_v56 }
 0x6f6   :  { %v3302_v59 = vpop.eup %3301 }
 0x6f7   :  { %v1081_v61 = vmul.f32 %v3302_v59, %v4184_v25  ;;  %v3304_v1 = vpop.eup %3303 }
 0x6f8   :  { %v1196_v5 = vmul.f32 %v3304_v1, %v4187_v27 }
 0x6f9   :  { %v1082_v63 = vpack.c.bf16 %v1081_v61, %v1081_v61 }
 0x6fa   :  { %v1197_v6 = vpack.c.bf16 %v1196_v5, %v1196_v5  ;;  %v3258_v5 = vld [vmem:[%s4582_s12 + $0x8] sm:$0xff]  }
 0x6fb   :  { %3036 = vmatmul.mubr.msk.bf16.vlgmr.msra.gmra.mrb[16].mxu0 %vm331_vm2, %v967_v58 }
 0x6fc   :  { %3046 = vmatpush3.bf16.msra.mxu0 %v1089_v60  ;;  %3047 = vmatprep.mubr.msk.bf16.mxu0 %vm3714_vm0, %v3713_v0 }
 0x6fd   :  { %3057 = vmatprep.subr.bf16.mxu0 %v3713_v0 }
 0x703   :  { %3048 = vmatmul.mubr.msk.bf16.vlgmr.msra.gmra.mrb[20].mxu0 %vm331_vm2, %v1082_v63 }
 0x704   :  { %3058 = vmatpush3.bf16.msra.mxu0 %v1204_v2  ;;  %3059 = vmatprep.mubr.msk.bf16.mxu0 %vm3714_vm0, %v3713_v0 }
 0x705   :  { %3071 = vmatprep.subr.bf16.mxu0 %v3713_v0 }
 0x70b   :  { %3060 = vmatmul.mubr.msk.bf16.vlgmr.msra.gmra.mrb[24].mxu0 %vm331_vm2, %v1197_v6  ;;  %v247_v6 = vld [vmem:[%s4623_s19] sm:$0xff] }
 0x70c   :  { %3075 = vmatprep.mubr.msk.bf16.mxu0 %vm3714_vm0, %v3713_v0 }
 0x789   :  { %v545_v7 = vpop.f32.mrb[0].mxu0 }
 0x78a   :  { %552 = vrot.lane.b32.xlu1 %v545_v7, %s3726_s15  ;;  %v2989_v8 = vpop.f32.mrb[1].mxu0  ;;  %v248_v7 = vld [vmem:[%s4623_s19 + $0x8] sm:$0xff] }
 0x78b   :  { %v548_v9 = vpop.f32.mrb[2].mxu0  ;;  %v249_v8 = vpack.c.bf16 %v248_v7, %v247_v6 }
 0x78c   :  { %v2990_v10 = vpop.f32.mrb[3].mxu0  ;;  %v3259_v9 = vld [vmem:[%s4580_s10] sm:$0xff]  }
 0x78d   :  { %3072 = vmatpush3.bf16.msra.mxu0 %v3259_v9  ;;  %v3260_v10 = vld [vmem:[%s4580_s10 + $0x8] sm:$0xff]  }
 0x78e   :  { %3073 = vmatprep.subr.bf16.mxu0 %v3713_v0 }
 0x791   :  { %v661_v11 = vpop.f32.mrb[4].mxu0  ;;  %3074 = vmatpush3.bf16.msra.mxu0 %v3260_v10 }
 0x792   :  { %668 = vrot.lane.b32.xlu0 %v661_v11, %s3727_s25  ;;  %v3001_v12 = vpop.f32.mrb[5].mxu0  ;;  %3087 = vmatprep.subr.bf16.mxu0 %v3713_v0 }
 0x793   :  { %v664_v13 = vpop.f32.mrb[6].mxu0 }
 0x794   :  { %v3002_v14 = vpop.f32.mrb[7].mxu0 }
 0x799   :  { %v777_v16 = vpop.f32.mrb[8].mxu0 }
 0x79a   :  { %784 = vrot.lane.b32.xlu0 %v777_v16, %s3728_s22  ;;  %v3013_v17 = vpop.f32.mrb[9].mxu0 }
 0x79b   :  { %v780_v18 = vpop.f32.mrb[10].mxu0 }
 0x79c   :  { %v3014_v19 = vpop.f32.mrb[11].mxu0 }
 0x7c6   :  { %v899_v20 = vpop.f32.mrb[12].mxu0 }
 0x7c7   :  { %905 = vst.msk [vmem:[#allocation2 + $0x8] sm:$0xff] %vm331_vm2, %v899_v20  ;;  %v3025_v15 = vpop.f32.mrb[13].mxu0  ;;  %v2821_v20 = vld [vmem:[%s4624_s4] ss:$0 sm:$0xff] }
 0x7c8   :  { %v902_v22 = vpop.f32.mrb[14].mxu0 }
 0x7c9   :  { %v3026_v23 = vpop.f32.mrb[15].mxu0 }
 0x7ce   :  { %v1010_v25 = vpop.f32.mrb[16].mxu0 }
 0x7cf   :  { %1017 = vrot.lane.b32.xlu1 %v1010_v25, %s3726_s15  ;;  %v3037_v26 = vpop.f32.mrb[17].mxu0  ;;  %v2822_v25 = vld [vmem:[#allocation11] ss:$0 sm:$0xff] }
 0x7d0   :  { %v1013_v27 = vpop.f32.mrb[18].mxu0 }
 0x7d1   :  { %v3038_v28 = vpop.f32.mrb[19].mxu0 }
 0x7d6   :  { %v1125_v31 = vpop.f32.mrb[20].mxu0 }
 0x7d7   :  { %1132 = vrot.lane.b32.xlu1 %v1125_v31, %s3727_s25  ;;  %v3049_v32 = vpop.f32.mrb[21].mxu0 }
 0x7d8   :  { %v1128_v21 = vpop.f32.mrb[22].mxu0 }
 0x7d9   :  { %v3050_v33 = vpop.f32.mrb[23].mxu0 }
 0x7de   :  { %v1240_v24 = vpop.f32.mrb[24].mxu0 }
 0x7df   :  { %1247 = vrot.lane.b32.xlu1 %v1240_v24, %s3728_s22  ;;  %v3061_v34 = vpop.f32.mrb[25].mxu0 }
 0x7e0   :  { %v1243_v35 = vpop.f32.mrb[26].mxu0 }
 0x7e1   :  { %v3062_v37 = vpop.f32.mrb[27].mxu0 }
 0x7fc   :  { %v553_v36 = vpop.permute.xlu1 %552 }
 0x7fd   :  { %556 = vst.msk [vmem:[#allocation2] sm:$0xff] %vm555_vm6, %v553_v36  ;;  %v2823_v36 = vld [vmem:[#allocation12] ss:$0 sm:$0xff] }
 0x804   :  { %v669_v38 = vpop.permute.xlu0 %668 }
 0x805   :  { %672 = vst.msk [vmem:[#allocation2] sm:$0xff] %vm671_vm7, %v669_v38 }
 0x80c   :  { %v785_v39 = vpop.permute.xlu0 %784 }
 0x80d   :  { %788 = vst.msk [vmem:[#allocation2] sm:$0xff] %vm787_vm8, %v785_v39 }
 0x814   :  { %v1251_v43 = vld [vmem:[#allocation2] sm:$0xff] }
 0x841   :  { %v1018_v40 = vpop.permute.xlu1 %1017 }
 0x842   :  { %1020 = vst.msk [vmem:[#allocation2 + $0x8] sm:$0xff] %vm555_vm6, %v1018_v40 }
 0x849   :  { %v1133_v41 = vpop.permute.xlu1 %1132 }
 0x84a   :  { %1135 = vst.msk [vmem:[#allocation2 + $0x8] sm:$0xff] %vm671_vm7, %v1133_v41 }
 0x851   :  { %v1248_v42 = vpop.permute.xlu1 %1247 }
 0x852   :  { %1250 = vst.msk [vmem:[#allocation2 + $0x8] sm:$0xff] %vm787_vm8, %v1248_v42 }
 0x859   :  { %v1252_v44 = vld [vmem:[#allocation2 + $0x8] sm:$0xff] }
 0x85a   :  { %v1253_v45 = vpack.c.bf16 %v1252_v44, %v1251_v43 }
 0x85c   :  { %3068 = vmatmul.mubr.msk.bf16.vlgmr.msra.gmra.mrb[40].mxu1 %vm274_vm1, %v1253_v45 }
 0x85d   :  { %3083 = vmatprep.mubr.msk.bf16.mxu1 %vm3714_vm0, %v3713_v0 }
 0x92f   :  { %v1314_v47 = vpop.f32.mrb[40].mxu1 }
 0x930   :  { %v1315_v48 = vadd.f32 %v2817_v46, %v1314_v47  ;;  %v3069_v49 = vpop.f32.mrb[41].mxu1 }
 0x931   :  { %v1317_v50 = vpop.f32.mrb[42].mxu1 }
 0x932   :  { %v1318_v51 = vadd.f32 %v2817_v46, %v1317_v50  ;;  %v3070_v52 = vpop.f32.mrb[43].mxu1  ;;  %v1321_v53 = vadd.f32 %v1315_v48, %v4053_v3 }
 0x934   :  { %v1325_v54 = vsel %vm274_vm1, %v1321_v53, 0.0  ;;  %v1322_v55 = vadd.f32 %v1318_v51, %v4058_v4  ;;  %v3257_v4 = vld [vmem:[%s4582_s12] sm:$0xff]  }
 0x935   :  { %1326 = vadd.xlane.f32.xlu0 %v1325_v54  ;;  %3080 = vmatpush3.bf16.msra.mxu1 %v3257_v4 }
 0x936   :  { %v1328_v56 = vsel %vm274_vm1, %v1322_v55, 0.0  ;;  %3081 = vmatprep.subr.bf16.mxu1 %v3713_v0 }
 0x937   :  { %1329 = vadd.xlane.f32.xlu1 %v1328_v56 }
 0x939   :  { %3082 = vmatpush3.bf16.msra.mxu1 %v3258_v5  ;;  %v1507_v5 = vld [vmem:[#allocation6] sm:$0xf]  }
 0x93a   :  { %3093 = vmatprep.subr.bf16.mxu1 %v3713_v0  ;;  %v1508_v6 = vunpack.c.0.s8 %v1507_v5 }
 0x93c   :  { %3084 = vmatmul.mubr.msk.bf16.vlgmr.msra.gmra.mrb[44].mxu1 %vm274_vm1, %v249_v8  ;;  %v1509_v7 = vcvt.s32.f32 %v1508_v6 }
 0x93d   :  { %3095 = vmatprep.mubr.msk.bf16.mxu1 %vm3714_vm0, %v3713_v0 }
 0x93e   :  { %vm1510_vm9 = vcmp.eq.f32.partialorder %v1509_v7, 0.0 }
 0x93f   :  { %v1511_v8 = vsel %vm1510_vm9, -1e+20, %v3713_v0 }
 0x9c2   :  { %v1327_v57 = vpop.xlane.xlu0 %1326 }
 0x9c3   :  { %v1332_v58 = vmul.f32 0.03125, %v1327_v57 }
 0x9c4   :  { %v1330_v59 = vpop.xlane.xlu1 %1329 }
 0x9c5   :  { %v1334_v60 = vsub.f32 %v1321_v53, %v1332_v58  ;;  %v1333_v61 = vmul.f32 0.03125, %v1330_v59 }
 0x9c7   :  { %v1335_v62 = vsub.f32 %v1322_v55, %v1333_v61  ;;  %v1336_v63 = vmul.f32 %v1334_v60, %v1334_v60 }
 0x9c9   :  { %v1338_v1 = vsel %vm274_vm1, %v1336_v63, 0.0  ;;  %v1337_v2 = vmul.f32 %v1335_v62, %v1335_v62 }
 0x9ca   :  { %1339 = vadd.xlane.f32.xlu0 %v1338_v1 }
 0x9cb   :  { %v1341_v3 = vsel %vm274_vm1, %v1337_v2, 0.0 }
 0x9ce   :  { %1342 = vadd.xlane.f32.xlu0 %v1341_v3 }
 0xa0f   :  { %v1499_v31 = vpop.f32.mrb[44].mxu1 }
 0xa10   :  { %v1500_v32 = vadd.f32 %v2827_v30, %v1499_v31  ;;  %v3085_v21 = vpop.f32.mrb[45].mxu1  ;;  %v1968_v31 = vunpack.c.1.s8 %v1507_v5 }
 0xa11   :  { %v1502_v33 = vpop.f32.mrb[46].mxu1 }
 0xa12   :  { %v1503_v24 = vadd.f32 %v2827_v30, %v1502_v33  ;;  %v3086_v34 = vpop.f32.mrb[47].mxu1 }
 0xa14   :  { %v4302_v35 = vpack.c.bf16 %v1503_v24, %v1500_v32  ;;  %v1969_v32 = vcvt.s32.f32 %v1968_v31 }
 0xa16   :  { %1623 = vrot.lane.b32.xlu1 %v4302_v35, %s3721_s21  ;;  %v1516_v37 = vsel %vm331_vm2, %v4302_v35, 0  ;;  %v4322_v50 = vrot.slane %v4302_v35, 4  ;;  %vm1970_vm10 = vcmp.eq.f32.partialorder %v1969_v32, 0.0 }
 0xa18   :  { %v1978_v58 = vsel %vm331_vm2, %v4322_v50, 0 }
 0xa1a   :  { %1738 = vrot.lane.b32.xlu1 %v4302_v35, %s3719_s17 }
 0xa57   :  { %v1340_v11 = vpop.xlane.xlu0 %1339 }
 0xa58   :  { %v1344_v12 = vmul.f32 0.03125, %v1340_v11 }
 0xa5a   :  { %v1346_v13 = vadd.f32 1e-05, %v1344_v12 }
 0xa5b   :  { %v1343_v14 = vpop.xlane.xlu0 %1342 }
 0xa5c   :  { %3305 = vrsqrt.f32 %v1346_v13  ;;  %v1345_v16 = vmul.f32 0.03125, %v1343_v14 }
 0xa5e   :  { %v1347_v17 = vadd.f32 1e-05, %v1345_v16 }
 0xa60   :  { %3307 = vrsqrt.f32 %v1347_v17 }
 0xa66   :  { %v3306_v18 = vpop.eup %3305 }
 0xa67   :  { %v1350_v19 = vmul.f32 %v3306_v18, %v1334_v60 }
 0xa69   :  { %v1358_v22 = vmul.f32 %v2821_v20, %v1350_v19 }
 0xa6a   :  { %v3308_v15 = vpop.eup %3307 }
 0xa6b   :  { %v1351_v23 = vmul.f32 %v3308_v15, %v1335_v62  ;;  %v4293_v27 = vadd.f32 %v2822_v25, %v1358_v22 }
 0xa6d   :  { %v1359_v26 = vmul.f32 %v2821_v20, %v1351_v23 }
 0xa6f   :  { %v4295_v28 = vadd.f32 %v2822_v25, %v1359_v26 }
 0xa71   :  { %v1368_v29 = vpack.c.bf16 %v4295_v28, %v4293_v27 }
 0xa73   :  { %3076 = vmatmul.mubr.msk.bf16.vlgmr.msra.gmra.mrb[28].mxu0 %vm274_vm1, %v1368_v29 }
 0xa74   :  { %3089 = vmatprep.mubr.msk.bf16.mxu0 %vm3714_vm0, %v3713_v0  ;;  %3088 = vmatpush3.bf16.xpose.msra.mxu0 %v1516_v37 }
 0xa75   :  { %3099 = vmatprep.subr.bf16.mxu0 %v3713_v0 }
 0xa88   :  { %v1624_v47 = vpop.permute.xlu1 %1623 }
 0xa89   :  { %v1629_v48 = vsel %vm331_vm2, %v1624_v47, 0 }
 0xa8c   :  { %v1739_v51 = vpop.permute.xlu1 %1738 }
 0xa8d   :  { %v1744_v53 = vsel %vm331_vm2, %v1739_v51, 0 }
 0xb46   :  { %v1429_v38 = vpop.f32.mrb[28].mxu0 }
 0xb47   :  { %v1430_v39 = vadd.f32 %v2823_v36, %v1429_v38  ;;  %v3077_v40 = vpop.f32.mrb[29].mxu0  ;;  %v1971_v38 = vsel %vm1970_vm10, -1e+20, %v3713_v0 }
 0xb48   :  { %v1432_v41 = vpop.f32.mrb[30].mxu0 }
 0xb49   :  { %v1433_v42 = vadd.f32 %v2823_v36, %v1432_v41  ;;  %v3078_v43 = vpop.f32.mrb[31].mxu0  ;;  %v1436_v44 = vmul.f32 0.17677669, %v1430_v39 }
 0xb4b   :  { %v1437_v45 = vmul.f32 0.17677669, %v1433_v42 }
 0xb4d   :  { %v1438_v46 = vpack.c.bf16 %v1437_v45, %v1436_v44 }
 0xb4f   :  { %1621 = vrot.lane.b32.xlu0 %v1438_v46, %s3721_s21  ;;  %1736 = vrot.lane.b32.xlu1 %v1438_v46, %s3719_s17  ;;  %v1972_v49 = vrot.slane %v1438_v46, 4 }
 0xb50   :  { %3090 = vmatmul.mubr.msk.bf16.vlgmr.msra.gmra.mrb[32].mxu0 %vm331_vm2, %v1438_v46 }
 0xb51   :  { %3100 = vmatpush3.bf16.xpose.msra.mxu0 %v1629_v48  ;;  %3101 = vmatprep.mubr.msk.bf16.mxu0 %vm3714_vm0, %v3713_v0 }
 0xb52   :  { %3111 = vmatprep.subr.bf16.mxu0 %v3713_v0 }
 0xb53   :  { %1853 = vrot.lane.b32.xlu0 %v4302_v35, %s3720_s9  ;;  %1851 = vrot.lane.b32.xlu1 %v1438_v46, %s3720_s9 }
 0xb57   :  { %2081 = vrot.lane.b32.xlu1 %v1972_v49, %s3721_s21  ;;  %2083 = vrot.lane.b32.xlu0 %v4322_v50, %s3721_s21 }
 0xb5b   :  { %2196 = vrot.lane.b32.xlu1 %v1972_v49, %s3719_s17  ;;  %2198 = vrot.lane.b32.xlu0 %v4322_v50, %s3719_s17 }
 0xb5f   :  { %2311 = vrot.lane.b32.xlu1 %v1972_v49, %s3720_s9  ;;  %2313 = vrot.lane.b32.xlu0 %v4322_v50, %s3720_s9 }
 0xbc1   :  { %v1622_v52 = vpop.permute.xlu0 %1621  ;;  %v1737_v55 = vpop.permute.xlu1 %1736 }
 0xbc2   :  { %3102 = vmatmul.mubr.msk.bf16.vlgmr.msra.gmra.mrb[36].mxu0 %vm331_vm2, %v1622_v52 }
 0xbc3   :  { %3112 = vmatpush3.bf16.xpose.msra.mxu0 %v1744_v53  ;;  %3113 = vmatprep.mubr.msk.bf16.mxu0 %vm3714_vm0, %v3713_v0 }
 0xbc4   :  { %3123 = vmatprep.subr.bf16.mxu0 %v3713_v0 }
 0xbc5   :  { %v1854_v54 = vpop.permute.xlu0 %1853  ;;  %v1852_v57 = vpop.permute.xlu1 %1851 }
 0xbc6   :  { %v1859_v56 = vsel %vm331_vm2, %v1854_v54, 0 }
 0xbc9   :  { %v2084_v59 = vpop.permute.xlu0 %2083  ;;  %v2082_v62 = vpop.permute.xlu1 %2081 }
 0xbca   :  { %3114 = vmatmul.mubr.msk.bf16.vlgmr.msra.gmra.mrb[40].mxu0 %vm331_vm2, %v1737_v55  ;;  %v2089_v60 = vsel %vm331_vm2, %v2084_v59, 0 }
 0xbcb   :  { %3124 = vmatpush3.bf16.xpose.msra.mxu0 %v1859_v56  ;;  %3125 = vmatprep.mubr.msk.bf16.mxu0 %vm3714_vm0, %v3713_v0 }
 0xbcc   :  { %3135 = vmatprep.subr.bf16.mxu0 %v3713_v0 }
 0xbcd   :  { %v2199_v61 = vpop.permute.xlu0 %2198  ;;  %v2197_v2 = vpop.permute.xlu1 %2196 }
 0xbce   :  { %v2204_v63 = vsel %vm331_vm2, %v2199_v61, 0 }
 0xbd1   :  { %v2314_v1 = vpop.permute.xlu0 %2313  ;;  %v2312_v4 = vpop.permute.xlu1 %2311 }
 0xbd2   :  { %3126 = vmatmul.mubr.msk.bf16.vlgmr.msra.gmra.mrb[44].mxu0 %vm331_vm2, %v1852_v57  ;;  %v2319_v3 = vsel %vm331_vm2, %v2314_v1, 0 }
 0xbd3   :  { %3136 = vmatpush3.bf16.xpose.msra.mxu0 %v1978_v58  ;;  %3137 = vmatprep.mubr.msk.bf16.mxu0 %vm3714_vm0, %v3713_v0 }
 0xbd4   :  { %3147 = vmatprep.subr.bf16.mxu0 %v3713_v0 }
 0xbda   :  { %3138 = vmatmul.mubr.msk.bf16.vlgmr.msra.gmra.mrb[48].mxu0 %vm331_vm2, %v1972_v49 }
 0xbdb   :  { %3148 = vmatpush3.bf16.xpose.msra.mxu0 %v2089_v60  ;;  %3149 = vmatprep.mubr.msk.bf16.mxu0 %vm3714_vm0, %v3713_v0 }
 0xbdc   :  { %3159 = vmatprep.subr.bf16.mxu0 %v3713_v0 }
 0xbe2   :  { %3150 = vmatmul.mubr.msk.bf16.vlgmr.msra.gmra.mrb[52].mxu0 %vm331_vm2, %v2082_v62 }
 0xbe3   :  { %3160 = vmatpush3.bf16.xpose.msra.mxu0 %v2204_v63  ;;  %3161 = vmatprep.mubr.msk.bf16.mxu0 %vm3714_vm0, %v3713_v0 }
 0xbe4   :  { %3171 = vmatprep.subr.bf16.mxu0 %v3713_v0 }
 0xbea   :  { %3162 = vmatmul.mubr.msk.bf16.vlgmr.msra.gmra.mrb[56].mxu0 %vm331_vm2, %v2197_v2 }
 0xbeb   :  { %3172 = vmatpush3.bf16.xpose.msra.mxu0 %v2319_v3  ;;  %3173 = vmatprep.mubr.msk.bf16.mxu0 %vm3714_vm0, %v3713_v0 }
 0xbec   :  { %3183 = vmatprep.subr.bf16.mxu0 %v3713_v0 }
 0xbf2   :  { %3174 = vmatmul.mubr.msk.bf16.vlgmr.msra.gmra.mrb[60].mxu0 %vm331_vm2, %v2312_v4 }
 0xbf3   :  { %3187 = vmatprep.mubr.msk.bf16.mxu0 %vm3714_vm0, %v3713_v0 }
 0xc23   :  { %v1552_v9 = vpop.f32.mrb[32].mxu0 }
 0xc24   :  { %v1553_v10 = vadd.f32 %v1552_v9, %v1511_v8  ;;  %v3091_v11 = vpop.f32.mrb[33].mxu0 }
 0xc25   :  { %v1555_v12 = vpop.f32.mrb[34].mxu0 }
 0xc26   :  { %v3092_v13 = vpop.f32.mrb[35].mxu0  ;;  %v1558_v14 = vsel %vm331_vm2, %v1553_v10, -inf }
 0xc27   :  { %1559 = vmax.xlane.f32.xlu0 %v1558_v14 }
 0xc95   :  { %v1665_v16 = vpop.f32.mrb[36].mxu0 }
 0xc96   :  { %v4369_v17 = vadd.f32 %v1665_v16, %v1511_v8  ;;  %v3103_v18 = vpop.f32.mrb[37].mxu0 }
 0xc97   :  { %v1668_v19 = vpop.f32.mrb[38].mxu0 }
 0xc98   :  { %v3104_v20 = vpop.f32.mrb[39].mxu0  ;;  %v1671_v15 = vsel %vm331_vm2, %v4369_v17, -inf }
 0xc99   :  { %1672 = vmax.xlane.f32.xlu1 %v1671_v15 }
 0xc9d   :  { %v1780_v22 = vpop.f32.mrb[40].mxu0 }
 0xc9e   :  { %v1781_v23 = vadd.f32 %v1780_v22, %v1511_v8  ;;  %v3115_v25 = vpop.f32.mrb[41].mxu0 }
 0xc9f   :  { %v1783_v26 = vpop.f32.mrb[42].mxu0 }
 0xca0   :  { %v3116_v29 = vpop.f32.mrb[43].mxu0  ;;  %v1786_v30 = vsel %vm331_vm2, %v1781_v23, -inf }
 0xca1   :  { %1787 = vmax.xlane.f32.xlu0 %v1786_v30 }
 0xca5   :  { %v1895_v21 = vpop.f32.mrb[44].mxu0 }
 0xca6   :  { %v4374_v33 = vadd.f32 %v1895_v21, %v1511_v8  ;;  %v3127_v24 = vpop.f32.mrb[45].mxu0 }
 0xca7   :  { %v1898_v34 = vpop.f32.mrb[46].mxu0 }
 0xca8   :  { %v3128_v37 = vpop.f32.mrb[47].mxu0  ;;  %v1901_v36 = vsel %vm331_vm2, %v4374_v33, -inf }
 0xca9   :  { %1902 = vmax.xlane.f32.xlu0 %v1901_v36 }
 0xcad   :  { %v2014_v39 = vpop.f32.mrb[48].mxu0 }
 0xcae   :  { %v4379_v40 = vadd.f32 %v2014_v39, %v1971_v38  ;;  %v3139_v41 = vpop.f32.mrb[49].mxu0 }
 0xcaf   :  { %v2017_v42 = vpop.f32.mrb[50].mxu0 }
 0xcb0   :  { %v3140_v43 = vpop.f32.mrb[51].mxu0  ;;  %v2020_v44 = vsel %vm331_vm2, %v4379_v40, -inf }
 0xcb1   :  { %2021 = vmax.xlane.f32.xlu1 %v2020_v44 }
 0xcb4   :  { %v1560_v62 = vpop.xlane.xlu0 %1559 }
 0xcb5   :  { %v2125_v45 = vpop.f32.mrb[52].mxu0  ;;  %v1561_v63 = vsub.f32 %v1553_v10, %v1560_v62 }
 0xcb6   :  { %v2126_v46 = vadd.f32 %v2125_v45, %v1971_v38  ;;  %v3151_v47 = vpop.f32.mrb[53].mxu0 }
 0xcb7   :  { %v2128_v48 = vpop.f32.mrb[54].mxu0  ;;  %v1562_v1 = vmul.f32 1.442695, %v1561_v63 }
 0xcb8   :  { %v3152_v49 = vpop.f32.mrb[55].mxu0  ;;  %v2131_v51 = vsel %vm331_vm2, %v2126_v46, -inf }
 0xcb9   :  { %2132 = vmax.xlane.f32.xlu0 %v2131_v51  ;;  %3309 = vpow2.f32 %v1562_v1 }
 0xcbd   :  { %v2240_v52 = vpop.f32.mrb[56].mxu0 }
 0xcbe   :  { %v2241_v53 = vadd.f32 %v2240_v52, %v1971_v38  ;;  %v3163_v54 = vpop.f32.mrb[57].mxu0 }
 0xcbf   :  { %v2243_v55 = vpop.f32.mrb[58].mxu0 }
 0xcc0   :  { %v3164_v56 = vpop.f32.mrb[59].mxu0  ;;  %v2246_v57 = vsel %vm331_vm2, %v2241_v53, -inf }
 0xcc1   :  { %2247 = vmax.xlane.f32.xlu1 %v2246_v57 }
 0xcc3   :  { %v4390_v4 = vpop.eup %3309 }
 0xcc4   :  { %v1564_v5 = vsel %vm331_vm2, %v4390_v4, 0.0 }
 0xcc5   :  { %v2355_v58 = vpop.f32.mrb[60].mxu0 }
 0xcc6   :  { %v3175_v59 = vpop.f32.mrb[61].mxu0  ;;  %v2356_v2 = vadd.f32 %v2355_v58, %v1971_v38 }
 0xcc7   :  { %v2358_v60 = vpop.f32.mrb[62].mxu0 }
 0xcc8   :  { %v3176_v61 = vpop.f32.mrb[63].mxu0  ;;  %v2361_v3 = vsel %vm331_vm2, %v2356_v2, -inf }
 0xccf   :  { %1683 = vrot.lane.b32.xlu0 %v4302_v35, %s3717_s1 }
 0xcd2   :  { %1571 = vrot.lane.b32.xlu1 %v4302_v35, %s3716_s26 }
 0xcee   :  { %2362 = vmax.xlane.f32.xlu0 %v2361_v3 }
 0xcf6   :  { %1565 = vadd.xlane.f32.xlu1 %v1564_v5 }
 0xd26   :  { %v1673_v6 = vpop.xlane.xlu1 %1672 }
 0xd27   :  { %v1674_v7 = vsub.f32 %v4369_v17, %v1673_v6 }
 0xd29   :  { %v1675_v8 = vmul.f32 1.442695, %v1674_v7 }
 0xd2b   :  { %3311 = vpow2.f32 %v1675_v8 }
 0xd2e   :  { %v1788_v9 = vpop.xlane.xlu0 %1787 }
 0xd2f   :  { %v1789_v11 = vsub.f32 %v1781_v23, %v1788_v9 }
 0xd31   :  { %v1790_v10 = vmul.f32 1.442695, %v1789_v11 }
 0xd33   :  { %3313 = vpow2.f32 %v1790_v10 }
 0xd35   :  { %v4395_v12 = vpop.eup %3311 }
 0xd36   :  { %v1677_v13 = vsel %vm331_vm2, %v4395_v12, 0.0  ;;  %v1903_v20 = vpop.xlane.xlu0 %1902 }
 0xd37   :  { %1678 = vadd.xlane.f32.xlu0 %v1677_v13  ;;  %v1904_v22 = vsub.f32 %v4374_v33, %v1903_v20 }
 0xd39   :  { %v1905_v23 = vmul.f32 1.442695, %v1904_v22 }
 0xd3b   :  { %3315 = vpow2.f32 %v1905_v23 }
 0xd3d   :  { %v4399_v14 = vpop.eup %3313 }
 0xd3e   :  { %v1792_v16 = vsel %vm331_vm2, %v4399_v14, 0.0  ;;  %v2022_v18 = vpop.xlane.xlu1 %2021 }
 0xd3f   :  { %1793 = vadd.xlane.f32.xlu1 %v1792_v16  ;;  %v2023_v25 = vsub.f32 %v4379_v40, %v2022_v18 }
 0xd41   :  { %v2024_v30 = vmul.f32 1.442695, %v2023_v25 }
 0xd43   :  { %3317 = vpow2.f32 %v2024_v30 }
 0xd45   :  { %v3316_v21 = vpop.eup %3315 }
 0xd46   :  { %v2133_v26 = vpop.xlane.xlu0 %2132  ;;  %v1907_v24 = vsel %vm331_vm2, %v3316_v21, 0.0 }
 0xd47   :  { %v2134_v29 = vsub.f32 %v2126_v46, %v2133_v26 }
 0xd49   :  { %v2135_v32 = vmul.f32 1.442695, %v2134_v29 }
 0xd4a   :  { %v1684_v40 = vpop.permute.xlu0 %1683 }
 0xd4b   :  { %3319 = vpow2.f32 %v2135_v32  ;;  %v1689_v51 = vsel %vm395_vm3, %v1684_v40, 0 }
 0xd4d   :  { %1798 = vrot.lane.b32.xlu0 %v4302_v35, %s3722_s0  ;;  %v4412_v34 = vpop.eup %3317 }
 0xd4e   :  { %v2248_v17 = vpop.xlane.xlu1 %2247  ;;  %v2026_v37 = vsel %vm331_vm2, %v4412_v34, 0.0 }
 0xd4f   :  { %v2249_v31 = vsub.f32 %v2241_v53, %v2248_v17 }
 0xd50   :  { %1913 = vrot.lane.b32.xlu1 %v4302_v35, %s3718_s3 }
 0xd51   :  { %v2250_v35 = vmul.f32 1.442695, %v2249_v31 }
 0xd52   :  { %v1572_v19 = vpop.permute.xlu1 %1571 }
 0xd53   :  { %v1577_v15 = vsel %vm395_vm3, %v1572_v19, 0  ;;  %3321 = vpow2.f32 %v2250_v35 }
 0xd54   :  { %3094 = vmatpush3.bf16.msra.mxu1 %v1577_v15 }
 0xd55   :  { %3105 = vmatprep.subr.bf16.mxu1 %v3713_v0  ;;  %v4414_v33 = vpop.eup %3319 }
 0xd56   :  { %v2137_v38 = vsel %vm331_vm2, %v4414_v33, 0.0 }
 0xd5d   :  { %v4418_v36 = vpop.eup %3321 }
 0xd5e   :  { %v2252_v39 = vsel %vm331_vm2, %v4418_v36, 0.0 }
 0xd6c   :  { %1908 = vadd.xlane.f32.xlu0 %v1907_v24 }
 0xd70   :  { %2027 = vadd.xlane.f32.xlu0 %v2026_v37 }
 0xd74   :  { %2138 = vadd.xlane.f32.xlu1 %v2137_v38  ;;  %2253 = vadd.xlane.f32.xlu0 %v2252_v39 }
 0xd7b   :  { %v2363_v41 = vpop.xlane.xlu0 %2362 }
 0xd7c   :  { %v2364_v42 = vsub.f32 %v2356_v2, %v2363_v41 }
 0xd7e   :  { %v2365_v43 = vmul.f32 1.442695, %v2364_v42 }
 0xd80   :  { %3323 = vpow2.f32 %v2365_v43 }
 0xd83   :  { %v1566_v44 = vpop.xlane.xlu1 %1565 }
 0xd84   :  { %3325 = vrcp.f32 %v1566_v44 }
 0xd85   :  { %2143 = vrot.lane.b32.xlu1 %v4322_v50, %s3717_s1 }
 0xd89   :  { %2258 = vrot.lane.b32.xlu1 %v4322_v50, %s3722_s0 }
 0xd8a   :  { %v4428_v45 = vpop.eup %3323 }
 0xd8b   :  { %v2367_v46 = vsel %vm331_vm2, %v4428_v45, 0.0 }
 0xd8c   :  { %2368 = vadd.xlane.f32.xlu0 %v2367_v46 }
 0xd8d   :  { %2373 = vrot.lane.b32.xlu1 %v4322_v50, %s3718_s3 }
 0xd8e   :  { %v3326_v47 = vpop.eup %3325 }
 0xd8f   :  { %v1568_v48 = vmul.f32 %v3326_v47, %v4390_v4 }
 0xd91   :  { %v1569_v49 = vpack.c.bf16 %v1568_v48, %v1568_v48 }
 0xd93   :  { %3096 = vmatmul.mubr.msk.bf16.vlgmr.msra.gmra.mrb[48].mxu1 %vm331_vm2, %v1569_v49 }
 0xd94   :  { %3106 = vmatpush3.bf16.msra.mxu1 %v1689_v51  ;;  %3107 = vmatprep.mubr.msk.bf16.mxu1 %vm3714_vm0, %v3713_v0 }
 0xd95   :  { %3117 = vmatprep.subr.bf16.mxu1 %v3713_v0 }
 0xda2   :  { %2032 = vrot.lane.b32.xlu0 %v4322_v50, %s3716_s26 }
 0xdc4   :  { %v1679_v52 = vpop.xlane.xlu0 %1678 }
 0xdc5   :  { %3327 = vrcp.f32 %v1679_v52 }
 0xdc8   :  { %v1799_v56 = vpop.permute.xlu0 %1798 }
 0xdc9   :  { %v1804_v58 = vsel %vm395_vm3, %v1799_v56, 0  ;;  %v3262_v56 = vld [vmem:[%s4584_s14 + $0x8] sm:$0xff]  }
 0xdcc   :  { %v1794_v53 = vpop.xlane.xlu1 %1793 }
 0xdcd   :  { %3329 = vrcp.f32 %v1794_v53 }
 0xdcf   :  { %v3328_v54 = vpop.eup %3327 }
 0xdd0   :  { %v1681_v55 = vmul.f32 %v3328_v54, %v4395_v12  ;;  %v1914_v60 = vpop.permute.xlu1 %1913 }
 0xdd1   :  { %v1919_v62 = vsel %vm395_vm3, %v1914_v60, 0 }
 0xdd2   :  { %v1682_v57 = vpack.c.bf16 %v1681_v55, %v1681_v55  ;;  %v3261_v55 = vld [vmem:[%s4584_s14] sm:$0xff]  }
 0xdd3   :  { %3184 = vmatpush3.bf16.msra.mxu0 %v3261_v55 }
 0xdd4   :  { %3108 = vmatmul.mubr.msk.bf16.vlgmr.msra.gmra.mrb[52].mxu1 %vm331_vm2, %v1682_v57  ;;  %3185 = vmatprep.subr.bf16.mxu0 %v3713_v0 }
 0xdd5   :  { %3118 = vmatpush3.bf16.msra.mxu1 %v1804_v58  ;;  %3119 = vmatprep.mubr.msk.bf16.mxu1 %vm3714_vm0, %v3713_v0 }
 0xdd6   :  { %3129 = vmatprep.subr.bf16.mxu1 %v3713_v0 }
 0xdd7   :  { %v3330_v50 = vpop.eup %3329  ;;  %3186 = vmatpush3.bf16.msra.mxu0 %v3262_v56 }
 0xdd8   :  { %v1796_v59 = vmul.f32 %v3330_v50, %v4399_v14  ;;  %3199 = vmatprep.subr.bf16.mxu0 %v3713_v0 }
 0xdda   :  { %v1797_v61 = vpack.c.bf16 %v1796_v59, %v1796_v59 }
 0xddc   :  { %3120 = vmatmul.mubr.msk.bf16.vlgmr.msra.gmra.mrb[56].mxu1 %vm331_vm2, %v1797_v61 }
 0xddd   :  { %3130 = vmatpush3.bf16.msra.mxu1 %v1919_v62  ;;  %3131 = vmatprep.mubr.msk.bf16.mxu1 %vm3714_vm0, %v3713_v0 }
 0xdde   :  { %3141 = vmatprep.subr.bf16.mxu1 %v3713_v0 }
 0xdf9   :  { %v1909_v63 = vpop.xlane.xlu0 %1908 }
 0xdfa   :  { %3331 = vrcp.f32 %v1909_v63 }
 0xdfd   :  { %v2028_v4 = vpop.xlane.xlu0 %2027 }
 0xdfe   :  { %3333 = vrcp.f32 %v2028_v4 }
 0xe01   :  { %v2139_v5 = vpop.xlane.xlu1 %2138  ;;  %v2254_v6 = vpop.xlane.xlu0 %2253 }
 0xe02   :  { %3335 = vrcp.f32 %v2139_v5 }
 0xe03   :  { %3337 = vrcp.f32 %v2254_v6 }
 0xe04   :  { %v3332_v1 = vpop.eup %3331 }
 0xe05   :  { %v1911_v2 = vmul.f32 %v3332_v1, %v3316_v21  ;;  %v2144_v12 = vpop.permute.xlu1 %2143 }
 0xe06   :  { %v2149_v16 = vsel %vm395_vm3, %v2144_v12, 0 }
 0xe07   :  { %v1912_v3 = vpack.c.bf16 %v1911_v2, %v1911_v2 }
 0xe08   :  { %v3334_v7 = vpop.eup %3333 }
 0xe09   :  { %3132 = vmatmul.mubr.msk.bf16.vlgmr.msra.gmra.mrb[60].mxu1 %vm331_vm2, %v1912_v3  ;;  %v2030_v9 = vmul.f32 %v3334_v7, %v4412_v34  ;;  %v2259_v17 = vpop.permute.xlu1 %2258 }
 0xe0a   :  { %3143 = vmatprep.mubr.msk.bf16.mxu1 %vm3714_vm0, %v3713_v0  ;;  %v2264_v15 = vsel %vm395_vm3, %v2259_v17, 0 }
 0xe0b   :  { %v2031_v13 = vpack.c.bf16 %v2030_v9, %v2030_v9 }
 0xe0c   :  { %v3336_v14 = vpop.eup %3335 }
 0xe0d   :  { %v2141_v18 = vmul.f32 %v3336_v14, %v4414_v33  ;;  %v3338_v20 = vpop.eup %3337  ;;  %v2374_v23 = vpop.permute.xlu1 %2373 }
 0xe0e   :  { %v2256_v22 = vmul.f32 %v3338_v20, %v4418_v36  ;;  %v2379_v29 = vsel %vm395_vm3, %v2374_v23, 0 }
 0xe0f   :  { %v2142_v19 = vpack.c.bf16 %v2141_v18, %v2141_v18 }
 0xe10   :  { %v2257_v25 = vpack.c.bf16 %v2256_v22, %v2256_v22 }
 0xe19   :  { %v2369_v8 = vpop.xlane.xlu0 %2368 }
 0xe1a   :  { %3339 = vrcp.f32 %v2369_v8 }
 0xe1d   :  { %v2033_v11 = vpop.permute.xlu0 %2032 }
 0xe1e   :  { %v2038_v10 = vsel %vm395_vm3, %v2033_v11, 0  ;;  %v2847_v11 = vld [vmem:[#allocation15] ss:$0 sm:$0xff] }
 0xe1f   :  { %3142 = vmatpush3.bf16.msra.mxu1 %v2038_v10 }
 0xe20   :  { %3153 = vmatprep.subr.bf16.mxu1 %v3713_v0 }
 0xe22   :  { %3144 = vmatmul.mubr.msk.bf16.vlgmr.msra.gmra.mrb[64].mxu1 %vm331_vm2, %v2031_v13 }
 0xe23   :  { %3154 = vmatpush3.bf16.msra.mxu1 %v2149_v16  ;;  %3155 = vmatprep.mubr.msk.bf16.mxu1 %vm3714_vm0, %v3713_v0 }
 0xe24   :  { %3165 = vmatprep.subr.bf16.mxu1 %v3713_v0  ;;  %v3340_v26 = vpop.eup %3339 }
 0xe25   :  { %v2371_v30 = vmul.f32 %v3340_v26, %v4428_v45 }
 0xe27   :  { %v2372_v31 = vpack.c.bf16 %v2371_v30, %v2371_v30 }
 0xe2a   :  { %3156 = vmatmul.mubr.msk.bf16.vlgmr.msra.gmra.mrb[68].mxu1 %vm331_vm2, %v2142_v19 }
 0xe2b   :  { %3166 = vmatpush3.bf16.msra.mxu1 %v2264_v15  ;;  %3167 = vmatprep.mubr.msk.bf16.mxu1 %vm3714_vm0, %v3713_v0 }
 0xe2c   :  { %3177 = vmatprep.subr.bf16.mxu1 %v3713_v0 }
 0xe32   :  { %3168 = vmatmul.mubr.msk.bf16.vlgmr.msra.gmra.mrb[72].mxu1 %vm331_vm2, %v2257_v25 }
 0xe33   :  { %3178 = vmatpush3.bf16.msra.mxu1 %v2379_v29  ;;  %3179 = vmatprep.mubr.msk.bf16.mxu1 %vm3714_vm0, %v3713_v0 }
 0xe34   :  { %3191 = vmatprep.subr.bf16.mxu1 %v3713_v0 }
 0xe3a   :  { %3180 = vmatmul.mubr.msk.bf16.vlgmr.msra.gmra.mrb[76].mxu1 %vm331_vm2, %v2372_v31 }
 0xe3b   :  { %3195 = vmatprep.mubr.msk.bf16.mxu1 %vm3714_vm0, %v3713_v0 }
 0xe66   :  { %v1613_v32 = vpop.f32.mrb[48].mxu1 }
 0xe67   :  { %1619 = vst.msk [vmem:[#allocation2] sm:$0xff] %vm331_vm2, %v1613_v32  ;;  %v3097_v35 = vpop.f32.mrb[49].mxu1 }
 0xe68   :  { %v1616_v21 = vpop.f32.mrb[50].mxu1 }
 0xe69   :  { %v3098_v24 = vpop.f32.mrb[51].mxu1  ;;  %v3264_v21 = vld [vmem:[%s4588_s18 + $0x8] sm:$0xff]  }
 0xe6a   :  { %v3265_v24 = vld [vmem:[%s4590_s20] sm:$0xff]  }
 0xea7   :  { %v1725_v34 = vpop.f32.mrb[52].mxu1 }
 0xea8   :  { %1732 = vrot.lane.b32.xlu1 %v1725_v34, %s3726_s15  ;;  %v3109_v33 = vpop.f32.mrb[53].mxu1  ;;  %v3266_v34 = vld [vmem:[%s4590_s20 + $0x8] sm:$0xff]  }
 0xea9   :  { %v1728_v37 = vpop.f32.mrb[54].mxu1  ;;  %v3267_v33 = vld [vmem:[%s4590_s20 + $0x10] sm:$0xff]  }
 0xeaa   :  { %v3110_v36 = vpop.f32.mrb[55].mxu1  ;;  %v3268_v37 = vld [vmem:[%s4590_s20 + $0x18] sm:$0xff]  }
 0xeab   :  { %v3269_v36 = vld [vmem:[%s4590_s20 + $0x20] sm:$0xff]  }
 0xeaf   :  { %v1840_v38 = vpop.f32.mrb[56].mxu1 }
 0xeb0   :  { %1847 = vrot.lane.b32.xlu0 %v1840_v38, %s3727_s25  ;;  %v3121_v39 = vpop.f32.mrb[57].mxu1  ;;  %v3270_v38 = vld [vmem:[%s4590_s20 + $0x28] sm:$0xff]  }
 0xeb1   :  { %v1843_v40 = vpop.f32.mrb[58].mxu1 }
 0xeb2   :  { %v3122_v41 = vpop.f32.mrb[59].mxu1 }
 0xedc   :  { %v1955_v42 = vpop.f32.mrb[60].mxu1 }
 0xedd   :  { %1962 = vrot.lane.b32.xlu0 %v1955_v42, %s3728_s22  ;;  %v3133_v43 = vpop.f32.mrb[61].mxu1 }
 0xede   :  { %v1958_v44 = vpop.f32.mrb[62].mxu1 }
 0xedf   :  { %v3134_v45 = vpop.f32.mrb[63].mxu1 }
 0xef5   :  { %v2074_v46 = vpop.f32.mrb[64].mxu1 }
 0xef6   :  { %2080 = vst.msk [vmem:[#allocation2 + $0x8] sm:$0xff] %vm331_vm2, %v2074_v46  ;;  %v3145_v47 = vpop.f32.mrb[65].mxu1 }
 0xef7   :  { %v2077_v48 = vpop.f32.mrb[66].mxu1  ;;  %v2851_v47 = vld [vmem:[#allocation17] ss:$0 sm:$0xff] }
 0xef8   :  { %v3146_v49 = vpop.f32.mrb[67].mxu1 }
 0xefd   :  { %v2185_v51 = vpop.f32.mrb[68].mxu1 }
 0xefe   :  { %2192 = vrot.lane.b32.xlu1 %v2185_v51, %s3726_s15  ;;  %v3157_v52 = vpop.f32.mrb[69].mxu1 }
 0xeff   :  { %v2188_v53 = vpop.f32.mrb[70].mxu1  ;;  %v2852_v52 = vld [vmem:[#allocation18] ss:$0 sm:$0xff] }
 0xf00   :  { %v3158_v54 = vpop.f32.mrb[71].mxu1 }
 0xf05   :  { %v2300_v57 = vpop.f32.mrb[72].mxu1 }
 0xf06   :  { %2307 = vrot.lane.b32.xlu1 %v2300_v57, %s3727_s25  ;;  %v3169_v58 = vpop.f32.mrb[73].mxu1  ;;  %v3271_v57 = vld [vmem:[%s4590_s20 + $0x30] sm:$0xff]  }
 0xf07   :  { %v2303_v50 = vpop.f32.mrb[74].mxu1  ;;  %v3272_v58 = vld [vmem:[%s4590_s20 + $0x38] sm:$0xff]   ;;  %s3729_s20 = smov [#allocation26]  }
 0xf08   :  { %v3170_v59 = vpop.f32.mrb[75].mxu1  ;;  %v2853_v50 = vld [vmem:[#allocation20] ss:$0 sm:$0xff]  ;;  %s2778_s23 = sshll.u32 %s3729_s20, 4  ;;  %s2779_s23 = int_to_ptr.vmem [resolvable:$true] %s2778_s23 }
 0xf09   :  { %s3657_s28 = scalar_lea.vmem %s2779_s23, 256  ;;  %p3662_p1 = scmp.lt.s32.totalorder %s2779_s23, %s2779_s23 }
 0xf0a   :  { %p3658_p0 = scmp.ne.s32.totalorder %s2779_s23, %s3657_s28  ;;  %p3663_p2 = scmp.lt.s32.totalorder %s3657_s28, %s3657_s28 }
 0xf0c   :  { %p3664_p3 = por %p3663_p2, %p3662_p1 }
 0xf0d   :  { %v2415_v60 = vpop.f32.mrb[76].mxu1 }
 0xf0e   :  { %2422 = vrot.lane.b32.xlu1 %v2415_v60, %s3728_s22  ;;  %v3181_v61 = vpop.f32.mrb[77].mxu1  ;;  %p3665_p4 = pnand %p3664_p3, %p3658_p0 }
 0xf0f   :  { %v2418_v62 = vpop.f32.mrb[78].mxu1 }
 0xf10   :  { %v3182_v63 = vpop.f32.mrb[79].mxu1 }
 0xf1a   :  { %v1733_v1 = vpop.permute.xlu1 %1732 }
 0xf1b   :  { %1735 = vst.msk [vmem:[#allocation2] sm:$0xff] %vm555_vm6, %v1733_v1 }
 0xf22   :  { %v1848_v2 = vpop.permute.xlu0 %1847 }
 0xf23   :  { %1850 = vst.msk [vmem:[#allocation2] sm:$0xff] %vm671_vm7, %v1848_v2 }
 0xf4f   :  { %v1963_v3 = vpop.permute.xlu0 %1962 }
 0xf50   :  { %1965 = vst.msk [vmem:[#allocation2] sm:$0xff] %vm787_vm8, %v1963_v3 }
 0xf57   :  { %v2426_v7 = vld [vmem:[#allocation2] sm:$0xff] }
 0xf70   :  { %v2193_v4 = vpop.permute.xlu1 %2192 }
 0xf71   :  { %2195 = vst.msk [vmem:[#allocation2 + $0x8] sm:$0xff] %vm555_vm6, %v2193_v4 }
 0xf78   :  { %v2308_v5 = vpop.permute.xlu1 %2307 }
 0xf79   :  { %2310 = vst.msk [vmem:[#allocation2 + $0x8] sm:$0xff] %vm671_vm7, %v2308_v5  ;;  %v2857_v5 = vld [vmem:[#allocation21] ss:$0 sm:$0xff] }
 0xf80   :  { %v2423_v6 = vpop.permute.xlu1 %2422 }
 0xf81   :  { %2425 = vst.msk [vmem:[#allocation2 + $0x8] sm:$0xff] %vm787_vm8, %v2423_v6 }
 0xf88   :  { %v2427_v8 = vld [vmem:[#allocation2 + $0x8] sm:$0xff] }
 0xf89   :  { %v2428_v9 = vpack.c.bf16 %v2427_v8, %v2426_v7 }
 0xf8b   :  { %3188 = vmatmul.mubr.msk.bf16.vlgmr.msra.gmra.mrb[64].mxu0 %vm274_vm1, %v2428_v9 }
 0xf8c   :  { %3215 = vmatprep.mubr.msk.bf16.mxu0 %vm3714_vm0, %v3713_v0  ;;  %3200 = vmatpush3.bf16.msra.mxu0 %v3265_v24 }
 0xf8d   :  { %3201 = vmatprep.subr.bf16.mxu0 %v3713_v0 }
 0xf90   :  { %3202 = vmatpush3.bf16.msra.mxu0 %v3266_v34 }
 0xf91   :  { %3203 = vmatprep.subr.bf16.mxu0 %v3713_v0 }
 0xf94   :  { %3204 = vmatpush3.bf16.msra.mxu0 %v3267_v33  ;;  %v2867_v33 = vld [vmem:[#allocation24] ss:$0 sm:$0xff] }
 0xf95   :  { %3205 = vmatprep.subr.bf16.mxu0 %v3713_v0 }
 0xf98   :  { %3206 = vmatpush3.bf16.msra.mxu0 %v3268_v37 }
 0xf99   :  { %3207 = vmatprep.subr.bf16.mxu0 %v3713_v0 }
 0xf9c   :  { %3208 = vmatpush3.bf16.msra.mxu0 %v3269_v36 }
 0xf9d   :  { %3209 = vmatprep.subr.bf16.mxu0 %v3713_v0 }
 0xfa0   :  { %3210 = vmatpush3.bf16.msra.mxu0 %v3270_v38 }
 0xfa1   :  { %3211 = vmatprep.subr.bf16.mxu0 %v3713_v0 }
 0xfa4   :  { %3212 = vmatpush3.bf16.msra.mxu0 %v3271_v57 }
 0xfa5   :  { %3213 = vmatprep.subr.bf16.mxu0 %v3713_v0 }
 0xfa8   :  { %3214 = vmatpush3.bf16.msra.mxu0 %v3272_v58 }
0x105e   :  { %v2489_v10 = vpop.f32.mrb[64].mxu0 }
0x105f   :  { %v2490_v12 = vadd.f32 %v2847_v11, %v2489_v10  ;;  %v3189_v13 = vpop.f32.mrb[65].mxu0 }
0x1060   :  { %v2492_v14 = vpop.f32.mrb[66].mxu0 }
0x1061   :  { %v2493_v16 = vadd.f32 %v2847_v11, %v2492_v14  ;;  %v3190_v18 = vpop.f32.mrb[67].mxu0  ;;  %v2496_v17 = vadd.f32 %v2490_v12, %v4293_v27 }
0x1063   :  { %v2497_v19 = vadd.f32 %v2493_v16, %v4295_v28  ;;  %v2500_v20 = vsel %vm274_vm1, %v2496_v17, 0.0  ;;  %v3263_v28 = vld [vmem:[%s4588_s18] sm:$0xff]  }
0x1064   :  { %2501 = vadd.xlane.f32.xlu0 %v2500_v20  ;;  %3192 = vmatpush3.bf16.msra.mxu1 %v3263_v28 }
0x1065   :  { %v2503_v15 = vsel %vm274_vm1, %v2497_v19, 0.0  ;;  %3193 = vmatprep.subr.bf16.mxu1 %v3713_v0 }
0x1066   :  { %2504 = vadd.xlane.f32.xlu1 %v2503_v15 }
0x1068   :  { %3194 = vmatpush3.bf16.msra.mxu1 %v3264_v21  ;;  %v2866_v21 = vld [vmem:[#allocation23] ss:$0 sm:$0xff] }
0x10f1   :  { %v2502_v22 = vpop.xlane.xlu0 %2501 }
0x10f2   :  { %v2506_v23 = vmul.f32 0.03125, %v2502_v22 }
0x10f3   :  { %v2505_v25 = vpop.xlane.xlu1 %2504 }
0x10f4   :  { %v2508_v26 = vsub.f32 %v2496_v17, %v2506_v23  ;;  %v2507_v29 = vmul.f32 0.03125, %v2505_v25 }
0x10f6   :  { %v2509_v30 = vsub.f32 %v2497_v19, %v2507_v29  ;;  %v2510_v31 = vmul.f32 %v2508_v26, %v2508_v26 }
0x10f8   :  { %v2512_v32 = vsel %vm274_vm1, %v2510_v31, 0.0  ;;  %v2511_v35 = vmul.f32 %v2509_v30, %v2509_v30 }
0x10f9   :  { %2513 = vadd.xlane.f32.xlu0 %v2512_v32 }
0x10fa   :  { %v2515_v27 = vsel %vm274_vm1, %v2511_v35, 0.0 }
0x10fd   :  { %2516 = vadd.xlane.f32.xlu0 %v2515_v27 }
0x1186   :  { %v2514_v39 = vpop.xlane.xlu0 %2513 }
0x1187   :  { %v2518_v40 = vmul.f32 0.03125, %v2514_v39 }
0x1189   :  { %v2520_v41 = vadd.f32 1e-05, %v2518_v40 }
0x118a   :  { %v2517_v42 = vpop.xlane.xlu0 %2516 }
0x118b   :  { %3341 = vrsqrt.f32 %v2520_v41  ;;  %v2519_v43 = vmul.f32 0.03125, %v2517_v42 }
0x118d   :  { %v2521_v44 = vadd.f32 1e-05, %v2519_v43 }
0x118f   :  { %3343 = vrsqrt.f32 %v2521_v44 }
0x1195   :  { %v3342_v45 = vpop.eup %3341 }
0x1196   :  { %v2524_v46 = vmul.f32 %v3342_v45, %v2508_v26 }
0x1198   :  { %v2532_v49 = vmul.f32 %v2851_v47, %v2524_v46 }
0x1199   :  { %v3344_v48 = vpop.eup %3343 }
0x119a   :  { %v2525_v51 = vmul.f32 %v3344_v48, %v2509_v30  ;;  %v2540_v54 = vadd.f32 %v2852_v52, %v2532_v49 }
0x119c   :  { %v2533_v53 = vmul.f32 %v2851_v47, %v2525_v51 }
0x119e   :  { %v2541_v55 = vadd.f32 %v2852_v52, %v2533_v53 }
0x11a0   :  { %v2542_v56 = vpack.c.bf16 %v2541_v55, %v2540_v54 }
0x11a2   :  { %3196 = vmatmul.mubr.msk.bf16.vlgmr.msra.gmra.mrb[80].mxu1 %vm274_vm1, %v2542_v56 }
0x1275   :  { %v2603_v59 = vpop.f32.mrb[80].mxu1 }
0x1276   :  { %v2604_v60 = vadd.f32 %v2853_v50, %v2603_v59  ;;  %v3197_v61 = vpop.f32.mrb[81].mxu1 }
0x1277   :  { %v2606_v62 = vpop.f32.mrb[82].mxu1 }
0x1278   :  { %v2607_v63 = vadd.f32 %v2853_v50, %v2606_v62  ;;  %v3198_v1 = vpop.f32.mrb[83].mxu1  ;;  %v2610_v2 = vmax.f32 %v2604_v60, 0.0 }
0x127a   :  { %v2611_v3 = vmax.f32 %v2607_v63, 0.0 }
0x127c   :  { %v2612_v4 = vpack.c.bf16 %v2611_v3, %v2610_v2 }
0x127e   :  { %3216 = vmatmul.mubr.bf16.vlgmr.msra.gmra.mrb[68].mxu0 %v2612_v4 }
0x1351   :  { %v2718_v6 = vpop.f32.mrb[68].mxu0 }
0x1352   :  { %v2719_v7 = vadd.f32 %v2857_v5, %v2718_v6  ;;  %v3217_v0 = vpop.f32.mrb[69].mxu0 }
0x1353   :  { %v2721_v8 = vpop.f32.mrb[70].mxu0 }
0x1354   :  { %v2725_v9 = vadd.f32 %v2719_v7, %v2540_v54  ;;  %v2722_v11 = vadd.f32 %v2857_v5, %v2721_v8  ;;  %v3218_v10 = vpop.f32.mrb[71].mxu0 }
0x1356   :  { %v2729_v12 = vsel %vm274_vm1, %v2725_v9, 0.0  ;;  %v2726_v13 = vadd.f32 %v2722_v11, %v2541_v55 }
0x1357   :  { %2730 = vadd.xlane.f32.xlu1 %v2729_v12 }
0x1358   :  { %v2732_v14 = vsel %vm274_vm1, %v2726_v13, 0.0 }
0x1359   :  { %2733 = vadd.xlane.f32.xlu0 %v2732_v14 }
0x13e4   :  { %v2731_v16 = vpop.xlane.xlu1 %2730 }
0x13e5   :  { %v2735_v18 = vmul.f32 0.03125, %v2731_v16 }
0x13e6   :  { %v2734_v17 = vpop.xlane.xlu0 %2733 }
0x13e7   :  { %v2737_v19 = vsub.f32 %v2725_v9, %v2735_v18  ;;  %v2736_v20 = vmul.f32 0.03125, %v2734_v17 }
0x13e9   :  { %v2738_v15 = vsub.f32 %v2726_v13, %v2736_v20  ;;  %v2739_v22 = vmul.f32 %v2737_v19, %v2737_v19 }
0x13eb   :  { %v2741_v23 = vsel %vm274_vm1, %v2739_v22, 0.0  ;;  %v2740_v25 = vmul.f32 %v2738_v15, %v2738_v15 }
0x13ec   :  { %2742 = vadd.xlane.f32.xlu1 %v2741_v23 }
0x13ed   :  { %v2744_v26 = vsel %vm274_vm1, %v2740_v25, 0.0 }
0x13ee   :  { %2745 = vadd.xlane.f32.xlu0 %v2744_v26 }
0x1479   :  { %v2743_v29 = vpop.xlane.xlu1 %2742 }
0x147a   :  { %v2747_v30 = vmul.f32 0.03125, %v2743_v29 }
0x147b   :  { %v2746_v31 = vpop.xlane.xlu0 %2745 }
0x147c   :  { %v2749_v32 = vadd.f32 1e-05, %v2747_v30  ;;  %v2748_v35 = vmul.f32 0.03125, %v2746_v31 }
0x147e   :  { %3345 = vrsqrt.f32 %v2749_v32  ;;  %v2750_v27 = vadd.f32 1e-05, %v2748_v35 }
0x1480   :  { %3347 = vrsqrt.f32 %v2750_v27 }
0x1488   :  { %v3346_v28 = vpop.eup %3345 }
0x1489   :  { %v2753_v24 = vmul.f32 %v3346_v28, %v2737_v19 }
0x148a   :  { %v3348_v34 = vpop.eup %3347 }
0x148b   :  { %v2761_v37 = vmul.f32 %v2866_v21, %v2753_v24  ;;  %v2754_v36 = vmul.f32 %v3348_v34, %v2738_v15 }
0x148d   :  { %v2762_v38 = vmul.f32 %v2866_v21, %v2754_v36  ;;  %v2769_v39 = vadd.f32 %v2867_v33, %v2761_v37 }
0x148f   :  { %v2770_v40 = vadd.f32 %v2867_v33, %v2762_v38  ;;  %2771 = vst.msk [vmem:[#allocation26] sm:$0xff] %vm274_vm1, %v2769_v39 }
0x1491   :  { %2772 = vst.msk [vmem:[#allocation26 + $0x8] sm:$0xff] %vm274_vm1, %v2770_v40 }
0x1492   :  { %3668 = shalt.err (!%p3665_p4)
}
0x1493   :  { %s3669_s10 = scalar_lea.hbm %s4594_s24, 256 }
0x1494   :  { %p3670_p5 = scmp.ne.s32.totalorder %s4594_s24, %s3669_s10  ;;  %p3673_p6 = scmp.lt.u32.totalorder %s3669_s10, %s4594_s24 }
0x1496   :  { %p3675_p7 = pnand %p3673_p6, %p3670_p5 }
0x1498   :  { %3678 = shalt.err (!%p3675_p7)
}
0x1499   :  { %s3730_s17 = smov 128  }
0x149a   :  { %2784 = dma.vmem_to_hbm [thread:$0]  %s2779_s23, 256, %s4594_s24, [#allocation5], %s3730_s17, %s3730_s17, %s3726_s15  }
0x149b   :  { %3695 = dma.done.wait [#allocation5], 256  }
0x149c   :  { %3696 = vsyncadd [#allocation5], 4294967040 }
0x149d   :  { %2788 = vsyncpa [#allocation4], 1 }
0x149e   :  { %2789 = vsyncpa [#allocation7], 1 }
0x149f   :  { %2790 = vsyncpa [#allocation10], 1 }
0x14a0   :  { %2791 = vsyncpa [#allocation13], 1 }
0x14a1   :  { %2792 = vsyncpa [#allocation16], 1 }
0x14a2   :  { %2793 = vsyncpa [#allocation19], 1 }
0x14a3   :  { %2794 = vsyncpa [#allocation22], 1 }
0x14a4   :  { %2795 = vsyncpa [#allocation25], 1 }
0x14a5   :  { %2796 = vsyncpa [#allocation5], 1 }

</bundles_post_ra>
